<compile_context>
chip_gen: v5e
topology: v5e:2x2
jax: 0.10.0
libtpu: 0.0.40
codegen_flags: <defaults>
</compile_context>

<pallas_src>
import functools

import jax
import jax.numpy as jnp
from jax import lax
from jax.experimental import pallas as pl
from jax.experimental.pallas import tpu as pltpu


# ----------------------------------------------------------------------------
# Fused Pallas kernel: 6 (de)conv layers + gram_diagonal_overload (minus eps*I)
# ----------------------------------------------------------------------------
def _fused_kernel(x_ref,
                  w1_ref, b1_ref, w2_ref, b2_ref, w3_ref, b3_ref,
                  w4_ref, b4_ref, w5_ref, b5_ref, w6_ref, b6_ref,
                  out_ref,
                  a3, a4, a5,
                  *, alpha, n, batch_block):
    f32 = jnp.float32
    bf16 = jnp.bfloat16

    def layer(sv, w_ref, b_ref, act):
        # sv: bf16 value (R, Win*Cin) -> f32 value (R-1, Wout*Cout).
        # One MXU matmul per kernel row against the banded weights; bf16 operands,
        # f32 accumulation / bias / LeakyReLU epilogue (v5e-friendly).
        hout = sv.shape[0] - 1
        acc = jnp.dot(sv[0:hout], w_ref[0], preferred_element_type=f32)
        acc = acc + jnp.dot(sv[1:hout + 1], w_ref[1], preferred_element_type=f32)
        acc = acc + b_ref[...]
        if act:
            acc = jnp.where(acc > 0, acc, f32(alpha) * acc)      # LeakyReLU
        return acc

    # Zero the H-padding rows (top/bottom) of the buffers feeding transposed convs.
    for buf in (a3, a4, a5):
        z = jnp.zeros((1, buf.shape[1]), buf.dtype)
        buf[0:1, :] = z
        buf[buf.shape[0] - 1:buf.shape[0], :] = z

    dn = (((0,), (0,)), ((), ()))       # contract dim 0 of both => lhs^T @ rhs

    for b in range(batch_block):        # static unroll; weights stay resident
        xv = x_ref[b]                                                   # bf16 (2N, N*tau)
        y1 = layer(xv, w1_ref, b1_ref, True)                            # conv1
        y2 = layer(y1.astype(bf16), w2_ref, b2_ref, True)               # conv2
        a3[1:a3.shape[0] - 1, :] = layer(y2.astype(bf16), w3_ref, b3_ref, True)            # conv3
        a4[1:a4.shape[0] - 1, :] = layer(a3[...].astype(bf16), w4_ref, b4_ref, True)       # deconv1
        a5[1:a5.shape[0] - 1, :] = layer(a4[...].astype(bf16), w5_ref, b5_ref, True)       # deconv2
        # TODO(synk): nn.Dropout(0.2) is treated as identity (inference semantics).
        rx = layer(a5[...].astype(bf16), w6_ref, b6_ref, False)         # deconv3: (2N, N) = [A; B]

        # gram_diagonal_overload (eps*I added in the wrapper):
        #   Re(Rz) = A^T A + B^T B = rx^T rx,   Im(Rz) = A^T B - B^T A.
        rz_r = lax.dot_general(rx, rx, dn, preferred_element_type=f32)
        rz_i = (lax.dot_general(rx[0:n], rx[n:2 * n], dn, preferred_element_type=f32)
                - lax.dot_general(rx[n:2 * n], rx[0:n], dn, preferred_element_type=f32))

        base = 2 * n * b
        out_ref[:, base:base + n] = rz_r          # real part for image b
        out_ref[:, base + n:base + 2 * n] = rz_i  # imag part for image b


# ----------------------------------------------------------------------------
# Banded ("Toeplitz") weight construction for the (H, W*C) layout
# ----------------------------------------------------------------------------
def _band(win, wout, shift):
    """(win, wout) selection matrix with 1.0 where wi == wo + shift."""
    wi = jnp.arange(win)[:, None]
    wo = jnp.arange(wout)[None, :]
    return (wi == wo + shift).astype(jnp.float32)


def _conv_big(w_oihw, win):
    """nn.Conv2d weight (Cout, Cin, 2, 2) -> (2, Win*Cin, (Win-1)*Cout)."""
    wout = win - 1
    mats = []
    for kh in range(2):
        m = sum(jnp.kron(_band(win, wout, kw), w_oihw[:, :, kh, kw].T)
                for kw in range(2))
        mats.append(m)
    return jnp.stack(mats, axis=0)


def _deconv_big(w_iohw, win):
    """nn.ConvTranspose2d weight (Cin, Cout, 2, 2) -> (2, Win*Cin, (Win+1)*Cout).

    Transposed conv (k=2, stride=1) == conv over the zero-padded input with the
    spatially flipped kernel; the W padding and flip are folded into the band.
    """
    wout = win + 1
    mats = []
    for kh in range(2):
        m = sum(jnp.kron(_band(win, wout, kw - 1), w_iohw[:, :, 1 - kh, 1 - kw])
                for kw in range(2))
        mats.append(m)
    return jnp.stack(mats, axis=0)


def init_params(key, tau, n):
    """Deterministic PyTorch-layout weights + banded versions for the fused kernel."""
    shapes = {
        "conv1_w": (16, tau, 2, 2), "conv1_b": (16,),
        "conv2_w": (32, 16, 2, 2), "conv2_b": (32,),
        "conv3_w": (64, 32, 2, 2), "conv3_b": (64,),
        "deconv1_w": (64, 32, 2, 2), "deconv1_b": (32,),
        "deconv2_w": (32, 16, 2, 2), "deconv2_b": (16,),
        "deconv3_w": (16, 1, 2, 2), "deconv3_b": (1,),
    }
    keys = jax.random.split(key, len(shapes))
    raw = {name: 0.1 * jax.random.normal(k, shp, jnp.float32)
           for k, (name, shp) in zip(keys, shapes.items())}

    win = [n, n - 1, n - 2, n - 3, n - 2, n - 1]          # input width per layer
    bigw = [
        _conv_big(raw["conv1_w"], win[0]),
        _conv_big(raw["conv2_w"], win[1]),
        _conv_big(raw["conv3_w"], win[2]),
        _deconv_big(raw["deconv1_w"], win[3]),
        _deconv_big(raw["deconv2_w"], win[4]),
        _deconv_big(raw["deconv3_w"], win[5]),
    ]
    wout = [win[0] - 1, win[1] - 1, win[2] - 1, win[3] + 1, win[4] + 1, win[5] + 1]
    biases = [raw["conv1_b"], raw["conv2_b"], raw["conv3_b"],
              raw["deconv1_b"], raw["deconv2_b"], raw["deconv3_b"]]

    params = {}
    for i in range(6):
        params[f"w{i + 1}"] = bigw[i].astype(jnp.bfloat16)                  # bf16 MXU operands
        params[f"b{i + 1}"] = jnp.tile(biases[i], wout[i]).reshape(1, -1)   # f32, tiled over W
    return params, raw


# ----------------------------------------------------------------------------
# Forward pass (DeepRootMUSIC.forward)
# ----------------------------------------------------------------------------
def _pick_batch_block(batch):
    # Keep the grid length >= 2 (both v7x TensorCores busy) while amortizing the
    # per-grid-step overhead over several images.
    if batch <= 1:
        return 1
    return min(8, max(1, batch // 2))


def deep_root_music_forward(Rx_tau, params, activation_value, eps=1.0, batch_block=None):
    """Rx_tau: [B, tau, 2N, N] float32 (PyTorch NCHW). Returns Rz [B, N, N] complex64."""
    B, tau, H2N, N = Rx_tau.shape
    assert H2N == 2 * N, "expected input of shape [B, tau, 2N, N]"

    bblk = _pick_batch_block(B) if batch_block is None else int(batch_block)
    nblk = pl.cdiv(B, bblk)
    bpad = nblk * bblk

    # (H, W*C) layout, pre-cast to bf16 so layer-1 MXU operands arrive ready.
    x = jnp.transpose(Rx_tau, (0, 2, 3, 1)).reshape(B, H2N, N * tau).astype(jnp.bfloat16)
    if bpad != B:
        x = jnp.pad(x, ((0, bpad - B), (0, 0), (0, 0)))

    ws = [params[f"w{i}"] for i in range(1, 7)]
    bs = [params[f"b{i}"] for i in range(1, 7)]

    in_specs = [pl.BlockSpec((bblk, H2N, N * tau), lambda i: (i, 0, 0))]
    operands = [x]
    for w, bias in zip(ws, bs):
        # Resident weights/biases (constant index maps).
        # TODO(synk): when scaling N, single-buffer these resident blocks
        # (pipeline_mode=pl.Buffered(1)) — the banded w3/w4 grow O(N^2*Cin*Cout).
        in_specs.append(pl.BlockSpec(w.shape, lambda i: (0, 0, 0)))
        in_specs.append(pl.BlockSpec(bias.shape, lambda i: (0, 0)))
        operands.append(w)
        operands.append(bias)

    lane_w = [w.shape[2] for w in ws]                     # Wout*Cout per layer
    # Only the buffers feeding transposed convs need VMEM scratch (zero H-pad rows);
    # conv1/conv2 outputs stay as values.
    scratch_shapes = [
        pltpu.VMEM((H2N - 1, lane_w[2]), jnp.float32),    # conv3 out  (H-padded)
        pltpu.VMEM((H2N,     lane_w[3]), jnp.float32),    # deconv1 out (H-padded)
        pltpu.VMEM((H2N + 1, lane_w[4]), jnp.float32),    # deconv2 out (H-padded)
    ]

    kernel = functools.partial(_fused_kernel, alpha=float(activation_value),
                               n=N, batch_block=bblk)
    out = pl.pallas_call(
        kernel,
        out_shape=jax.ShapeDtypeStruct((nblk, N, bblk * 2 * N), jnp.float32),
        grid=(nblk,),
        in_specs=in_specs,
        out_specs=pl.BlockSpec((None, N, bblk * 2 * N), lambda i: (i, 0, 0)),
        scratch_shapes=scratch_shapes,
        compiler_params=pltpu.CompilerParams(
            dimension_semantics=("parallel",),
            vmem_limit_bytes=32 * 1024 * 1024,
        ),
    )(*operands)

    # Unpack the lane-dense per-step slab back to (B, N, 2N); add eps*I here
    # (hoisted out of the kernel).
    out = (out.reshape(nblk, N, bblk, 2 * N)
              .transpose(0, 2, 1, 3)
              .reshape(bpad, N, 2 * N)[:B])
    rz_r = out[:, :, :N] + eps * jnp.eye(N, dtype=out.dtype)
    rz_i = out[:, :, N:]
    Rz = lax.complex(rz_r, rz_i)
    # TODO(synk): root_music (complex eigendecomposition + polynomial root finding,
    # plus self.M which is never set in __init__) has no Pallas/TPU equivalent;
    # only the surrogate covariance Rz is returned.
    return Rz


# ----------------------------------------------------------------------------
# Pure-JAX f32 reference (for numerical validation)
# ----------------------------------------------------------------------------
def _reference_forward(Rx_tau, raw, activation_value, eps):
    alpha = activation_value
    dnums = ("NCHW", "OIHW", "NCHW")

    def lrelu(v):
        return jnp.where(v > 0, v, alpha * v)

    def conv(v, w, b):
        y = lax.conv_general_dilated(v, w, (1, 1), "VALID", dimension_numbers=dnums)
        return y + b[None, :, None, None]

    def deconv(v, w, b):
        wf = jnp.transpose(jnp.flip(w, (2, 3)), (1, 0, 2, 3))   # (Cout, Cin, kh, kw)
        vp = jnp.pad(v, ((0, 0), (0, 0), (1, 1), (1, 1)))
        y = lax.conv_general_dilated(vp, wf, (1, 1), "VALID", dimension_numbers=dnums)
        return y + b[None, :, None, None]

    x = lrelu(conv(Rx_tau, raw["conv1_w"], raw["conv1_b"]))
    x = lrelu(conv(x, raw["conv2_w"], raw["conv2_b"]))
    x = lrelu(conv(x, raw["conv3_w"], raw["conv3_b"]))
    x = lrelu(deconv(x, raw["deconv1_w"], raw["deconv1_b"]))
    x = lrelu(deconv(x, raw["deconv2_w"], raw["deconv2_b"]))
    rx = deconv(x, raw["deconv3_w"], raw["deconv3_b"])[:, 0]     # (B, 2N, N)
    n = rx.shape[-1]
    a, b_ = rx[:, :n, :], rx[:, n:, :]
    kx = a + 1j * b_
    return jnp.einsum("bij,bik->bjk", jnp.conj(kx), kx) + eps * jnp.eye(n)


# ----------------------------------------------------------------------------
if __name__ == "__main__":
    key = jax.random.PRNGKey(0)
    k_in, k_par = jax.random.split(key)

    B, tau, N = 4, 4, 8
    Rx_tau = jax.random.normal(k_in, (B, tau, 2 * N, N), jnp.float32)
    params, raw = init_params(k_par, tau, N)

    activation_value = 0.5
    fwd = jax.jit(functools.partial(deep_root_music_forward,
                                    activation_value=activation_value))
    Rz = fwd(Rx_tau, params)
    jax.block_until_ready(Rz)
    assert Rz.shape == (B, N, N) and Rz.dtype == jnp.complex64

    # Numerical check against the pure-JAX f32 reference (bf16 MXU operands in the
    # kernel -> compare relative to the largest reference magnitude).
    Rz_ref = _reference_forward(Rx_tau, raw, activation_value, eps=1.0)
    err = float(jnp.max(jnp.abs(Rz - Rz_ref)))
    scale = float(jnp.max(jnp.abs(Rz_ref)))
    assert err <= 8e-2 * max(1.0, scale), f"numerical mismatch: err={err} scale={scale}"

    print("KERNEL_OK")
</pallas_src>

<mosaic_0001>
module attributes {stable_mosaic.version = 11 : i64} {
  func.func @_fused_kernel(%arg0: i32, %arg1: memref<2x16x32xbf16, #tpu.memory_space<vmem>>, %arg2: memref<2x32x112xbf16, #tpu.memory_space<vmem>>, %arg3: memref<1x112xf32, #tpu.memory_space<vmem>>, %arg4: memref<2x112x192xbf16, #tpu.memory_space<vmem>>, %arg5: memref<1x192xf32, #tpu.memory_space<vmem>>, %arg6: memref<2x192x320xbf16, #tpu.memory_space<vmem>>, %arg7: memref<1x320xf32, #tpu.memory_space<vmem>>, %arg8: memref<2x320x192xbf16, #tpu.memory_space<vmem>>, %arg9: memref<1x192xf32, #tpu.memory_space<vmem>>, %arg10: memref<2x192x112xbf16, #tpu.memory_space<vmem>>, %arg11: memref<1x112xf32, #tpu.memory_space<vmem>>, %arg12: memref<2x112x8xbf16, #tpu.memory_space<vmem>>, %arg13: memref<1x8xf32, #tpu.memory_space<vmem>>, %arg14: memref<1x8x32xf32, #tpu.memory_space<vmem>>, %arg15: memref<15x320xf32, #tpu.memory_space<vmem>>, %arg16: memref<16x192xf32, #tpu.memory_space<vmem>>, %arg17: memref<17x112xf32, #tpu.memory_space<vmem>>) attributes {dimension_semantics = [#tpu.dimension_semantics<parallel>], iteration_bounds = array<i64: 2>, scalar_prefetch = 0 : i64, scratch_operands = 3 : i64, tpu.core_type = #tpu.core_type<tc>, window_params = [{transform_indices = @transform_0, window_bounds = array<i64: 2, 16, 32>}, {pipeline_mode = #tpu.pipeline_mode<synchronous>, transform_indices = @transform_1, window_bounds = array<i64: 2, 32, 112>}, {pipeline_mode = #tpu.pipeline_mode<synchronous>, transform_indices = @transform_2, window_bounds = array<i64: 1, 112>}, {pipeline_mode = #tpu.pipeline_mode<synchronous>, transform_indices = @transform_3, window_bounds = array<i64: 2, 112, 192>}, {pipeline_mode = #tpu.pipeline_mode<synchronous>, transform_indices = @transform_4, window_bounds = array<i64: 1, 192>}, {pipeline_mode = #tpu.pipeline_mode<synchronous>, transform_indices = @transform_5, window_bounds = array<i64: 2, 192, 320>}, {pipeline_mode = #tpu.pipeline_mode<synchronous>, transform_indices = @transform_6, window_bounds = array<i64: 1, 320>}, {pipeline_mode = #tpu.pipeline_mode<synchronous>, transform_indices = @transform_7, window_bounds = array<i64: 2, 320, 192>}, {pipeline_mode = #tpu.pipeline_mode<synchronous>, transform_indices = @transform_8, window_bounds = array<i64: 1, 192>}, {pipeline_mode = #tpu.pipeline_mode<synchronous>, transform_indices = @transform_9, window_bounds = array<i64: 2, 192, 112>}, {pipeline_mode = #tpu.pipeline_mode<synchronous>, transform_indices = @transform_10, window_bounds = array<i64: 1, 112>}, {pipeline_mode = #tpu.pipeline_mode<synchronous>, transform_indices = @transform_11, window_bounds = array<i64: 2, 112, 8>}, {pipeline_mode = #tpu.pipeline_mode<synchronous>, transform_indices = @transform_12, window_bounds = array<i64: 1, 8>}, {transform_indices = @transform_13, window_bounds = array<i64: 1, 8, 32>}]} {
    %cst = arith.constant 0.000000e+00 : f32
    %0 = vector.broadcast %cst : f32 to vector<1x320xf32>
    %c0 = arith.constant 0 : index
    %c0_0 = arith.constant 0 : index
    %1 = vector.load %arg15[%c0, %c0_0] : memref<15x320xf32, #tpu.memory_space<vmem>>, vector<1x320xf32>
    tpu.vector_store %arg15[%c0, %c0_0], %0 {strides = array<i32>} : memref<15x320xf32, #tpu.memory_space<vmem>>, vector<1x320xf32>,
    %c14 = arith.constant 14 : index
    %c0_1 = arith.constant 0 : index
    %2 = vector.load %arg15[%c14, %c0_1] : memref<15x320xf32, #tpu.memory_space<vmem>>, vector<1x320xf32>
    tpu.vector_store %arg15[%c14, %c0_1], %0 {strides = array<i32>} : memref<15x320xf32, #tpu.memory_space<vmem>>, vector<1x320xf32>,
    %cst_2 = arith.constant 0.000000e+00 : f32
    %3 = vector.broadcast %cst_2 : f32 to vector<1x192xf32>
    %c0_3 = arith.constant 0 : index
    %c0_4 = arith.constant 0 : index
    %4 = vector.load %arg16[%c0_3, %c0_4] : memref<16x192xf32, #tpu.memory_space<vmem>>, vector<1x192xf32>
    tpu.vector_store %arg16[%c0_3, %c0_4], %3 {strides = array<i32>} : memref<16x192xf32, #tpu.memory_space<vmem>>, vector<1x192xf32>,
    %c15 = arith.constant 15 : index
    %c0_5 = arith.constant 0 : index
    %5 = vector.load %arg16[%c15, %c0_5] : memref<16x192xf32, #tpu.memory_space<vmem>>, vector<1x192xf32>
    tpu.vector_store %arg16[%c15, %c0_5], %3 {strides = array<i32>} : memref<16x192xf32, #tpu.memory_space<vmem>>, vector<1x192xf32>,
    %cst_6 = arith.constant 0.000000e+00 : f32
    %6 = vector.broadcast %cst_6 : f32 to vector<1x112xf32>
    %c0_7 = arith.constant 0 : index
    %c0_8 = arith.constant 0 : index
    %7 = vector.load %arg17[%c0_7, %c0_8] : memref<17x112xf32, #tpu.memory_space<vmem>>, vector<1x112xf32>
    tpu.vector_store %arg17[%c0_7, %c0_8], %6 {strides = array<i32>} : memref<17x112xf32, #tpu.memory_space<vmem>>, vector<1x112xf32>,
    %c16 = arith.constant 16 : index
    %c0_9 = arith.constant 0 : index
    %8 = vector.load %arg17[%c16, %c0_9] : memref<17x112xf32, #tpu.memory_space<vmem>>, vector<1x112xf32>
    tpu.vector_store %arg17[%c16, %c0_9], %6 {strides = array<i32>} : memref<17x112xf32, #tpu.memory_space<vmem>>, vector<1x112xf32>,
    %c0_10 = arith.constant 0 : index
    %c0_11 = arith.constant 0 : index
    %c0_12 = arith.constant 0 : index
    %9 = vector.load %arg1[%c0_10, %c0_11, %c0_12] : memref<2x16x32xbf16, #tpu.memory_space<vmem>>, vector<1x16x32xbf16>
    %10 = vector.shape_cast %9 : vector<1x16x32xbf16> to vector<16x32xbf16>
    %11 = vector.extract_strided_slice %10 {offsets = [0, 0], sizes = [15, 32], strides = [1, 1]} : vector<16x32xbf16> to vector<15x32xbf16>
    %c0_13 = arith.constant 0 : index
    %c0_14 = arith.constant 0 : index
    %c0_15 = arith.constant 0 : index
    %12 = vector.load %arg2[%c0_13, %c0_14, %c0_15] : memref<2x32x112xbf16, #tpu.memory_space<vmem>>, vector<1x32x112xbf16>
    %13 = vector.shape_cast %12 : vector<1x32x112xbf16> to vector<32x112xbf16>
    %cst_16 = arith.constant dense<0.000000e+00> : vector<15x112xf32>
    %14 = tpu.matmul %11, %13, %cst_16 {dimension_numbers = #tpu.dot_dimension_numbers<[1], [0], [0], [1], [0, 0, 1, 1], [], []>} : vector<15x32xbf16>, vector<32x112xbf16>, vector<15x112xf32> -> vector<15x112xf32>
    %15 = vector.extract_strided_slice %10 {offsets = [1, 0], sizes = [15, 32], strides = [1, 1]} : vector<16x32xbf16> to vector<15x32xbf16>
    %c1 = arith.constant 1 : index
    %c0_17 = arith.constant 0 : index
    %c0_18 = arith.constant 0 : index
    %16 = vector.load %arg2[%c1, %c0_17, %c0_18] : memref<2x32x112xbf16, #tpu.memory_space<vmem>>, vector<1x32x112xbf16>
    %17 = vector.shape_cast %16 : vector<1x32x112xbf16> to vector<32x112xbf16>
    %cst_19 = arith.constant dense<0.000000e+00> : vector<15x112xf32>
    %18 = tpu.matmul %15, %17, %cst_19 {dimension_numbers = #tpu.dot_dimension_numbers<[1], [0], [0], [1], [0, 0, 1, 1], [], []>} : vector<15x32xbf16>, vector<32x112xbf16>, vector<15x112xf32> -> vector<15x112xf32>
    %19 = arith.addf %14, %18 : vector<15x112xf32>
    %c0_20 = arith.constant 0 : index
    %c0_21 = arith.constant 0 : index
    %20 = vector.load %arg3[%c0_20, %c0_21] : memref<1x112xf32, #tpu.memory_space<vmem>>, vector<1x112xf32>
    %21 = vector.broadcast %20 : vector<1x112xf32> to vector<15x112xf32>
    %22 = arith.addf %19, %21 : vector<15x112xf32>
    %cst_22 = arith.constant 0.000000e+00 : f32
    %23 = vector.broadcast %cst_22 : f32 to vector<15x112xf32>
    %24 = arith.cmpf ogt, %22, %23 : vector<15x112xf32>
    %cst_23 = arith.constant 5.000000e-01 : f32
    %25 = vector.broadcast %cst_23 : f32 to vector<15x112xf32>
    %26 = arith.mulf %25, %22 : vector<15x112xf32>
    %27 = arith.select %24, %22, %26 : vector<15x112xi1>, vector<15x112xf32>
    %28 = arith.truncf %27 : vector<15x112xf32> to vector<15x112xbf16>
    %29 = vector.extract_strided_slice %28 {offsets = [0, 0], sizes = [14, 112], strides = [1, 1]} : vector<15x112xbf16> to vector<14x112xbf16>
    %c0_24 = arith.constant 0 : index
    %c0_25 = arith.constant 0 : index
    %c0_26 = arith.constant 0 : index
    %30 = vector.load %arg4[%c0_24, %c0_25, %c0_26] : memref<2x112x192xbf16, #tpu.memory_space<vmem>>, vector<1x112x192xbf16>
    %31 = vector.shape_cast %30 : vector<1x112x192xbf16> to vector<112x192xbf16>
    %cst_27 = arith.constant dense<0.000000e+00> : vector<14x192xf32>
    %32 = tpu.matmul %29, %31, %cst_27 {dimension_numbers = #tpu.dot_dimension_numbers<[1], [0], [0], [1], [0, 0, 1, 1], [], []>} : vector<14x112xbf16>, vector<112x192xbf16>, vector<14x192xf32> -> vector<14x192xf32>
    %33 = vector.extract_strided_slice %28 {offsets = [1, 0], sizes = [14, 112], strides = [1, 1]} : vector<15x112xbf16> to vector<14x112xbf16>
    %c1_28 = arith.constant 1 : index
    %c0_29 = arith.constant 0 : index
    %c0_30 = arith.constant 0 : index
    %34 = vector.load %arg4[%c1_28, %c0_29, %c0_30] : memref<2x112x192xbf16, #tpu.memory_space<vmem>>, vector<1x112x192xbf16>
    %35 = vector.shape_cast %34 : vector<1x112x192xbf16> to vector<112x192xbf16>
    %cst_31 = arith.constant dense<0.000000e+00> : vector<14x192xf32>
    %36 = tpu.matmul %33, %35, %cst_31 {dimension_numbers = #tpu.dot_dimension_numbers<[1], [0], [0], [1], [0, 0, 1, 1], [], []>} : vector<14x112xbf16>, vector<112x192xbf16>, vector<14x192xf32> -> vector<14x192xf32>
    %37 = arith.addf %32, %36 : vector<14x192xf32>
    %c0_32 = arith.constant 0 : index
    %c0_33 = arith.constant 0 : index
    %38 = vector.load %arg5[%c0_32, %c0_33] : memref<1x192xf32, #tpu.memory_space<vmem>>, vector<1x192xf32>
    %39 = vector.broadcast %38 : vector<1x192xf32> to vector<14x192xf32>
    %40 = arith.addf %37, %39 : vector<14x192xf32>
    %cst_34 = arith.constant 0.000000e+00 : f32
    %41 = vector.broadcast %cst_34 : f32 to vector<14x192xf32>
    %42 = arith.cmpf ogt, %40, %41 : vector<14x192xf32>
    %cst_35 = arith.constant 5.000000e-01 : f32
    %43 = vector.broadcast %cst_35 : f32 to vector<14x192xf32>
    %44 = arith.mulf %43, %40 : vector<14x192xf32>
    %45 = arith.select %42, %40, %44 : vector<14x192xi1>, vector<14x192xf32>
    %46 = arith.truncf %45 : vector<14x192xf32> to vector<14x192xbf16>
    %47 = vector.extract_strided_slice %46 {offsets = [0, 0], sizes = [13, 192], strides = [1, 1]} : vector<14x192xbf16> to vector<13x192xbf16>
    %c0_36 = arith.constant 0 : index
    %c0_37 = arith.constant 0 : index
    %c0_38 = arith.constant 0 : index
    %48 = vector.load %arg6[%c0_36, %c0_37, %c0_38] : memref<2x192x320xbf16, #tpu.memory_space<vmem>>, vector<1x192x320xbf16>
    %49 = vector.shape_cast %48 : vector<1x192x320xbf16> to vector<192x320xbf16>
    %cst_39 = arith.constant dense<0.000000e+00> : vector<13x320xf32>
    %50 = tpu.matmul %47, %49, %cst_39 {dimension_numbers = #tpu.dot_dimension_numbers<[1], [0], [0], [1], [0, 0, 1, 1], [], []>} : vector<13x192xbf16>, vector<192x320xbf16>, vector<13x320xf32> -> vector<13x320xf32>
    %51 = vector.extract_strided_slice %46 {offsets = [1, 0], sizes = [13, 192], strides = [1, 1]} : vector<14x192xbf16> to vector<13x192xbf16>
    %c1_40 = arith.constant 1 : index
    %c0_41 = arith.constant 0 : index
    %c0_42 = arith.constant 0 : index
    %52 = vector.load %arg6[%c1_40, %c0_41, %c0_42] : memref<2x192x320xbf16, #tpu.memory_space<vmem>>, vector<1x192x320xbf16>
    %53 = vector.shape_cast %52 : vector<1x192x320xbf16> to vector<192x320xbf16>
    %cst_43 = arith.constant dense<0.000000e+00> : vector<13x320xf32>
    %54 = tpu.matmul %51, %53, %cst_43 {dimension_numbers = #tpu.dot_dimension_numbers<[1], [0], [0], [1], [0, 0, 1, 1], [], []>} : vector<13x192xbf16>, vector<192x320xbf16>, vector<13x320xf32> -> vector<13x320xf32>
    %55 = arith.addf %50, %54 : vector<13x320xf32>
    %c0_44 = arith.constant 0 : index
    %c0_45 = arith.constant 0 : index
    %56 = vector.load %arg7[%c0_44, %c0_45] : memref<1x320xf32, #tpu.memory_space<vmem>>, vector<1x320xf32>
    %57 = vector.broadcast %56 : vector<1x320xf32> to vector<13x320xf32>
    %58 = arith.addf %55, %57 : vector<13x320xf32>
    %cst_46 = arith.constant 0.000000e+00 : f32
    %59 = vector.broadcast %cst_46 : f32 to vector<13x320xf32>
    %60 = arith.cmpf ogt, %58, %59 : vector<13x320xf32>
    %cst_47 = arith.constant 5.000000e-01 : f32
    %61 = vector.broadcast %cst_47 : f32 to vector<13x320xf32>
    %62 = arith.mulf %61, %58 : vector<13x320xf32>
    %63 = arith.select %60, %58, %62 : vector<13x320xi1>, vector<13x320xf32>
    %c1_48 = arith.constant 1 : index
    %c0_49 = arith.constant 0 : index
    %64 = vector.load %arg15[%c1_48, %c0_49] : memref<15x320xf32, #tpu.memory_space<vmem>>, vector<13x320xf32>
    tpu.vector_store %arg15[%c1_48, %c0_49], %63 {strides = array<i32>} : memref<15x320xf32, #tpu.memory_space<vmem>>, vector<13x320xf32>,
    %c0_50 = arith.constant 0 : index
    %c0_51 = arith.constant 0 : index
    %65 = vector.load %arg15[%c0_50, %c0_51] : memref<15x320xf32, #tpu.memory_space<vmem>>, vector<15x320xf32>
    %66 = arith.truncf %65 : vector<15x320xf32> to vector<15x320xbf16>
    %67 = vector.extract_strided_slice %66 {offsets = [0, 0], sizes = [14, 320], strides = [1, 1]} : vector<15x320xbf16> to vector<14x320xbf16>
    %c0_52 = arith.constant 0 : index
    %c0_53 = arith.constant 0 : index
    %c0_54 = arith.constant 0 : index
    %68 = vector.load %arg8[%c0_52, %c0_53, %c0_54] : memref<2x320x192xbf16, #tpu.memory_space<vmem>>, vector<1x320x192xbf16>
    %69 = vector.shape_cast %68 : vector<1x320x192xbf16> to vector<320x192xbf16>
    %cst_55 = arith.constant dense<0.000000e+00> : vector<14x192xf32>
    %70 = tpu.matmul %67, %69, %cst_55 {dimension_numbers = #tpu.dot_dimension_numbers<[1], [0], [0], [1], [0, 0, 1, 1], [], []>} : vector<14x320xbf16>, vector<320x192xbf16>, vector<14x192xf32> -> vector<14x192xf32>
    %71 = vector.extract_strided_slice %66 {offsets = [1, 0], sizes = [14, 320], strides = [1, 1]} : vector<15x320xbf16> to vector<14x320xbf16>
    %c1_56 = arith.constant 1 : index
    %c0_57 = arith.constant 0 : index
    %c0_58 = arith.constant 0 : index
    %72 = vector.load %arg8[%c1_56, %c0_57, %c0_58] : memref<2x320x192xbf16, #tpu.memory_space<vmem>>, vector<1x320x192xbf16>
    %73 = vector.shape_cast %72 : vector<1x320x192xbf16> to vector<320x192xbf16>
    %cst_59 = arith.constant dense<0.000000e+00> : vector<14x192xf32>
    %74 = tpu.matmul %71, %73, %cst_59 {dimension_numbers = #tpu.dot_dimension_numbers<[1], [0], [0], [1], [0, 0, 1, 1], [], []>} : vector<14x320xbf16>, vector<320x192xbf16>, vector<14x192xf32> -> vector<14x192xf32>
    %75 = arith.addf %70, %74 : vector<14x192xf32>
    %c0_60 = arith.constant 0 : index
    %c0_61 = arith.constant 0 : index
    %76 = vector.load %arg9[%c0_60, %c0_61] : memref<1x192xf32, #tpu.memory_space<vmem>>, vector<1x192xf32>
    %77 = vector.broadcast %76 : vector<1x192xf32> to vector<14x192xf32>
    %78 = arith.addf %75, %77 : vector<14x192xf32>
    %cst_62 = arith.constant 0.000000e+00 : f32
    %79 = vector.broadcast %cst_62 : f32 to vector<14x192xf32>
    %80 = arith.cmpf ogt, %78, %79 : vector<14x192xf32>
    %cst_63 = arith.constant 5.000000e-01 : f32
    %81 = vector.broadcast %cst_63 : f32 to vector<14x192xf32>
    %82 = arith.mulf %81, %78 : vector<14x192xf32>
    %83 = arith.select %80, %78, %82 : vector<14x192xi1>, vector<14x192xf32>
    %c1_64 = arith.constant 1 : index
    %c0_65 = arith.constant 0 : index
    %84 = vector.load %arg16[%c1_64, %c0_65] : memref<16x192xf32, #tpu.memory_space<vmem>>, vector<14x192xf32>
    tpu.vector_store %arg16[%c1_64, %c0_65], %83 {strides = array<i32>} : memref<16x192xf32, #tpu.memory_space<vmem>>, vector<14x192xf32>,
    %c0_66 = arith.constant 0 : index
    %c0_67 = arith.constant 0 : index
    %85 = vector.load %arg16[%c0_66, %c0_67] : memref<16x192xf32, #tpu.memory_space<vmem>>, vector<16x192xf32>
    %86 = arith.truncf %85 : vector<16x192xf32> to vector<16x192xbf16>
    %87 = vector.extract_strided_slice %86 {offsets = [0, 0], sizes = [15, 192], strides = [1, 1]} : vector<16x192xbf16> to vector<15x192xbf16>
    %c0_68 = arith.constant 0 : index
    %c0_69 = arith.constant 0 : index
    %c0_70 = arith.constant 0 : index
    %88 = vector.load %arg10[%c0_68, %c0_69, %c0_70] : memref<2x192x112xbf16, #tpu.memory_space<vmem>>, vector<1x192x112xbf16>
    %89 = vector.shape_cast %88 : vector<1x192x112xbf16> to vector<192x112xbf16>
    %cst_71 = arith.constant dense<0.000000e+00> : vector<15x112xf32>
    %90 = tpu.matmul %87, %89, %cst_71 {dimension_numbers = #tpu.dot_dimension_numbers<[1], [0], [0], [1], [0, 0, 1, 1], [], []>} : vector<15x192xbf16>, vector<192x112xbf16>, vector<15x112xf32> -> vector<15x112xf32>
    %91 = vector.extract_strided_slice %86 {offsets = [1, 0], sizes = [15, 192], strides = [1, 1]} : vector<16x192xbf16> to vector<15x192xbf16>
    %c1_72 = arith.constant 1 : index
    %c0_73 = arith.constant 0 : index
    %c0_74 = arith.constant 0 : index
    %92 = vector.load %arg10[%c1_72, %c0_73, %c0_74] : memref<2x192x112xbf16, #tpu.memory_space<vmem>>, vector<1x192x112xbf16>
    %93 = vector.shape_cast %92 : vector<1x192x112xbf16> to vector<192x112xbf16>
    %cst_75 = arith.constant dense<0.000000e+00> : vector<15x112xf32>
    %94 = tpu.matmul %91, %93, %cst_75 {dimension_numbers = #tpu.dot_dimension_numbers<[1], [0], [0], [1], [0, 0, 1, 1], [], []>} : vector<15x192xbf16>, vector<192x112xbf16>, vector<15x112xf32> -> vector<15x112xf32>
    %95 = arith.addf %90, %94 : vector<15x112xf32>
    %c0_76 = arith.constant 0 : index
    %c0_77 = arith.constant 0 : index
    %96 = vector.load %arg11[%c0_76, %c0_77] : memref<1x112xf32, #tpu.memory_space<vmem>>, vector<1x112xf32>
    %97 = vector.broadcast %96 : vector<1x112xf32> to vector<15x112xf32>
    %98 = arith.addf %95, %97 : vector<15x112xf32>
    %cst_78 = arith.constant 0.000000e+00 : f32
    %99 = vector.broadcast %cst_78 : f32 to vector<15x112xf32>
    %100 = arith.cmpf ogt, %98, %99 : vector<15x112xf32>
    %cst_79 = arith.constant 5.000000e-01 : f32
    %101 = vector.broadcast %cst_79 : f32 to vector<15x112xf32>
    %102 = arith.mulf %101, %98 : vector<15x112xf32>
    %103 = arith.select %100, %98, %102 : vector<15x112xi1>, vector<15x112xf32>
    %c1_80 = arith.constant 1 : index
    %c0_81 = arith.constant 0 : index
    %104 = vector.load %arg17[%c1_80, %c0_81] : memref<17x112xf32, #tpu.memory_space<vmem>>, vector<15x112xf32>
    tpu.vector_store %arg17[%c1_80, %c0_81], %103 {strides = array<i32>} : memref<17x112xf32, #tpu.memory_space<vmem>>, vector<15x112xf32>,
    %c0_82 = arith.constant 0 : index
    %c0_83 = arith.constant 0 : index
    %105 = vector.load %arg17[%c0_82, %c0_83] : memref<17x112xf32, #tpu.memory_space<vmem>>, vector<17x112xf32>
    %106 = arith.truncf %105 : vector<17x112xf32> to vector<17x112xbf16>
    %107 = vector.extract_strided_slice %106 {offsets = [0, 0], sizes = [16, 112], strides = [1, 1]} : vector<17x112xbf16> to vector<16x112xbf16>
    %c0_84 = arith.constant 0 : index
    %c0_85 = arith.constant 0 : index
    %c0_86 = arith.constant 0 : index
    %108 = vector.load %arg12[%c0_84, %c0_85, %c0_86] : memref<2x112x8xbf16, #tpu.memory_space<vmem>>, vector<1x112x8xbf16>
    %109 = vector.shape_cast %108 : vector<1x112x8xbf16> to vector<112x8xbf16>
    %cst_87 = arith.constant dense<0.000000e+00> : vector<16x8xf32>
    %110 = tpu.matmul %107, %109, %cst_87 {dimension_numbers = #tpu.dot_dimension_numbers<[1], [0], [0], [1], [0, 0, 1, 1], [], []>} : vector<16x112xbf16>, vector<112x8xbf16>, vector<16x8xf32> -> vector<16x8xf32>
    %111 = vector.extract_strided_slice %106 {offsets = [1, 0], sizes = [16, 112], strides = [1, 1]} : vector<17x112xbf16> to vector<16x112xbf16>
    %c1_88 = arith.constant 1 : index
    %c0_89 = arith.constant 0 : index
    %c0_90 = arith.constant 0 : index
    %112 = vector.load %arg12[%c1_88, %c0_89, %c0_90] : memref<2x112x8xbf16, #tpu.memory_space<vmem>>, vector<1x112x8xbf16>
    %113 = vector.shape_cast %112 : vector<1x112x8xbf16> to vector<112x8xbf16>
    %cst_91 = arith.constant dense<0.000000e+00> : vector<16x8xf32>
    %114 = tpu.matmul %111, %113, %cst_91 {dimension_numbers = #tpu.dot_dimension_numbers<[1], [0], [0], [1], [0, 0, 1, 1], [], []>} : vector<16x112xbf16>, vector<112x8xbf16>, vector<16x8xf32> -> vector<16x8xf32>
    %115 = arith.addf %110, %114 : vector<16x8xf32>
    %c0_92 = arith.constant 0 : index
    %c0_93 = arith.constant 0 : index
    %116 = vector.load %arg13[%c0_92, %c0_93] : memref<1x8xf32, #tpu.memory_space<vmem>>, vector<1x8xf32>
    %117 = vector.broadcast %116 : vector<1x8xf32> to vector<16x8xf32>
    %118 = arith.addf %115, %117 : vector<16x8xf32>
    %cst_94 = arith.constant dense<0.000000e+00> : vector<8x8xf32>
    %119 = tpu.matmul %118, %118, %cst_94 {dimension_numbers = #tpu.dot_dimension_numbers<[0], [0], [1], [1], [0, 1, 1, 1], [], []>} : vector<16x8xf32>, vector<16x8xf32>, vector<8x8xf32> -> vector<8x8xf32>
    %120 = vector.extract_strided_slice %118 {offsets = [0, 0], sizes = [8, 8], strides = [1, 1]} : vector<16x8xf32> to vector<8x8xf32>
    %121 = vector.extract_strided_slice %118 {offsets = [8, 0], sizes = [8, 8], strides = [1, 1]} : vector<16x8xf32> to vector<8x8xf32>
    %cst_95 = arith.constant dense<0.000000e+00> : vector<8x8xf32>
    %122 = tpu.matmul %120, %121, %cst_95 {dimension_numbers = #tpu.dot_dimension_numbers<[0], [0], [1], [1], [0, 1, 1, 1], [], []>} : vector<8x8xf32>, vector<8x8xf32>, vector<8x8xf32> -> vector<8x8xf32>
    %123 = vector.extract_strided_slice %118 {offsets = [8, 0], sizes = [8, 8], strides = [1, 1]} : vector<16x8xf32> to vector<8x8xf32>
    %124 = vector.extract_strided_slice %118 {offsets = [0, 0], sizes = [8, 8], strides = [1, 1]} : vector<16x8xf32> to vector<8x8xf32>
    %cst_96 = arith.constant dense<0.000000e+00> : vector<8x8xf32>
    %125 = tpu.matmul %123, %124, %cst_96 {dimension_numbers = #tpu.dot_dimension_numbers<[0], [0], [1], [1], [0, 1, 1, 1], [], []>} : vector<8x8xf32>, vector<8x8xf32>, vector<8x8xf32> -> vector<8x8xf32>
    %126 = arith.subf %122, %125 : vector<8x8xf32>
    %c0_97 = arith.constant 0 : index
    %c0_98 = arith.constant 0 : index
    %c0_99 = arith.constant 0 : index
    %127 = vector.load %arg14[%c0_97, %c0_98, %c0_99] : memref<1x8x32xf32, #tpu.memory_space<vmem>>, vector<1x8x8xf32>
    %128 = vector.shape_cast %127 : vector<1x8x8xf32> to vector<8x8xf32>
    %129 = vector.shape_cast %119 : vector<8x8xf32> to vector<1x8x8xf32>
    tpu.vector_store %arg14[%c0_97, %c0_98, %c0_99], %129 {strides = array<i32>} : memref<1x8x32xf32, #tpu.memory_space<vmem>>, vector<1x8x8xf32>,
    %c0_100 = arith.constant 0 : index
    %c0_101 = arith.constant 0 : index
    %c8 = arith.constant 8 : index
    %130 = vector.load %arg14[%c0_100, %c0_101, %c8] : memref<1x8x32xf32, #tpu.memory_space<vmem>>, vector<1x8x8xf32>
    %131 = vector.shape_cast %130 : vector<1x8x8xf32> to vector<8x8xf32>
    %132 = vector.shape_cast %126 : vector<8x8xf32> to vector<1x8x8xf32>
    tpu.vector_store %arg14[%c0_100, %c0_101, %c8], %132 {strides = array<i32>} : memref<1x8x32xf32, #tpu.memory_space<vmem>>, vector<1x8x8xf32>,
    %c1_102 = arith.constant 1 : index
    %c0_103 = arith.constant 0 : index
    %c0_104 = arith.constant 0 : index
    %133 = vector.load %arg1[%c1_102, %c0_103, %c0_104] : memref<2x16x32xbf16, #tpu.memory_space<vmem>>, vector<1x16x32xbf16>
    %134 = vector.shape_cast %133 : vector<1x16x32xbf16> to vector<16x32xbf16>
    %135 = vector.extract_strided_slice %134 {offsets = [0, 0], sizes = [15, 32], strides = [1, 1]} : vector<16x32xbf16> to vector<15x32xbf16>
    %c0_105 = arith.constant 0 : index
    %c0_106 = arith.constant 0 : index
    %c0_107 = arith.constant 0 : index
    %136 = vector.load %arg2[%c0_105, %c0_106, %c0_107] : memref<2x32x112xbf16, #tpu.memory_space<vmem>>, vector<1x32x112xbf16>
    %137 = vector.shape_cast %136 : vector<1x32x112xbf16> to vector<32x112xbf16>
    %cst_108 = arith.constant dense<0.000000e+00> : vector<15x112xf32>
    %138 = tpu.matmul %135, %137, %cst_108 {dimension_numbers = #tpu.dot_dimension_numbers<[1], [0], [0], [1], [0, 0, 1, 1], [], []>} : vector<15x32xbf16>, vector<32x112xbf16>, vector<15x112xf32> -> vector<15x112xf32>
    %139 = vector.extract_strided_slice %134 {offsets = [1, 0], sizes = [15, 32], strides = [1, 1]} : vector<16x32xbf16> to vector<15x32xbf16>
    %c1_109 = arith.constant 1 : index
    %c0_110 = arith.constant 0 : index
    %c0_111 = arith.constant 0 : index
    %140 = vector.load %arg2[%c1_109, %c0_110, %c0_111] : memref<2x32x112xbf16, #tpu.memory_space<vmem>>, vector<1x32x112xbf16>
    %141 = vector.shape_cast %140 : vector<1x32x112xbf16> to vector<32x112xbf16>
    %cst_112 = arith.constant dense<0.000000e+00> : vector<15x112xf32>
    %142 = tpu.matmul %139, %141, %cst_112 {dimension_numbers = #tpu.dot_dimension_numbers<[1], [0], [0], [1], [0, 0, 1, 1], [], []>} : vector<15x32xbf16>, vector<32x112xbf16>, vector<15x112xf32> -> vector<15x112xf32>
    %143 = arith.addf %138, %142 : vector<15x112xf32>
    %c0_113 = arith.constant 0 : index
    %c0_114 = arith.constant 0 : index
    %144 = vector.load %arg3[%c0_113, %c0_114] : memref<1x112xf32, #tpu.memory_space<vmem>>, vector<1x112xf32>
    %145 = vector.broadcast %144 : vector<1x112xf32> to vector<15x112xf32>
    %146 = arith.addf %143, %145 : vector<15x112xf32>
    %cst_115 = arith.constant 0.000000e+00 : f32
    %147 = vector.broadcast %cst_115 : f32 to vector<15x112xf32>
    %148 = arith.cmpf ogt, %146, %147 : vector<15x112xf32>
    %cst_116 = arith.constant 5.000000e-01 : f32
    %149 = vector.broadcast %cst_116 : f32 to vector<15x112xf32>
    %150 = arith.mulf %149, %146 : vector<15x112xf32>
    %151 = arith.select %148, %146, %150 : vector<15x112xi1>, vector<15x112xf32>
    %152 = arith.truncf %151 : vector<15x112xf32> to vector<15x112xbf16>
    %153 = vector.extract_strided_slice %152 {offsets = [0, 0], sizes = [14, 112], strides = [1, 1]} : vector<15x112xbf16> to vector<14x112xbf16>
    %c0_117 = arith.constant 0 : index
    %c0_118 = arith.constant 0 : index
    %c0_119 = arith.constant 0 : index
    %154 = vector.load %arg4[%c0_117, %c0_118, %c0_119] : memref<2x112x192xbf16, #tpu.memory_space<vmem>>, vector<1x112x192xbf16>
    %155 = vector.shape_cast %154 : vector<1x112x192xbf16> to vector<112x192xbf16>
    %cst_120 = arith.constant dense<0.000000e+00> : vector<14x192xf32>
    %156 = tpu.matmul %153, %155, %cst_120 {dimension_numbers = #tpu.dot_dimension_numbers<[1], [0], [0], [1], [0, 0, 1, 1], [], []>} : vector<14x112xbf16>, vector<112x192xbf16>, vector<14x192xf32> -> vector<14x192xf32>
    %157 = vector.extract_strided_slice %152 {offsets = [1, 0], sizes = [14, 112], strides = [1, 1]} : vector<15x112xbf16> to vector<14x112xbf16>
    %c1_121 = arith.constant 1 : index
    %c0_122 = arith.constant 0 : index
    %c0_123 = arith.constant 0 : index
    %158 = vector.load %arg4[%c1_121, %c0_122, %c0_123] : memref<2x112x192xbf16, #tpu.memory_space<vmem>>, vector<1x112x192xbf16>
    %159 = vector.shape_cast %158 : vector<1x112x192xbf16> to vector<112x192xbf16>
    %cst_124 = arith.constant dense<0.000000e+00> : vector<14x192xf32>
    %160 = tpu.matmul %157, %159, %cst_124 {dimension_numbers = #tpu.dot_dimension_numbers<[1], [0], [0], [1], [0, 0, 1, 1], [], []>} : vector<14x112xbf16>, vector<112x192xbf16>, vector<14x192xf32> -> vector<14x192xf32>
    %161 = arith.addf %156, %160 : vector<14x192xf32>
    %c0_125 = arith.constant 0 : index
    %c0_126 = arith.constant 0 : index
    %162 = vector.load %arg5[%c0_125, %c0_126] : memref<1x192xf32, #tpu.memory_space<vmem>>, vector<1x192xf32>
    %163 = vector.broadcast %162 : vector<1x192xf32> to vector<14x192xf32>
    %164 = arith.addf %161, %163 : vector<14x192xf32>
    %cst_127 = arith.constant 0.000000e+00 : f32
    %165 = vector.broadcast %cst_127 : f32 to vector<14x192xf32>
    %166 = arith.cmpf ogt, %164, %165 : vector<14x192xf32>
    %cst_128 = arith.constant 5.000000e-01 : f32
    %167 = vector.broadcast %cst_128 : f32 to vector<14x192xf32>
    %168 = arith.mulf %167, %164 : vector<14x192xf32>
    %169 = arith.select %166, %164, %168 : vector<14x192xi1>, vector<14x192xf32>
    %170 = arith.truncf %169 : vector<14x192xf32> to vector<14x192xbf16>
    %171 = vector.extract_strided_slice %170 {offsets = [0, 0], sizes = [13, 192], strides = [1, 1]} : vector<14x192xbf16> to vector<13x192xbf16>
    %c0_129 = arith.constant 0 : index
    %c0_130 = arith.constant 0 : index
    %c0_131 = arith.constant 0 : index
    %172 = vector.load %arg6[%c0_129, %c0_130, %c0_131] : memref<2x192x320xbf16, #tpu.memory_space<vmem>>, vector<1x192x320xbf16>
    %173 = vector.shape_cast %172 : vector<1x192x320xbf16> to vector<192x320xbf16>
    %cst_132 = arith.constant dense<0.000000e+00> : vector<13x320xf32>
    %174 = tpu.matmul %171, %173, %cst_132 {dimension_numbers = #tpu.dot_dimension_numbers<[1], [0], [0], [1], [0, 0, 1, 1], [], []>} : vector<13x192xbf16>, vector<192x320xbf16>, vector<13x320xf32> -> vector<13x320xf32>
    %175 = vector.extract_strided_slice %170 {offsets = [1, 0], sizes = [13, 192], strides = [1, 1]} : vector<14x192xbf16> to vector<13x192xbf16>
    %c1_133 = arith.constant 1 : index
    %c0_134 = arith.constant 0 : index
    %c0_135 = arith.constant 0 : index
    %176 = vector.load %arg6[%c1_133, %c0_134, %c0_135] : memref<2x192x320xbf16, #tpu.memory_space<vmem>>, vector<1x192x320xbf16>
    %177 = vector.shape_cast %176 : vector<1x192x320xbf16> to vector<192x320xbf16>
    %cst_136 = arith.constant dense<0.000000e+00> : vector<13x320xf32>
    %178 = tpu.matmul %175, %177, %cst_136 {dimension_numbers = #tpu.dot_dimension_numbers<[1], [0], [0], [1], [0, 0, 1, 1], [], []>} : vector<13x192xbf16>, vector<192x320xbf16>, vector<13x320xf32> -> vector<13x320xf32>
    %179 = arith.addf %174, %178 : vector<13x320xf32>
    %c0_137 = arith.constant 0 : index
    %c0_138 = arith.constant 0 : index
    %180 = vector.load %arg7[%c0_137, %c0_138] : memref<1x320xf32, #tpu.memory_space<vmem>>, vector<1x320xf32>
    %181 = vector.broadcast %180 : vector<1x320xf32> to vector<13x320xf32>
    %182 = arith.addf %179, %181 : vector<13x320xf32>
    %cst_139 = arith.constant 0.000000e+00 : f32
    %183 = vector.broadcast %cst_139 : f32 to vector<13x320xf32>
    %184 = arith.cmpf ogt, %182, %183 : vector<13x320xf32>
    %cst_140 = arith.constant 5.000000e-01 : f32
    %185 = vector.broadcast %cst_140 : f32 to vector<13x320xf32>
    %186 = arith.mulf %185, %182 : vector<13x320xf32>
    %187 = arith.select %184, %182, %186 : vector<13x320xi1>, vector<13x320xf32>
    %c1_141 = arith.constant 1 : index
    %c0_142 = arith.constant 0 : index
    %188 = vector.load %arg15[%c1_141, %c0_142] : memref<15x320xf32, #tpu.memory_space<vmem>>, vector<13x320xf32>
    tpu.vector_store %arg15[%c1_141, %c0_142], %187 {strides = array<i32>} : memref<15x320xf32, #tpu.memory_space<vmem>>, vector<13x320xf32>,
    %c0_143 = arith.constant 0 : index
    %c0_144 = arith.constant 0 : index
    %189 = vector.load %arg15[%c0_143, %c0_144] : memref<15x320xf32, #tpu.memory_space<vmem>>, vector<15x320xf32>
    %190 = arith.truncf %189 : vector<15x320xf32> to vector<15x320xbf16>
    %191 = vector.extract_strided_slice %190 {offsets = [0, 0], sizes = [14, 320], strides = [1, 1]} : vector<15x320xbf16> to vector<14x320xbf16>
    %c0_145 = arith.constant 0 : index
    %c0_146 = arith.constant 0 : index
    %c0_147 = arith.constant 0 : index
    %192 = vector.load %arg8[%c0_145, %c0_146, %c0_147] : memref<2x320x192xbf16, #tpu.memory_space<vmem>>, vector<1x320x192xbf16>
    %193 = vector.shape_cast %192 : vector<1x320x192xbf16> to vector<320x192xbf16>
    %cst_148 = arith.constant dense<0.000000e+00> : vector<14x192xf32>
    %194 = tpu.matmul %191, %193, %cst_148 {dimension_numbers = #tpu.dot_dimension_numbers<[1], [0], [0], [1], [0, 0, 1, 1], [], []>} : vector<14x320xbf16>, vector<320x192xbf16>, vector<14x192xf32> -> vector<14x192xf32>
    %195 = vector.extract_strided_slice %190 {offsets = [1, 0], sizes = [14, 320], strides = [1, 1]} : vector<15x320xbf16> to vector<14x320xbf16>
    %c1_149 = arith.constant 1 : index
    %c0_150 = arith.constant 0 : index
    %c0_151 = arith.constant 0 : index
    %196 = vector.load %arg8[%c1_149, %c0_150, %c0_151] : memref<2x320x192xbf16, #tpu.memory_space<vmem>>, vector<1x320x192xbf16>
    %197 = vector.shape_cast %196 : vector<1x320x192xbf16> to vector<320x192xbf16>
    %cst_152 = arith.constant dense<0.000000e+00> : vector<14x192xf32>
    %198 = tpu.matmul %195, %197, %cst_152 {dimension_numbers = #tpu.dot_dimension_numbers<[1], [0], [0], [1], [0, 0, 1, 1], [], []>} : vector<14x320xbf16>, vector<320x192xbf16>, vector<14x192xf32> -> vector<14x192xf32>
    %199 = arith.addf %194, %198 : vector<14x192xf32>
    %c0_153 = arith.constant 0 : index
    %c0_154 = arith.constant 0 : index
    %200 = vector.load %arg9[%c0_153, %c0_154] : memref<1x192xf32, #tpu.memory_space<vmem>>, vector<1x192xf32>
    %201 = vector.broadcast %200 : vector<1x192xf32> to vector<14x192xf32>
    %202 = arith.addf %199, %201 : vector<14x192xf32>
    %cst_155 = arith.constant 0.000000e+00 : f32
    %203 = vector.broadcast %cst_155 : f32 to vector<14x192xf32>
    %204 = arith.cmpf ogt, %202, %203 : vector<14x192xf32>
    %cst_156 = arith.constant 5.000000e-01 : f32
    %205 = vector.broadcast %cst_156 : f32 to vector<14x192xf32>
    %206 = arith.mulf %205, %202 : vector<14x192xf32>
    %207 = arith.select %204, %202, %206 : vector<14x192xi1>, vector<14x192xf32>
    %c1_157 = arith.constant 1 : index
    %c0_158 = arith.constant 0 : index
    %208 = vector.load %arg16[%c1_157, %c0_158] : memref<16x192xf32, #tpu.memory_space<vmem>>, vector<14x192xf32>
    tpu.vector_store %arg16[%c1_157, %c0_158], %207 {strides = array<i32>} : memref<16x192xf32, #tpu.memory_space<vmem>>, vector<14x192xf32>,
    %c0_159 = arith.constant 0 : index
    %c0_160 = arith.constant 0 : index
    %209 = vector.load %arg16[%c0_159, %c0_160] : memref<16x192xf32, #tpu.memory_space<vmem>>, vector<16x192xf32>
    %210 = arith.truncf %209 : vector<16x192xf32> to vector<16x192xbf16>
    %211 = vector.extract_strided_slice %210 {offsets = [0, 0], sizes = [15, 192], strides = [1, 1]} : vector<16x192xbf16> to vector<15x192xbf16>
    %c0_161 = arith.constant 0 : index
    %c0_162 = arith.constant 0 : index
    %c0_163 = arith.constant 0 : index
    %212 = vector.load %arg10[%c0_161, %c0_162, %c0_163] : memref<2x192x112xbf16, #tpu.memory_space<vmem>>, vector<1x192x112xbf16>
    %213 = vector.shape_cast %212 : vector<1x192x112xbf16> to vector<192x112xbf16>
    %cst_164 = arith.constant dense<0.000000e+00> : vector<15x112xf32>
    %214 = tpu.matmul %211, %213, %cst_164 {dimension_numbers = #tpu.dot_dimension_numbers<[1], [0], [0], [1], [0, 0, 1, 1], [], []>} : vector<15x192xbf16>, vector<192x112xbf16>, vector<15x112xf32> -> vector<15x112xf32>
    %215 = vector.extract_strided_slice %210 {offsets = [1, 0], sizes = [15, 192], strides = [1, 1]} : vector<16x192xbf16> to vector<15x192xbf16>
    %c1_165 = arith.constant 1 : index
    %c0_166 = arith.constant 0 : index
    %c0_167 = arith.constant 0 : index
    %216 = vector.load %arg10[%c1_165, %c0_166, %c0_167] : memref<2x192x112xbf16, #tpu.memory_space<vmem>>, vector<1x192x112xbf16>
    %217 = vector.shape_cast %216 : vector<1x192x112xbf16> to vector<192x112xbf16>
    %cst_168 = arith.constant dense<0.000000e+00> : vector<15x112xf32>
    %218 = tpu.matmul %215, %217, %cst_168 {dimension_numbers = #tpu.dot_dimension_numbers<[1], [0], [0], [1], [0, 0, 1, 1], [], []>} : vector<15x192xbf16>, vector<192x112xbf16>, vector<15x112xf32> -> vector<15x112xf32>
    %219 = arith.addf %214, %218 : vector<15x112xf32>
    %c0_169 = arith.constant 0 : index
    %c0_170 = arith.constant 0 : index
    %220 = vector.load %arg11[%c0_169, %c0_170] : memref<1x112xf32, #tpu.memory_space<vmem>>, vector<1x112xf32>
    %221 = vector.broadcast %220 : vector<1x112xf32> to vector<15x112xf32>
    %222 = arith.addf %219, %221 : vector<15x112xf32>
    %cst_171 = arith.constant 0.000000e+00 : f32
    %223 = vector.broadcast %cst_171 : f32 to vector<15x112xf32>
    %224 = arith.cmpf ogt, %222, %223 : vector<15x112xf32>
    %cst_172 = arith.constant 5.000000e-01 : f32
    %225 = vector.broadcast %cst_172 : f32 to vector<15x112xf32>
    %226 = arith.mulf %225, %222 : vector<15x112xf32>
    %227 = arith.select %224, %222, %226 : vector<15x112xi1>, vector<15x112xf32>
    %c1_173 = arith.constant 1 : index
    %c0_174 = arith.constant 0 : index
    %228 = vector.load %arg17[%c1_173, %c0_174] : memref<17x112xf32, #tpu.memory_space<vmem>>, vector<15x112xf32>
    tpu.vector_store %arg17[%c1_173, %c0_174], %227 {strides = array<i32>} : memref<17x112xf32, #tpu.memory_space<vmem>>, vector<15x112xf32>,
    %c0_175 = arith.constant 0 : index
    %c0_176 = arith.constant 0 : index
    %229 = vector.load %arg17[%c0_175, %c0_176] : memref<17x112xf32, #tpu.memory_space<vmem>>, vector<17x112xf32>
    %230 = arith.truncf %229 : vector<17x112xf32> to vector<17x112xbf16>
    %231 = vector.extract_strided_slice %230 {offsets = [0, 0], sizes = [16, 112], strides = [1, 1]} : vector<17x112xbf16> to vector<16x112xbf16>
    %c0_177 = arith.constant 0 : index
    %c0_178 = arith.constant 0 : index
    %c0_179 = arith.constant 0 : index
    %232 = vector.load %arg12[%c0_177, %c0_178, %c0_179] : memref<2x112x8xbf16, #tpu.memory_space<vmem>>, vector<1x112x8xbf16>
    %233 = vector.shape_cast %232 : vector<1x112x8xbf16> to vector<112x8xbf16>
    %cst_180 = arith.constant dense<0.000000e+00> : vector<16x8xf32>
    %234 = tpu.matmul %231, %233, %cst_180 {dimension_numbers = #tpu.dot_dimension_numbers<[1], [0], [0], [1], [0, 0, 1, 1], [], []>} : vector<16x112xbf16>, vector<112x8xbf16>, vector<16x8xf32> -> vector<16x8xf32>
    %235 = vector.extract_strided_slice %230 {offsets = [1, 0], sizes = [16, 112], strides = [1, 1]} : vector<17x112xbf16> to vector<16x112xbf16>
    %c1_181 = arith.constant 1 : index
    %c0_182 = arith.constant 0 : index
    %c0_183 = arith.constant 0 : index
    %236 = vector.load %arg12[%c1_181, %c0_182, %c0_183] : memref<2x112x8xbf16, #tpu.memory_space<vmem>>, vector<1x112x8xbf16>
    %237 = vector.shape_cast %236 : vector<1x112x8xbf16> to vector<112x8xbf16>
    %cst_184 = arith.constant dense<0.000000e+00> : vector<16x8xf32>
    %238 = tpu.matmul %235, %237, %cst_184 {dimension_numbers = #tpu.dot_dimension_numbers<[1], [0], [0], [1], [0, 0, 1, 1], [], []>} : vector<16x112xbf16>, vector<112x8xbf16>, vector<16x8xf32> -> vector<16x8xf32>
    %239 = arith.addf %234, %238 : vector<16x8xf32>
    %c0_185 = arith.constant 0 : index
    %c0_186 = arith.constant 0 : index
    %240 = vector.load %arg13[%c0_185, %c0_186] : memref<1x8xf32, #tpu.memory_space<vmem>>, vector<1x8xf32>
    %241 = vector.broadcast %240 : vector<1x8xf32> to vector<16x8xf32>
    %242 = arith.addf %239, %241 : vector<16x8xf32>
    %cst_187 = arith.constant dense<0.000000e+00> : vector<8x8xf32>
    %243 = tpu.matmul %242, %242, %cst_187 {dimension_numbers = #tpu.dot_dimension_numbers<[0], [0], [1], [1], [0, 1, 1, 1], [], []>} : vector<16x8xf32>, vector<16x8xf32>, vector<8x8xf32> -> vector<8x8xf32>
    %244 = vector.extract_strided_slice %242 {offsets = [0, 0], sizes = [8, 8], strides = [1, 1]} : vector<16x8xf32> to vector<8x8xf32>
    %245 = vector.extract_strided_slice %242 {offsets = [8, 0], sizes = [8, 8], strides = [1, 1]} : vector<16x8xf32> to vector<8x8xf32>
    %cst_188 = arith.constant dense<0.000000e+00> : vector<8x8xf32>
    %246 = tpu.matmul %244, %245, %cst_188 {dimension_numbers = #tpu.dot_dimension_numbers<[0], [0], [1], [1], [0, 1, 1, 1], [], []>} : vector<8x8xf32>, vector<8x8xf32>, vector<8x8xf32> -> vector<8x8xf32>
    %247 = vector.extract_strided_slice %242 {offsets = [8, 0], sizes = [8, 8], strides = [1, 1]} : vector<16x8xf32> to vector<8x8xf32>
    %248 = vector.extract_strided_slice %242 {offsets = [0, 0], sizes = [8, 8], strides = [1, 1]} : vector<16x8xf32> to vector<8x8xf32>
    %cst_189 = arith.constant dense<0.000000e+00> : vector<8x8xf32>
    %249 = tpu.matmul %247, %248, %cst_189 {dimension_numbers = #tpu.dot_dimension_numbers<[0], [0], [1], [1], [0, 1, 1, 1], [], []>} : vector<8x8xf32>, vector<8x8xf32>, vector<8x8xf32> -> vector<8x8xf32>
    %250 = arith.subf %246, %249 : vector<8x8xf32>
    %c0_190 = arith.constant 0 : index
    %c0_191 = arith.constant 0 : index
    %c16_192 = arith.constant 16 : index
    %251 = vector.load %arg14[%c0_190, %c0_191, %c16_192] : memref<1x8x32xf32, #tpu.memory_space<vmem>>, vector<1x8x8xf32>
    %252 = vector.shape_cast %251 : vector<1x8x8xf32> to vector<8x8xf32>
    %253 = vector.shape_cast %243 : vector<8x8xf32> to vector<1x8x8xf32>
    tpu.vector_store %arg14[%c0_190, %c0_191, %c16_192], %253 {strides = array<i32>} : memref<1x8x32xf32, #tpu.memory_space<vmem>>, vector<1x8x8xf32>,
    %c0_193 = arith.constant 0 : index
    %c0_194 = arith.constant 0 : index
    %c24 = arith.constant 24 : index
    %254 = vector.load %arg14[%c0_193, %c0_194, %c24] : memref<1x8x32xf32, #tpu.memory_space<vmem>>, vector<1x8x8xf32>
    %255 = vector.shape_cast %254 : vector<1x8x8xf32> to vector<8x8xf32>
    %256 = vector.shape_cast %250 : vector<8x8xf32> to vector<1x8x8xf32>
    tpu.vector_store %arg14[%c0_193, %c0_194, %c24], %256 {strides = array<i32>} : memref<1x8x32xf32, #tpu.memory_space<vmem>>, vector<1x8x8xf32>,
    return
  }
  func.func @transform_0(%arg0: i32) -> (i32, i32, i32) {
    %c0_i32 = arith.constant 0 : i32
    %c0_i32_0 = arith.constant 0 : i32
    %c0_i32_1 = arith.constant 0 : i32
    return %arg0, %c0_i32, %c0_i32_0 : i32, i32, i32
  }
  func.func @transform_1(%arg0: i32) -> (i32, i32, i32) {
    %c0_i32 = arith.constant 0 : i32
    %c0_i32_0 = arith.constant 0 : i32
    %c0_i32_1 = arith.constant 0 : i32
    %c0_i32_2 = arith.constant 0 : i32
    return %c0_i32, %c0_i32_0, %c0_i32_1 : i32, i32, i32
  }
  func.func @transform_2(%arg0: i32) -> (i32, i32) {
    %c0_i32 = arith.constant 0 : i32
    %c0_i32_0 = arith.constant 0 : i32
    %c0_i32_1 = arith.constant 0 : i32
    return %c0_i32, %c0_i32_0 : i32, i32
  }
  func.func @transform_3(%arg0: i32) -> (i32, i32, i32) {
    %c0_i32 = arith.constant 0 : i32
    %c0_i32_0 = arith.constant 0 : i32
    %c0_i32_1 = arith.constant 0 : i32
    %c0_i32_2 = arith.constant 0 : i32
    return %c0_i32, %c0_i32_0, %c0_i32_1 : i32, i32, i32
  }
  func.func @transform_4(%arg0: i32) -> (i32, i32) {
    %c0_i32 = arith.constant 0 : i32
    %c0_i32_0 = arith.constant 0 : i32
    %c0_i32_1 = arith.constant 0 : i32
    return %c0_i32, %c0_i32_0 : i32, i32
  }
  func.func @transform_5(%arg0: i32) -> (i32, i32, i32) {
    %c0_i32 = arith.constant 0 : i32
    %c0_i32_0 = arith.constant 0 : i32
    %c0_i32_1 = arith.constant 0 : i32
    %c0_i32_2 = arith.constant 0 : i32
    return %c0_i32, %c0_i32_0, %c0_i32_1 : i32, i32, i32
  }
  func.func @transform_6(%arg0: i32) -> (i32, i32) {
    %c0_i32 = arith.constant 0 : i32
    %c0_i32_0 = arith.constant 0 : i32
    %c0_i32_1 = arith.constant 0 : i32
    return %c0_i32, %c0_i32_0 : i32, i32
  }
  func.func @transform_7(%arg0: i32) -> (i32, i32, i32) {
    %c0_i32 = arith.constant 0 : i32
    %c0_i32_0 = arith.constant 0 : i32
    %c0_i32_1 = arith.constant 0 : i32
    %c0_i32_2 = arith.constant 0 : i32
    return %c0_i32, %c0_i32_0, %c0_i32_1 : i32, i32, i32
  }
  func.func @transform_8(%arg0: i32) -> (i32, i32) {
    %c0_i32 = arith.constant 0 : i32
    %c0_i32_0 = arith.constant 0 : i32
    %c0_i32_1 = arith.constant 0 : i32
    return %c0_i32, %c0_i32_0 : i32, i32
  }
  func.func @transform_9(%arg0: i32) -> (i32, i32, i32) {
    %c0_i32 = arith.constant 0 : i32
    %c0_i32_0 = arith.constant 0 : i32
    %c0_i32_1 = arith.constant 0 : i32
    %c0_i32_2 = arith.constant 0 : i32
    return %c0_i32, %c0_i32_0, %c0_i32_1 : i32, i32, i32
  }
  func.func @transform_10(%arg0: i32) -> (i32, i32) {
    %c0_i32 = arith.constant 0 : i32
    %c0_i32_0 = arith.constant 0 : i32
    %c0_i32_1 = arith.constant 0 : i32
    return %c0_i32, %c0_i32_0 : i32, i32
  }
  func.func @transform_11(%arg0: i32) -> (i32, i32, i32) {
    %c0_i32 = arith.constant 0 : i32
    %c0_i32_0 = arith.constant 0 : i32
    %c0_i32_1 = arith.constant 0 : i32
    %c0_i32_2 = arith.constant 0 : i32
    return %c0_i32, %c0_i32_0, %c0_i32_1 : i32, i32, i32
  }
  func.func @transform_12(%arg0: i32) -> (i32, i32) {
    %c0_i32 = arith.constant 0 : i32
    %c0_i32_0 = arith.constant 0 : i32
    %c0_i32_1 = arith.constant 0 : i32
    return %c0_i32, %c0_i32_0 : i32, i32
  }
  func.func @transform_13(%arg0: i32) -> (i32, i32, i32) {
    %c0_i32 = arith.constant 0 : i32
    %c0_i32_0 = arith.constant 0 : i32
    %c0_i32_1 = arith.constant 0 : i32
    return %arg0, %c0_i32, %c0_i32_0 : i32, i32, i32
  }
}

</mosaic_0001>

<bundles_post_ra>
// kernel: custom-call
= control target key start
LH: loop header
LB: loop body
LE: loop exit
PB: predicated region body
PF: predicated region fallthrough
CT: control target
= control target key end

     0   :  { %s105_s0 = inlined_call_operand.vmem [shape: f32[4,8,8], index: 0, kind: input, shape index: {}]   ;;  %s106_s1 = inlined_call_operand.vmem [shape: f32[4,8,8], index: 1, kind: input, shape index: {}]   ;;  %s107_s2 = inlined_call_operand.hbm [shape: c64[4,8,8], index: 2, kind: output, shape index: {}]  }
   0x1   :  { %s3_s11 = scalar_lea.hbm %s107_s2, 32 }
   0x2   :  { %4 = vsyncpa [#allocation0], 0  ;;  %s6_s14 = sshll.u32 %s105_s0, 4  ;;  %s8_s17 = sshll.u32 %s107_s2, 4  ;;  %s7_s14 = int_to_ptr.vmem [resolvable:$true] %s6_s14  ;;  %s9_s17 = int_to_ptr.hbm [resolvable:$true] %s8_s17 }
   0x3   :  { %11 = dma.vmem_to_hbm [thread:$0]  %s7_s14, 512, %s9_s17, [#allocation0] }
   0x4   :  { %74 = dma.done.wait [#allocation0], 512  }
   0x5   :  { %75 = vsyncadd [#allocation0], 4294966784 }
   0x6   :  { %14 = vsyncpa [#allocation0], 1 }
   0x7   :  { %15 = vsyncpa [#allocation1], 0  ;;  %s17_s20 = sshll.u32 %s106_s1, 4  ;;  %s19_s21 = sshll.u32 %s3_s11, 4  ;;  %s18_s20 = int_to_ptr.vmem [resolvable:$true] %s17_s20  ;;  %s20_s21 = int_to_ptr.hbm [resolvable:$true] %s19_s21 }
   0x8   :  { %22 = dma.vmem_to_hbm [thread:$0]  %s18_s20, 512, %s20_s21, [#allocation1] }
   0x9   :  { %76 = dma.done.wait [#allocation1], 512  }
   0xa   :  { %77 = vsyncadd [#allocation1], 4294966784 }
   0xb   :  { %25 = vsyncpa [#allocation1], 1 }

// kernel: deep_root_music_forward.1
= control target key start
LH: loop header
LB: loop body
LE: loop exit
PB: predicated region body
PF: predicated region fallthrough
CT: control target
= control target key end

     0   :  { %s8182_s25 = smov 0   ;;  %s10998_s0 = inlined_call_operand.vmem [shape: bf16[4,16,32], index: 0, kind: input, shape index: {}]   ;;  %s10999_s1 = inlined_call_operand.vmem [shape: bf16[2,32,112], index: 1, kind: input, shape index: {}]   ;;  %s11000_s2 = inlined_call_operand.vmem [shape: f32[1,112], index: 2, kind: input, shape index: {}]   ;;  %s11001_s3 = inlined_call_operand.vmem [shape: bf16[2,112,192], index: 3, kind: input, shape index: {}]   ;;  %s11002_s4 = inlined_call_operand.vmem [shape: f32[1,192], index: 4, kind: input, shape index: {}]   ;;  %s11003_s5 = inlined_call_operand.vmem [shape: bf16[2,192,320], index: 5, kind: input, shape index: {}]   ;;  %s11004_s6 = inlined_call_operand.vmem [shape: f32[1,320], index: 6, kind: input, shape index: {}]   ;;  %s11005_s7 = inlined_call_operand.vmem [shape: bf16[2,320,192], index: 7, kind: input, shape index: {}]   ;;  %s11006_s8 = inlined_call_operand.vmem [shape: f32[1,192], index: 8, kind: input, shape index: {}]   ;;  %s11007_s9 = inlined_call_operand.vmem [shape: bf16[2,192,112], index: 9, kind: input, shape index: {}]   ;;  %s11008_s10 = inlined_call_operand.vmem [shape: f32[1,112], index: 10, kind: input, shape index: {}]   ;;  %s11009_s11 = inlined_call_operand.vmem [shape: bf16[2,112,8], index: 11, kind: input, shape index: {}]   ;;  %s11010_s12 = inlined_call_operand.vmem [shape: f32[1,8], index: 12, kind: input, shape index: {}]   ;;  %s11011_s13 = inlined_call_operand.vmem [shape: f32[2,8,32], index: 13, kind: output, shape index: {}]  }
   0x1 LB: > { %s8188_s26 = sadd.s32 4294967295, %s8106_s25   ;;  %p5508_p0 = scmp.ge.s32.totalorder %s8106_s25, 1  ;;  %s8106_s25 = sphi %s8182_s25, %s23_s25  }
   0x2   : > { %p389_p1 = scmp.lt.s32.totalorder %s8106_s25, 3 }
   0x4   : > { %p390_p2 = pnand %p5508_p0, %p389_p1 }
   0x5   : > { %s5509_s16 = sshll.u32 (!%p390_p2), %s8188_s26, 1  ;;  %p440_p4 = scmp.lt.s32.totalorder (!%p390_p2), %s8188_s26, 1 }
   0x6   : > { %393 = sbr.rel (%p390_p2) target bundleno = 2673 (0xa71), region = 72  ;;  %p434_p3 = scmp.lt.s32.totalorder (!%p390_p2), %s5509_s16, 3 }
   0x7   : > { %s8109_s28 = smov (!%p390_p2), 8   ;;  %s8110_s29 = smov (!%p390_p2), 16  }
   0x8   : > { %s8111_s14 = smov (!%p390_p2), 24  }
   0xb   : > { %v7638_v0 = vld [vmem:[%s10999_s1 + $0x8] sm:$0xff]  ;;  %v7637_v1 = vld [vmem:[%s10999_s1] sm:$0xff]  ;;  %v7640_v2 = vld [vmem:[%s10999_s1 + $0x18] sm:$0xff]  ;;  %s11015_s16 = smov (!%p434_p3, %s5509_s16), 3  ;;  %vm499_vm0 = vcmask 261120   ;;  %vm670_vm3 = vcmask 916480  }
   0xc   : > { %v7639_v3 = vld [vmem:[%s10999_s1 + $0x10] sm:$0xff]  ;;  %537 = vmatpush.bf16.msra.mxu1 %v7638_v0  ;;  %509 = vmatpush.bf16.msra.mxu0 %v7640_v2  ;;  %s7635_s19 = sshll.u32 %s11015_s16, 3  ;;  %v5661_v9 = vld [vmem:[%s11001_s3 + $0x60] sm:$0xf]  ;;  %v7654_v10 = vld [vmem:[%s11001_s3 + $0x64] sm:$0xf0] }
   0xd   : > { %s8208_s22 = scalar_lea.vmem %s10998_s0, %s7635_s19  ;;  %v7653_v11 = vld [vmem:[%s11001_s3 + $0x64] sm:$0xf]  ;;  %v5662_v12 = vor.u32 %v7654_v10, %v5661_v9  ;;  %v5663_v13 = vld [vmem:[%s11001_s3 + $0x68] sm:$0xf0]  ;;  %v5653_v15 = vld [vmem:[%s11001_s3 + $0x50] sm:$0xf] }
   0xe   : > { %v7636_v4 = vld [vmem:[%s8208_s22] sm:$0xff]  ;;  %v5666_v14 = vor.u32 %v7653_v11, %v5663_v13  ;;  %v7652_v16 = vld [vmem:[%s11001_s3 + $0x54] sm:$0xf0]  ;;  %v7651_v17 = vld [vmem:[%s11001_s3 + $0x54] sm:$0xf]  ;;  %vm1138_vm8 = vcmask 523264  }
   0xf   : > { %v481_v5 = vshrl.u32 %v7636_v4, 16  ;;  %v483_v6 = vshll.u32 %v7636_v4, 16  ;;  %v5654_v18 = vor.u32 %v7652_v16, %v5653_v15  ;;  %v5655_v19 = vld [vmem:[%s11001_s3 + $0x58] sm:$0xf0]  ;;  %v5603_v21 = vld [vmem:[%s11001_s3 + $0xd0] sm:$0xf] }
  0x10   : > { %538 = vmatpush.bf16.msra.mxu1 %v7637_v1  ;;  %510 = vmatpush.bf16.msra.mxu0 %v7639_v3  ;;  %v5658_v20 = vor.u32 %v7651_v17, %v5655_v19  ;;  %v7668_v22 = vld [vmem:[%s11001_s3 + $0xd4] sm:$0xf0]  ;;  %v7667_v23 = vld [vmem:[%s11001_s3 + $0xd4] sm:$0xf]  ;;  %v5605_v25 = vld [vmem:[%s11001_s3 + $0xd8] sm:$0xf0] }
  0x11   : > { %v485_v7 = vrot.slane %v483_v6, 1  ;;  %v5604_v24 = vor.u32 %v7668_v22, %v5603_v21  ;;  %v5608_v26 = vor.u32 %v7667_v23, %v5605_v25  ;;  %v5645_v27 = vld [vmem:[%s11001_s3 + $0x40] sm:$0xf]  ;;  %v7650_v28 = vld [vmem:[%s11001_s3 + $0x44] sm:$0xf0]  ;;  %vm1543_vm11 = vcmask 1040384  }
  0x12   : > { %v7649_v29 = vld [vmem:[%s11001_s3 + $0x44] sm:$0xf]  ;;  %v5646_v30 = vor.u32 %v7650_v28, %v5645_v27  ;;  %v5647_v31 = vld [vmem:[%s11001_s3 + $0x48] sm:$0xf0]  ;;  %v5595_v33 = vld [vmem:[%s11001_s3 + $0xc0] sm:$0xf] }
  0x13   : > { %5538 = vmatmul.msk.bf16.vlgmr.msra.gmra.mxu1 %vm499_vm0, %v7636_v4  ;;  %v486_v8 = vor.u32 %v485_v7, %v481_v5  ;;  %675 = vmatpush.bf16.msra.mxu2 %v5604_v24  ;;  %v5650_v32 = vor.u32 %v7649_v29, %v5647_v31  ;;  %v7666_v34 = vld [vmem:[%s11001_s3 + $0xc4] sm:$0xf0]  ;;  %v7665_v35 = vld [vmem:[%s11001_s3 + $0xc4] sm:$0xf]  ;;  %v5597_v37 = vld [vmem:[%s11001_s3 + $0xc8] sm:$0xf0] }
  0x14   : > { %775 = vmatpush.bf16.msrb.mxu0 %v5662_v12  ;;  %789 = vmatpush.bf16.msrb.mxu1 %v5666_v14  ;;  %v5596_v36 = vor.u32 %v7666_v34, %v5595_v33  ;;  %v5600_v38 = vor.u32 %v7665_v35, %v5597_v37  ;;  %v5637_v39 = vld [vmem:[%s11001_s3 + $0x30] sm:$0xf]  ;;  %v7648_v40 = vld [vmem:[%s11001_s3 + $0x34] sm:$0xf0]  ;;  %v7647_v41 = vld [vmem:[%s11001_s3 + $0x34] sm:$0xf] }
  0x15   : > { %5529 = vmatmul.msk.bf16.vlgmr.msra.gmra.mxu0 %vm499_vm0, %v486_v8  ;;  %689 = vmatpush.bf16.msra.mxu3 %v5608_v26  ;;  %v5638_v42 = vor.u32 %v7648_v40, %v5637_v39  ;;  %v5639_v43 = vld [vmem:[%s11001_s3 + $0x38] sm:$0xf0]  ;;  %v5587_v45 = vld [vmem:[%s11001_s3 + $0xb0] sm:$0xf]  ;;  %v7664_v46 = vld [vmem:[%s11001_s3 + $0xb4] sm:$0xf0] }
  0x16   : > { %v5642_v44 = vor.u32 %v7647_v41, %v5639_v43  ;;  %v7663_v47 = vld [vmem:[%s11001_s3 + $0xb4] sm:$0xf]  ;;  %v5588_v48 = vor.u32 %v7664_v46, %v5587_v45  ;;  %v5589_v49 = vld [vmem:[%s11001_s3 + $0xb8] sm:$0xf0]  ;;  %v5629_v51 = vld [vmem:[%s11001_s3 + $0x20] sm:$0xf] }
  0x17   : > { %676 = vmatpush.bf16.msra.mxu2 %v5596_v36  ;;  %v5592_v50 = vor.u32 %v7663_v47, %v5589_v49  ;;  %v7646_v52 = vld [vmem:[%s11001_s3 + $0x24] sm:$0xf0]  ;;  %v7645_v53 = vld [vmem:[%s11001_s3 + $0x24] sm:$0xf]  ;;  %v5631_v55 = vld [vmem:[%s11001_s3 + $0x28] sm:$0xf0] }
  0x18   : > { %776 = vmatpush.bf16.msrb.mxu0 %v5654_v18  ;;  %790 = vmatpush.bf16.msrb.mxu1 %v5658_v20  ;;  %v5630_v54 = vor.u32 %v7646_v52, %v5629_v51  ;;  %v5634_v56 = vor.u32 %v7645_v53, %v5631_v55  ;;  %v5579_v57 = vld [vmem:[%s11001_s3 + $0xa0] sm:$0xf]  ;;  %v7662_v58 = vld [vmem:[%s11001_s3 + $0xa4] sm:$0xf0]  ;;  %v7661_v59 = vld [vmem:[%s11001_s3 + $0xa4] sm:$0xf] }
  0x19   : > { %690 = vmatpush.bf16.msra.mxu3 %v5600_v38  ;;  %v5580_v60 = vor.u32 %v7662_v58, %v5579_v57  ;;  %v5581_v61 = vld [vmem:[%s11001_s3 + $0xa8] sm:$0xf0]  ;;  %v5621_v63 = vld [vmem:[%s11001_s3 + $0x10] sm:$0xf]  ;;  %v7644_v0 = vld [vmem:[%s11001_s3 + $0x14] sm:$0xf0] }
  0x1a   : > { %v5584_v62 = vor.u32 %v7661_v59, %v5581_v61  ;;  %v7643_v1 = vld [vmem:[%s11001_s3 + $0x14] sm:$0xf]  ;;  %v5622_v2 = vor.u32 %v7644_v0, %v5621_v63  ;;  %v5623_v3 = vld [vmem:[%s11001_s3 + $0x18] sm:$0xf0]  ;;  %v5571_v5 = vld [vmem:[%s11001_s3 + $0x90] sm:$0xf] }
  0x1b   : > { %677 = vmatpush.bf16.msra.mxu2 %v5588_v48  ;;  %v5626_v4 = vor.u32 %v7643_v1, %v5623_v3  ;;  %v7660_v6 = vld [vmem:[%s11001_s3 + $0x94] sm:$0xf0]  ;;  %v7659_v7 = vld [vmem:[%s11001_s3 + $0x94] sm:$0xf]  ;;  %v5573_v9 = vld [vmem:[%s11001_s3 + $0x98] sm:$0xf0] }
  0x1c   : > { %777 = vmatpush.bf16.msrb.mxu0 %v5646_v30  ;;  %791 = vmatpush.bf16.msrb.mxu1 %v5650_v32  ;;  %v5572_v8 = vor.u32 %v7660_v6, %v5571_v5  ;;  %v5576_v10 = vor.u32 %v7659_v7, %v5573_v9  ;;  %v5613_v11 = vld [vmem:[%s11001_s3] sm:$0xf]  ;;  %v7642_v12 = vld [vmem:[%s11001_s3 + $0x4] sm:$0xf0]  ;;  %v7641_v13 = vld [vmem:[%s11001_s3 + $0x4] sm:$0xf] }
  0x1d   : > { %691 = vmatpush.bf16.msra.mxu3 %v5592_v50  ;;  %v5614_v14 = vor.u32 %v7642_v12, %v5613_v11  ;;  %v5615_v15 = vld [vmem:[%s11001_s3 + $0x8] sm:$0xf0]  ;;  %v5563_v17 = vld [vmem:[%s11001_s3 + $0x80] sm:$0xf]  ;;  %v7658_v18 = vld [vmem:[%s11001_s3 + $0x84] sm:$0xf0] }
  0x1e   : > { %v5618_v16 = vor.u32 %v7641_v13, %v5615_v15  ;;  %v7657_v19 = vld [vmem:[%s11001_s3 + $0x84] sm:$0xf]  ;;  %v5564_v20 = vor.u32 %v7658_v18, %v5563_v17  ;;  %v5565_v21 = vld [vmem:[%s11001_s3 + $0x88] sm:$0xf0]  ;;  %v5555_v23 = vld [vmem:[%s11001_s3 + $0x70] sm:$0xf] }
  0x1f   : > { %678 = vmatpush.bf16.msra.mxu2 %v5580_v60  ;;  %v5568_v22 = vor.u32 %v7657_v19, %v5565_v21  ;;  %v7656_v24 = vld [vmem:[%s11001_s3 + $0x74] sm:$0xf0]  ;;  %v7655_v25 = vld [vmem:[%s11001_s3 + $0x74] sm:$0xf]  ;;  %v5557_v27 = vld [vmem:[%s11001_s3 + $0x78] sm:$0xf0] }
  0x20   : > { %778 = vmatpush.bf16.msrb.mxu0 %v5638_v42  ;;  %792 = vmatpush.bf16.msrb.mxu1 %v5642_v44  ;;  %v5556_v26 = vor.u32 %v7656_v24, %v5555_v23  ;;  %v5560_v28 = vor.u32 %v7655_v25, %v5557_v27  ;;  %v5803_v29 = vld [vmem:[%s11003_s5 + $0x1c8] sm:$0xf]  ;;  %v7727_v30 = vld [vmem:[%s11003_s5 + $0x1d0] sm:$0xf0]  ;;  %v7726_v31 = vld [vmem:[%s11003_s5 + $0x1cc] sm:$0xf] }
  0x21   : > { %692 = vmatpush.bf16.msra.mxu3 %v5584_v62  ;;  %v5804_v32 = vor.u32 %v7727_v30, %v5803_v29  ;;  %v5805_v33 = vld [vmem:[%s11003_s5 + $0x1d4] sm:$0xf0]  ;;  %v8094_v36 = vld [vmem:[%s11000_s2] ss:$0 sm:$0xff]  ;;  %v5791_v57 = vld [vmem:[%s11003_s5 + $0x1b0] sm:$0xf] }
  0x22   : > { %v5808_v35 = vor.u32 %v7726_v31, %v5805_v33  ;;  %v7724_v58 = vld [vmem:[%s11003_s5 + $0x1b8] sm:$0xf0]  ;;  %v7723_v60 = vld [vmem:[%s11003_s5 + $0x1b4] sm:$0xf]  ;;  %v5793_v61 = vld [vmem:[%s11003_s5 + $0x1bc] sm:$0xf0] }
  0x23   : > { %679 = vmatpush.bf16.msra.mxu2 %v5572_v8  ;;  %v5792_v59 = vor.u32 %v7724_v58, %v5791_v57  ;;  %v5779_v62 = vld [vmem:[%s11003_s5 + $0x198] sm:$0xf]  ;;  %v5796_v63 = vor.u32 %v7723_v60, %v5793_v61  ;;  %v7721_v0 = vld [vmem:[%s11003_s5 + $0x1a0] sm:$0xf0]  ;;  %v7720_v1 = vld [vmem:[%s11003_s5 + $0x19c] sm:$0xf] }
  0x24   : > { %779 = vmatpush.bf16.msrb.mxu0 %v5630_v54  ;;  %793 = vmatpush.bf16.msrb.mxu1 %v5634_v56  ;;  %v5780_v3 = vor.u32 %v7721_v0, %v5779_v62  ;;  %v5767_v5 = vld [vmem:[%s11003_s5 + $0x180] sm:$0xf]  ;;  %v7718_v6 = vld [vmem:[%s11003_s5 + $0x188] sm:$0xf0]  ;;  %v7717_v8 = vld [vmem:[%s11003_s5 + $0x184] sm:$0xf] }
  0x25   : > { %693 = vmatpush.bf16.msra.mxu3 %v5576_v10  ;;  %v5768_v7 = vor.u32 %v7718_v6, %v5767_v5  ;;  %v5769_v9 = vld [vmem:[%s11003_s5 + $0x18c] sm:$0xf0]  ;;  %v5755_v11 = vld [vmem:[%s11003_s5 + $0x168] sm:$0xf]  ;;  %v7715_v12 = vld [vmem:[%s11003_s5 + $0x170] sm:$0xf0] }
  0x26   : > { %v5772_v10 = vor.u32 %v7717_v8, %v5769_v9  ;;  %v5851_v13 = vld [vmem:[%s11003_s5 + $0x228] sm:$0xf]  ;;  %v7739_v15 = vld [vmem:[%s11003_s5 + $0x230] sm:$0xf0]  ;;  %v7714_v17 = vld [vmem:[%s11003_s5 + $0x16c] sm:$0xf] }
  0x27   : > { %680 = vmatpush.bf16.msra.mxu2 %v5564_v20  ;;  %v5757_v18 = vld [vmem:[%s11003_s5 + $0x174] sm:$0xf0]  ;;  %v7738_v20 = vld [vmem:[%s11003_s5 + $0x22c] sm:$0xf]  ;;  %v5743_v23 = vld [vmem:[%s11003_s5 + $0x150] sm:$0xf] }
  0x28   : > { %780 = vmatpush.bf16.msrb.mxu0 %v5622_v2  ;;  %794 = vmatpush.bf16.msrb.mxu1 %v5626_v4  ;;  %v5781_v2 = vld [vmem:[%s11003_s5 + $0x1a4] sm:$0xf0]  ;;  %v5760_v19 = vor.u32 %v7714_v17, %v5757_v18  ;;  %v5853_v21 = vld [vmem:[%s11003_s5 + $0x234] sm:$0xf0]  ;;  %v7712_v24 = vld [vmem:[%s11003_s5 + $0x158] sm:$0xf0] }
  0x29   : > { %694 = vmatpush.bf16.msra.mxu3 %v5568_v22  ;;  %v5784_v4 = vor.u32 %v7720_v1, %v5781_v2  ;;  %v5856_v22 = vor.u32 %v7738_v20, %v5853_v21  ;;  %v5839_v25 = vld [vmem:[%s11003_s5 + $0x210] sm:$0xf]  ;;  %v7736_v27 = vld [vmem:[%s11003_s5 + $0x218] sm:$0xf0]  ;;  %v7711_v29 = vld [vmem:[%s11003_s5 + $0x154] sm:$0xf] }
  0x2a   : > { %v5745_v30 = vld [vmem:[%s11003_s5 + $0x15c] sm:$0xf0]  ;;  %v7735_v31 = vld [vmem:[%s11003_s5 + $0x214] sm:$0xf]  ;;  %v5721_v60 = vld [vmem:[%s11003_s5 + $0x12c] sm:$0xf0] }
  0x2b   : > { %681 = vmatpush.bf16.msra.mxu2 %v5556_v26  ;;  %v5744_v26 = vor.u32 %v7712_v24, %v5743_v23  ;;  %v5841_v33 = vld [vmem:[%s11003_s5 + $0x21c] sm:$0xf0]  ;;  %v7729_v61 = vld [vmem:[%s11003_s5 + $0x1e4] sm:$0xf]  ;;  %v5859_v0 = vld [vmem:[%s11003_s5 + $0x230] sm:$0xf] }
  0x2c   : > { %781 = vmatpush.bf16.msrb.mxu0 %v5614_v14  ;;  %795 = vmatpush.bf16.msrb.mxu1 %v5618_v16  ;;  %v5756_v14 = vor.u32 %v7715_v12, %v5755_v11  ;;  %v5852_v16 = vor.u32 %v7739_v15, %v5851_v13  ;;  %v7740_v1 = vld [vmem:[%s11003_s5 + $0x238] sm:$0xf0]  ;;  %v7703_v5 = vld [vmem:[%s11003_s5 + $0x110] sm:$0xf0]  ;;  %v5799_v6 = vld [vmem:[%s11003_s5 + $0x1b8] sm:$0xf] }
  0x2d   : > { %695 = vmatpush.bf16.msra.mxu3 %v5560_v28  ;;  %v5840_v28 = vor.u32 %v7736_v27, %v5839_v25  ;;  %v7725_v8 = vld [vmem:[%s11003_s5 + $0x1c0] sm:$0xf0]  ;;  %v5938_v9 = vld [vmem:[%s11003_s5 + $0x90] sm:$0xf]  ;;  %v5847_v13 = vld [vmem:[%s11003_s5 + $0x218] sm:$0xf] }
  0x2e   : > { %v5800_v11 = vor.u32 %v7725_v8, %v5799_v6  ;;  %v5986_v15 = vld [vmem:[%s11003_s5 + $0xf0] sm:$0xf]  ;;  %v7700_v17 = vld [vmem:[%s11003_s5 + $0xf8] sm:$0xf0]  ;;  %v5787_v18 = vld [vmem:[%s11003_s5 + $0x1a0] sm:$0xf] }
  0x2f   : > { %1142 = vmatpush.bf16.msrb.mxu2 %v5804_v32  ;;  %v5748_v32 = vor.u32 %v7711_v29, %v5745_v30  ;;  %v5987_v20 = vor.u32 %v7700_v17, %v5986_v15  ;;  %v7685_v23 = vld [vmem:[%s11003_s5 + $0x80] sm:$0xf0]  ;;  %v5835_v25 = vld [vmem:[%s11003_s5 + $0x200] sm:$0xf]  ;;  %v5974_v27 = vld [vmem:[%s11003_s5 + $0xd8] sm:$0xf] }
  0x30   : > { %1170 = vmatpush.bf16.msra.mxu0 %v5808_v35  ;;  %1188 = vmatpush.bf16.msra.mxu1 %v5856_v22  ;;  %v7709_v35 = vld [vmem:[%s11003_s5 + $0x140] sm:$0xf0]  ;;  %v5926_v22 = vld [vmem:[%s11003_s5 + $0x78] sm:$0xf]  ;;  %v5775_v30 = vld [vmem:[%s11003_s5 + $0x188] sm:$0xf] }
  0x31   : > { %1160 = vmatpush.bf16.msrb.mxu3 %v5852_v16  ;;  %v5927_v24 = vor.u32 %v7685_v23, %v5926_v22  ;;  %v7697_v29 = vld [vmem:[%s11003_s5 + $0xe0] sm:$0xf0]  ;;  %vm1561_vm13 = vcmask 523265   ;;  %s11017_s26 = smov (!%p440_p4, %s8188_s26), 1 }
  0x32   : > { %v7673_v6 = vld [vmem:[%s11003_s5 + $0x20] sm:$0xf0]  ;;  %s5512_s30 = sshll.u32 %s11017_s26, 3 }
  0x33   : > { %1143 = vmatpush.bf16.msrb.mxu2 %v5792_v59  ;;  %v7705_v59 = vld [vmem:[%s11003_s5 + $0x124] sm:$0xf]  ;;  %s9735_s17 = scalar_lea.vmem %s11011_s13, %s5512_s30 }
  0x34   : > { %1171 = vmatpush.bf16.msra.mxu0 %v5796_v63  ;;  %v5724_v62 = vor.u32 %v7705_v59, %v5721_v60  ;;  %v5817_v63 = vld [vmem:[%s11003_s5 + $0x1ec] sm:$0xf0] }
  0x35   : > { %1161 = vmatpush.bf16.msrb.mxu3 %v5840_v28  ;;  %v5820_v2 = vor.u32 %v7729_v61, %v5817_v63 }
  0x37   : > { %1144 = vmatpush.bf16.msrb.mxu2 %v5780_v3  ;;  %v5860_v3 = vor.u32 %v7740_v1, %v5859_v0  ;;  %v5739_v0 = vld [vmem:[%s11003_s5 + $0x140] sm:$0xf]  ;;  %v7710_v1 = vld [vmem:[%s11003_s5 + $0x148] sm:$0xf0] }
  0x38   : > { %1172 = vmatpush.bf16.msra.mxu0 %v5784_v4  ;;  %v5998_v4 = vld [vmem:[%s11003_s5 + $0x108] sm:$0xf] }
  0x3b   : > { %1145 = vmatpush.bf16.msrb.mxu2 %v5768_v7  ;;  %v5999_v7 = vor.u32 %v7703_v5, %v5998_v4  ;;  %v5740_v5 = vor.u32 %v7710_v1, %v5739_v0  ;;  %v7699_v0 = vld [vmem:[%s11003_s5 + $0xf4] sm:$0xf]  ;;  %v5988_v1 = vld [vmem:[%s11003_s5 + $0xfc] sm:$0xf0] }
  0x3c   : > { %1173 = vmatpush.bf16.msra.mxu0 %v5772_v10  ;;  %v7688_v10 = vld [vmem:[%s11003_s5 + $0x98] sm:$0xf0] }
  0x3d   : > { %v5939_v12 = vor.u32 %v7688_v10, %v5938_v9  ;;  %v5727_v9 = vld [vmem:[%s11003_s5 + $0x128] sm:$0xf]  ;;  %v7707_v10 = vld [vmem:[%s11003_s5 + $0x130] sm:$0xf0] }
  0x3e   : > { %v5728_v15 = vor.u32 %v7707_v10, %v5727_v9  ;;  %v5991_v9 = vor.u32 %v7699_v0, %v5988_v1  ;;  %v5982_v10 = vld [vmem:[%s11003_s5 + $0xe0] sm:$0xf]  ;;  %v7820_v0 = vld [vmem:[%s11005_s7 + $0x274] sm:$0xf0]  ;;  %v7795_v1 = vld [vmem:[%s11005_s7 + $0x1b4] sm:$0xf] }
  0x3f   : > { %1146 = vmatpush.bf16.msrb.mxu2 %v5756_v14  ;;  %v7737_v14 = vld [vmem:[%s11003_s5 + $0x220] sm:$0xf0] }
  0x40   : > { %1174 = vmatpush.bf16.msra.mxu0 %v5760_v19  ;;  %v5848_v16 = vor.u32 %v7737_v14, %v5847_v13  ;;  %v7722_v19 = vld [vmem:[%s11003_s5 + $0x1a8] sm:$0xf0] }
  0x41   : > { %v5788_v21 = vor.u32 %v7722_v19, %v5787_v18 }
  0x43   : > { %1147 = vmatpush.bf16.msrb.mxu2 %v5744_v26  ;;  %v7734_v26 = vld [vmem:[%s11003_s5 + $0x208] sm:$0xf0] }
  0x44   : > { %1175 = vmatpush.bf16.msra.mxu0 %v5748_v32  ;;  %v5836_v28 = vor.u32 %v7734_v26, %v5835_v25  ;;  %v5975_v32 = vor.u32 %v7697_v29, %v5974_v27 }
  0x90   : > { %v540_v34 = vpop.f32.mrf.mxu1 }
  0x92   : > { %v512_v37 = vpop.f32.mrf.mxu0 }
  0x93   : > { %v541_v38 = vadd.f32 %v540_v34, %v512_v37  ;;  %v5731_v34 = vld [vmem:[%s11003_s5 + $0x138] sm:$0xf] }
  0x94   : > { %v5732_v37 = vor.u32 %v7709_v35, %v5731_v34  ;;  %v7682_v34 = vld [vmem:[%s11003_s5 + $0x68] sm:$0xf0] }
  0x95   : > { %v549_v39 = vadd.f32 %v8094_v36, %v541_v38  ;;  %v5827_v38 = vld [vmem:[%s11003_s5 + $0x1f8] sm:$0xf] }
  0x96   : > { %1148 = vmatpush.bf16.msrb.mxu2 %v5732_v37  ;;  %v5823_v37 = vld [vmem:[%s11003_s5 + $0x1e8] sm:$0xf] }
  0x97   : > { %v553_v40 = vmul.f32 0.5, %v549_v39  ;;  %vm551_vm1 = vcmp.gt.f32.partialorder %v549_v39, 0.0 }
  0x98   : > { %v542_v41 = vpop.f32.mrf.mxu1 }
  0x99   : > { %v555_v44 = vsel %vm551_vm1, %v549_v39, %v553_v40  ;;  %v7733_v39 = vld [vmem:[%s11003_s5 + $0x200] sm:$0xf0] }
  0x9a   : > { %v514_v42 = vpop.f32.mrf.mxu0  ;;  %v557_v47 = vpack.c.bf16 %v555_v44, %v555_v44  ;;  %v5828_v40 = vor.u32 %v7733_v39, %v5827_v38  ;;  %v7731_v38 = vld [vmem:[%s11003_s5 + $0x1f0] sm:$0xf0]  ;;  %v5962_v39 = vld [vmem:[%s11003_s5 + $0xc0] sm:$0xf] }
  0x9b   : > { %v543_v43 = vadd.f32 %v542_v41, %v514_v42  ;;  %v7708_v41 = vld [vmem:[%s11003_s5 + $0x13c] sm:$0xf]  ;;  %v5733_v42 = vld [vmem:[%s11003_s5 + $0x144] sm:$0xf0] }
  0x9c   : > { %v590_v50 = vunpack.c.l.b16 %v557_v47  ;;  %v5736_v44 = vor.u32 %v7708_v41, %v5733_v42  ;;  %v7706_v47 = vld [vmem:[%s11003_s5 + $0x128] sm:$0xf0]  ;;  %1162 = vmatpush.bf16.msrb.mxu3 %v5828_v40  ;;  %v802_v40 = vld [vmem:[%s11002_s4] sm:$0x3]  ;;  %v5824_v41 = vor.u32 %v7731_v38, %v5823_v37 }
  0x9d   : > { %v550_v45 = vadd.f32 %v8094_v36, %v543_v43  ;;  %v5844_v36 = vor.u32 %v7735_v31, %v5841_v33  ;;  %v7732_v43 = vld [vmem:[%s11003_s5 + $0x1fc] sm:$0xf]  ;;  %v7719_v31 = vld [vmem:[%s11003_s5 + $0x190] sm:$0xf0]  ;;  %v5914_v33 = vld [vmem:[%s11003_s5 + $0x60] sm:$0xf] }
  0x9e   : > { %1176 = vmatpush.bf16.msra.mxu0 %v5736_v44  ;;  %v5776_v35 = vor.u32 %v7719_v31, %v5775_v30  ;;  %v7694_v42 = vld [vmem:[%s11003_s5 + $0xc8] sm:$0xf0] }
  0x9f   : > { %vm552_vm2 = vcmp.gt.f32.partialorder %v550_v45, 0.0  ;;  %v554_v46 = vmul.f32 0.5, %v550_v45  ;;  %1189 = vmatpush.bf16.msra.mxu1 %v5844_v36  ;;  %v5915_v36 = vor.u32 %v7682_v34, %v5914_v33  ;;  %v5963_v44 = vor.u32 %v7694_v42, %v5962_v39  ;;  %v7690_v38 = vld [vmem:[%s11003_s5 + $0xac] sm:$0xf]  ;;  %v5952_v39 = vld [vmem:[%s11003_s5 + $0xb4] sm:$0xf0] }
  0xa0   : > { %v5958_v42 = vld [vmem:[%s11003_s5 + $0xb0] sm:$0xf] }
  0xa1   : > { %v556_v48 = vsel %vm552_vm2, %v550_v45, %v554_v46  ;;  %v5829_v45 = vld [vmem:[%s11003_s5 + $0x204] sm:$0xf0]  ;;  %v5719_v46 = vld [vmem:[%s11003_s5 + $0x120] sm:$0xf] }
  0xa2   : > { %v558_v49 = vpack.c.bf16 %v556_v48, %v556_v48  ;;  %v5832_v48 = vor.u32 %v7732_v43, %v5829_v45  ;;  %1177 = vmatpush.bf16.msra.mxu0 %v5724_v62  ;;  %v5763_v43 = vld [vmem:[%s11003_s5 + $0x170] sm:$0xf]  ;;  %v7716_v45 = vld [vmem:[%s11003_s5 + $0x178] sm:$0xf0] }
  0xa4   : > { %v591_v51 = vunpack.c.l.b16 %v558_v49  ;;  %v5720_v49 = vor.u32 %v7706_v47, %v5719_v46  ;;  %1190 = vmatpush.bf16.msra.mxu1 %v5832_v48  ;;  %v5902_v46 = vld [vmem:[%s11003_s5 + $0x48] sm:$0xf]  ;;  %v7679_v47 = vld [vmem:[%s11003_s5 + $0x50] sm:$0xf0] }
  0xa6   : > { %v592_v52 = vpack.c.b16 %v591_v51, %v590_v50  ;;  %v5815_v50 = vld [vmem:[%s11003_s5 + $0x1e0] sm:$0xf]  ;;  %v7730_v51 = vld [vmem:[%s11003_s5 + $0x1e8] sm:$0xf0]  ;;  %1149 = vmatpush.bf16.msrb.mxu2 %v5720_v49 }
  0xa8   : > { %5667 = vmatmul.msk.bf16.vlgmr.msrb.gmra.mxu0 %vm670_vm3, %v592_v52  ;;  %5668 = vmatmul.msk.bf16.vlgmr.msrb.gmra.mxu1 %vm670_vm3, %v592_v52  ;;  %v596_v53 = vshll.u32 %v592_v52, 16  ;;  %v594_v54 = vshrl.u32 %v592_v52, 16  ;;  %v5811_v52 = vld [vmem:[%s11003_s5 + $0x1d0] sm:$0xf] }
  0xa9   : > { %1191 = vmatpush.bf16.msra.mxu1 %v5820_v2  ;;  %1439 = vmatpush.bf16.msrb.mxu0 %v5999_v7  ;;  %v5878_v2 = vld [vmem:[%s11003_s5 + $0x18] sm:$0xf] }
  0xaa   : > { %v598_v55 = vrot.slane %v596_v53, 1  ;;  %v5816_v53 = vor.u32 %v7730_v51, %v5815_v50  ;;  %v5764_v50 = vor.u32 %v7716_v45, %v5763_v43  ;;  %v5903_v51 = vor.u32 %v7679_v47, %v5902_v46  ;;  %v7692_v43 = vld [vmem:[%s11003_s5 + $0xb8] sm:$0xf0]  ;;  %v7702_v46 = vld [vmem:[%s11003_s5 + $0x10c] sm:$0xf] }
  0xab   : > { %v5879_v7 = vor.u32 %v7673_v6, %v5878_v2  ;;  %v7704_v45 = vld [vmem:[%s11003_s5 + $0x118] sm:$0xf0]  ;;  %v5934_v6 = vld [vmem:[%s11003_s5 + $0x80] sm:$0xf] }
  0xac   : > { %v599_v56 = vor.u32 %v598_v55, %v594_v54  ;;  %v7728_v54 = vld [vmem:[%s11003_s5 + $0x1d8] sm:$0xf0]  ;;  %v5950_v55 = vld [vmem:[%s11003_s5 + $0xa8] sm:$0xf]  ;;  %1163 = vmatpush.bf16.msrb.mxu3 %v5816_v53  ;;  %v7713_v53 = vld [vmem:[%s11003_s5 + $0x160] sm:$0xf0] }
  0xad   : > { %v5812_v57 = vor.u32 %v7728_v54, %v5811_v52  ;;  %1216 = vmatpush.bf16.msrb.mxu1 %v5860_v3  ;;  %1440 = vmatpush.bf16.msrb.mxu0 %v5987_v20  ;;  %v5751_v52 = vld [vmem:[%s11003_s5 + $0x158] sm:$0xf]  ;;  %v804_v54 = vperm.slane %v802_v40, 0 }
  0xae   : > { %5609 = vmatmul.msk.bf16.vlgmr.msra.gmra.mxu2 %vm670_vm3, %v599_v56  ;;  %5610 = vmatmul.msk.bf16.vlgmr.msra.gmra.mxu3 %vm670_vm3, %v599_v56  ;;  %v7691_v56 = vld [vmem:[%s11003_s5 + $0xb0] sm:$0xf0] }
  0xaf   : > { %v5951_v58 = vor.u32 %v7691_v56, %v5950_v55  ;;  %v805_v55 = vperm.slane %v802_v40, 1  ;;  %v5752_v56 = vor.u32 %v7713_v53, %v5751_v52 }
  0xb0   : > { %1198 = vmatpush.bf16.msra.mxu3 %v5812_v57  ;;  %v5890_v57 = vld [vmem:[%s11003_s5 + $0x30] sm:$0xf] }
  0xb1   : > { %1421 = vmatpush.bf16.msra.mxu2 %v5951_v58  ;;  %1217 = vmatpush.bf16.msrb.mxu1 %v5848_v16  ;;  %v7676_v58 = vld [vmem:[%s11003_s5 + $0x38] sm:$0xf0]  ;;  %v7670_v16 = vld [vmem:[%s11003_s5 + $0x8] sm:$0xf0] }
  0xb2   : > { %1441 = vmatpush.bf16.msrb.mxu0 %v5975_v32  ;;  %v5891_v61 = vor.u32 %v7676_v58, %v5890_v57  ;;  %v5940_v57 = vld [vmem:[%s11003_s5 + $0x9c] sm:$0xf0]  ;;  %v5946_v58 = vld [vmem:[%s11003_s5 + $0x98] sm:$0xf] }
  0xb4   : > { %1199 = vmatpush.bf16.msra.mxu3 %v5800_v11  ;;  %v5866_v11 = vld [vmem:[%s11003_s5] sm:$0xf] }
  0xb5   : > { %1422 = vmatpush.bf16.msra.mxu2 %v5939_v12  ;;  %1218 = vmatpush.bf16.msrb.mxu1 %v5836_v28  ;;  %v5867_v19 = vor.u32 %v7670_v16, %v5866_v11  ;;  %v7698_v11 = vld [vmem:[%s11003_s5 + $0xe8] sm:$0xf0]  ;;  %v7681_v16 = vld [vmem:[%s11003_s5 + $0x64] sm:$0xf] }
  0xb6   : > { %1442 = vmatpush.bf16.msrb.mxu0 %v5963_v44  ;;  %v6006_v44 = vld [vmem:[%s11003_s5 + $0x110] sm:$0xf] }
  0xb8   : > { %1200 = vmatpush.bf16.msra.mxu3 %v5788_v21 }
  0xb9   : > { %1423 = vmatpush.bf16.msra.mxu2 %v5927_v24  ;;  %1219 = vmatpush.bf16.msrb.mxu1 %v5824_v41 }
  0xbc   : > { %1201 = vmatpush.bf16.msra.mxu3 %v5776_v35 }
  0xbd   : > { %1424 = vmatpush.bf16.msra.mxu2 %v5915_v36 }
  0xc0   : > { %1202 = vmatpush.bf16.msra.mxu3 %v5764_v50 }
  0xc1   : > { %1425 = vmatpush.bf16.msra.mxu2 %v5903_v51  ;;  %v6000_v51 = vld [vmem:[%s11003_s5 + $0x114] sm:$0xf0] }
  0xc4   : > { %1203 = vmatpush.bf16.msra.mxu3 %v5752_v56  ;;  %v7687_v56 = vld [vmem:[%s11003_s5 + $0x94] sm:$0xf] }
  0xc5   : > { %1426 = vmatpush.bf16.msra.mxu2 %v5891_v61  ;;  %v6003_v61 = vor.u32 %v7702_v46, %v6000_v51  ;;  %v5943_v2 = vor.u32 %v7687_v56, %v5940_v57  ;;  %v5886_v46 = vld [vmem:[%s11003_s5 + $0x20] sm:$0xf]  ;;  %v5868_v51 = vld [vmem:[%s11003_s5 + $0xc] sm:$0xf0]  ;;  %v7812_v57 = vld [vmem:[%s11005_s7 + $0x234] sm:$0xf0] }
  0xc6   : > { %v6173_v56 = vld [vmem:[%s11005_s7 + $0x230] sm:$0xf] }
  0xc8   : > { %1204 = vmatpush.bf16.msra.mxu3 %v5740_v5  ;;  %v5928_v5 = vld [vmem:[%s11003_s5 + $0x84] sm:$0xf0] }
  0xc9   : > { %1427 = vmatpush.bf16.msra.mxu2 %v5879_v7  ;;  %v7686_v7 = vld [vmem:[%s11003_s5 + $0x88] sm:$0xf0] }
  0xcc   : > { %1205 = vmatpush.bf16.msra.mxu3 %v5728_v15  ;;  %v5935_v15 = vor.u32 %v7686_v7, %v5934_v6  ;;  %v7810_v6 = vld [vmem:[%s11005_s7 + $0x224] sm:$0xf0]  ;;  %v6167_v7 = vld [vmem:[%s11005_s7 + $0x228] sm:$0xf0] }
  0xcd   : > { %1428 = vmatpush.bf16.msra.mxu2 %v5867_v19  ;;  %v7683_v19 = vld [vmem:[%s11003_s5 + $0x70] sm:$0xf0] }
 0x125   : > { %v783_v48 = vpop.f32.mrf.mxu0  ;;  %v797_v49 = vpop.f32.mrf.mxu1 }
 0x12d   : > { %v785_v12 = vpop.f32.mrf.mxu0  ;;  %v799_v13 = vpop.f32.mrf.mxu1 }
 0x131   : > { %v683_v59 = vpop.f32.mrf.mxu2  ;;  %v697_v60 = vpop.f32.mrf.mxu3 }
 0x132   : > { %v784_v62 = vadd.f32 %v783_v48, %v683_v59  ;;  %v798_v63 = vadd.f32 %v797_v49, %v697_v60  ;;  %v7689_v59 = vld [vmem:[%s11003_s5 + $0xa0] sm:$0xf0]  ;;  %v6007_v60 = vor.u32 %v7704_v45, %v6006_v44  ;;  %v7672_v44 = vld [vmem:[%s11003_s5 + $0x1c] sm:$0xf]  ;;  %v5880_v45 = vld [vmem:[%s11003_s5 + $0x24] sm:$0xf0] }
 0x134   : > { %v808_v3 = vadd.f32 %v804_v54, %v784_v62  ;;  %v809_v4 = vadd.f32 %v805_v55, %v798_v63  ;;  %v5994_v62 = vld [vmem:[%s11003_s5 + $0xf8] sm:$0xf]  ;;  %v7701_v63 = vld [vmem:[%s11003_s5 + $0x100] sm:$0xf0] }
 0x136   : > { %v816_v8 = vmul.f32 0.5, %v808_v3  ;;  %vm812_vm4 = vcmp.gt.f32.partialorder %v808_v3, 0.0  ;;  %v817_v14 = vmul.f32 0.5, %v809_v4  ;;  %vm813_vm5 = vcmp.gt.f32.partialorder %v809_v4, 0.0 }
 0x138   : > { %v820_v22 = vsel %vm812_vm4, %v808_v3, %v816_v8  ;;  %v821_v23 = vsel %vm813_vm5, %v809_v4, %v817_v14  ;;  %v5947_v3 = vor.u32 %v7689_v59, %v5946_v58  ;;  %v7684_v4 = vld [vmem:[%s11003_s5 + $0x7c] sm:$0xf]  ;;  %v5995_v8 = vor.u32 %v7701_v63, %v5994_v62  ;;  %v6205_v62 = vld [vmem:[%s11005_s7 + $0x270] sm:$0xf] }
 0x139   : > { %v685_v17 = vpop.f32.mrf.mxu2  ;;  %v699_v18 = vpop.f32.mrf.mxu3  ;;  %v824_v28 = vpack.c.bf16 %v821_v23, %v820_v22  ;;  %v5931_v14 = vor.u32 %v7684_v4, %v5928_v5  ;;  %v5970_v22 = vld [vmem:[%s11003_s5 + $0xc8] sm:$0xf]  ;;  %v7695_v23 = vld [vmem:[%s11003_s5 + $0xd0] sm:$0xf0]  ;;  %v6174_v58 = vor.u32 %v7812_v57, %v6173_v56  ;;  %v445_v59 = vlaneseq  ;;  %v6165_v5 = vld [vmem:[%s11005_s7 + $0x220] sm:$0xf] }
 0x13a   : > { %v786_v20 = vadd.f32 %v785_v12, %v685_v17  ;;  %v800_v21 = vadd.f32 %v799_v13, %v699_v18  ;;  %v7696_v12 = vld [vmem:[%s11003_s5 + $0xdc] sm:$0xf]  ;;  %v5976_v13 = vld [vmem:[%s11003_s5 + $0xe4] sm:$0xf0]  ;;  %v5916_v17 = vld [vmem:[%s11003_s5 + $0x6c] sm:$0xf0] }
 0x13b   : > { %v925_v32 = vunpack.c.l.b16 %v824_v28  ;;  %v926_v33 = vunpack.c.h.b16 %v824_v28  ;;  %v5922_v18 = vld [vmem:[%s11003_s5 + $0x68] sm:$0xf]  ;;  %v7678_v28 = vld [vmem:[%s11003_s5 + $0x4c] sm:$0xf]  ;;  %vm8888_vm9 = vcmp.lt.s32.totalorder %v445_v59, 320  ;;  %vm1565_vm4 = vcmask 521216  }
 0x13c   : > { %v810_v24 = vadd.f32 %v804_v54, %v786_v20  ;;  %v811_v25 = vadd.f32 %v805_v55, %v800_v21  ;;  %v5955_v54 = vor.u32 %v7690_v38, %v5952_v39  ;;  %v5959_v55 = vor.u32 %v7692_v43, %v5958_v42  ;;  %v7675_v38 = vld [vmem:[%s11003_s5 + $0x34] sm:$0xf]  ;;  %v5892_v39 = vld [vmem:[%s11003_s5 + $0x3c] sm:$0xf0] }
 0x13d   : > { %v5983_v20 = vor.u32 %v7698_v11, %v5982_v10  ;;  %v5979_v21 = vor.u32 %v7696_v12, %v5976_v13  ;;  %v5895_v42 = vor.u32 %v7675_v38, %v5892_v39  ;;  %v6101_v12 = vld [vmem:[%s11005_s7 + $0x1a0] sm:$0xf]  ;;  %v7794_v13 = vld [vmem:[%s11005_s7 + $0x1a4] sm:$0xf0]  ;;  %v7811_v57 = vld [vmem:[%s11005_s7 + $0x234] sm:$0xf] }
 0x13e   : > { %vm814_vm6 = vcmp.gt.f32.partialorder %v810_v24, 0.0  ;;  %v818_v26 = vmul.f32 0.5, %v810_v24  ;;  %vm815_vm7 = vcmp.gt.f32.partialorder %v811_v25, 0.0  ;;  %v819_v27 = vmul.f32 0.5, %v811_v25  ;;  %v7806_v38 = vld [vmem:[%s11005_s7 + $0x204] sm:$0xf0] }
 0x13f   : > { %vm454_vm5 = vcmp.lt.s32.totalorder %v445_v59, 192  ;;  %v7825_v59 = vld [vmem:[%s11007_s9 + $0x20] sm:$0xff] }
 0x140   : > { %v822_v29 = vsel %vm814_vm6, %v810_v24, %v818_v26  ;;  %v823_v30 = vsel %vm815_vm7, %v811_v25, %v819_v27  ;;  %v7693_v24 = vld [vmem:[%s11003_s5 + $0xc4] sm:$0xf]  ;;  %v5964_v25 = vld [vmem:[%s11003_s5 + $0xcc] sm:$0xf0]  ;;  %v5919_v26 = vor.u32 %v7681_v16, %v5916_v17  ;;  %v5923_v27 = vor.u32 %v7683_v19, %v5922_v18  ;;  %v7818_v16 = vld [vmem:[%s11005_s7 + $0x264] sm:$0xf0] }
 0x141   : > { %v825_v31 = vpack.c.bf16 %v823_v30, %v822_v29  ;;  %v5904_v29 = vld [vmem:[%s11003_s5 + $0x54] sm:$0xf0]  ;;  %v5910_v30 = vld [vmem:[%s11003_s5 + $0x50] sm:$0xf]  ;;  %v7793_v17 = vld [vmem:[%s11005_s7 + $0x1a4] sm:$0xf] }
 0x142   : > { %v6103_v19 = vld [vmem:[%s11005_s7 + $0x1a8] sm:$0xf0] }
 0x143   : > { %v927_v34 = vunpack.c.l.b16 %v825_v31  ;;  %v928_v35 = vunpack.c.h.b16 %v825_v31  ;;  %v7680_v31 = vld [vmem:[%s11003_s5 + $0x58] sm:$0xf0] }
 0x145   : > { %v8679_v36 = vpack.c.b16 %v927_v34, %v925_v32  ;;  %v8681_v37 = vpack.c.b16 %v928_v35, %v926_v33  ;;  %v5971_v32 = vor.u32 %v7695_v23, %v5970_v22  ;;  %v5967_v33 = vor.u32 %v7693_v24, %v5964_v25  ;;  %v7808_v24 = vld [vmem:[%s11005_s7 + $0x214] sm:$0xf0] }
 0x146   : > { %v5907_v34 = vor.u32 %v7678_v28, %v5904_v29  ;;  %v5911_v35 = vor.u32 %v7680_v31, %v5910_v30  ;;  %v6106_v23 = vor.u32 %v7793_v17, %v6103_v19  ;;  %v6189_v28 = vld [vmem:[%s11005_s7 + $0x250] sm:$0xf]  ;;  %v7816_v30 = vld [vmem:[%s11005_s7 + $0x254] sm:$0xf0]  ;;  %v7791_v31 = vld [vmem:[%s11005_s7 + $0x194] sm:$0xf] }
 0x147   : > { %v934_v40 = vshll.u32 %v8679_v36, 16  ;;  %v941_v41 = vshll.u32 %v8681_v37, 16  ;;  %v932_v47 = vshrl.u32 %v8679_v36, 16  ;;  %v939_v49 = vshrl.u32 %v8681_v37, 16  ;;  %v7786_v17 = vld [vmem:[%s11005_s7 + $0x164] sm:$0xf0] }
 0x148   : > { %v6071_v19 = vld [vmem:[%s11005_s7 + $0x168] sm:$0xf0] }
 0x149   : > { %v936_v48 = vrot.slane %v934_v40, 1  ;;  %v943_v50 = vrot.slane %v941_v41, 1  ;;  %v5898_v40 = vld [vmem:[%s11003_s5 + $0x38] sm:$0xf]  ;;  %v7677_v41 = vld [vmem:[%s11003_s5 + $0x40] sm:$0xf0] }
 0x14a   : > { %v5899_v43 = vor.u32 %v7677_v41, %v5898_v40 }
 0x14b   : > { %v8711_v52 = vor.u32 %v936_v48, %v932_v47  ;;  %v8713_v53 = vor.u32 %v943_v50, %v939_v49  ;;  %v7674_v47 = vld [vmem:[%s11003_s5 + $0x28] sm:$0xf0]  ;;  %v5883_v48 = vor.u32 %v7672_v44, %v5880_v45  ;;  %v7669_v50 = vld [vmem:[%s11003_s5 + $0x4] sm:$0xf]  ;;  %v6181_v44 = vld [vmem:[%s11005_s7 + $0x240] sm:$0xf] }
 0x14c   : > { %v5887_v49 = vor.u32 %v7674_v47, %v5886_v46  ;;  %v7814_v46 = vld [vmem:[%s11005_s7 + $0x244] sm:$0xf0]  ;;  %v7789_v47 = vld [vmem:[%s11005_s7 + $0x184] sm:$0xf] }
 0x14d   : > { %1150 = vmatmul.bf16.vlgmr.msrb.gmra.mxu2 %v8711_v52  ;;  %5861 = vmatmul.msk.bf16.vlgmr.msrb.gmra.mxu3 %vm1138_vm8, %v8713_v53 }
 0x14e   : > { %1178 = vmatmul.bf16.vlgmr.msra.gmra.mxu0 %v8711_v52  ;;  %5862 = vmatmul.msk.bf16.vlgmr.msra.gmra.mxu1 %vm1138_vm8, %v8713_v53 }
 0x14f   : > { %1449 = vmatpush.bf16.msra.mxu1 %v5955_v54  ;;  %1477 = vmatpush.bf16.msra.mxu0 %v5959_v55  ;;  %v5871_v54 = vor.u32 %v7669_v50, %v5868_v51  ;;  %v6141_v51 = vld [vmem:[%s11005_s7 + $0x1f0] sm:$0xf] }
 0x150   : > { %1495 = vmatpush.bf16.msrb.mxu2 %v6007_v60  ;;  %1467 = vmatpush.bf16.msrb.mxu3 %v6003_v61 }
 0x153   : > { %1450 = vmatpush.bf16.msra.mxu1 %v5943_v2  ;;  %1478 = vmatpush.bf16.msra.mxu0 %v5947_v3  ;;  %v6111_v2 = vld [vmem:[%s11005_s7 + $0x1b8] sm:$0xf0]  ;;  %v6206_v3 = vor.u32 %v7820_v0, %v6205_v62  ;;  %v7788_v62 = vld [vmem:[%s11005_s7 + $0x174] sm:$0xf0] }
 0x154   : > { %1496 = vmatpush.bf16.msrb.mxu2 %v5995_v8  ;;  %1468 = vmatpush.bf16.msrb.mxu3 %v5991_v9  ;;  %v6114_v4 = vor.u32 %v7795_v1, %v6111_v2  ;;  %v6166_v8 = vor.u32 %v7810_v6, %v6165_v5  ;;  %v8108_v9 = vmov 0.0   ;;  %v6079_v1 = vld [vmem:[%s11005_s7 + $0x178] sm:$0xf0]  ;;  %v6133_v2 = vld [vmem:[%s11005_s7 + $0x1e0] sm:$0xf] }
 0x155   : > { %449 = vst.msk [vmem:[#allocation2] ss:$8 sm:$0x7] %vm8888_vm9, %v8108_v9  ;;  %v7809_v6 = vld [vmem:[%s11005_s7 + $0x224] sm:$0xf] }
 0x156   : > { %452 = vst.msk [vmem:[#allocation2 + $0x1e] ss:$8 sm:$0x7] %vm8888_vm9, %v8108_v9 }
 0x157   : > { %1451 = vmatpush.bf16.msra.mxu1 %v5931_v14  ;;  %1479 = vmatpush.bf16.msra.mxu0 %v5935_v15  ;;  %v6197_v14 = vld [vmem:[%s11005_s7 + $0x260] sm:$0xf]  ;;  %v6102_v15 = vor.u32 %v7794_v13, %v6101_v12  ;;  %v6170_v13 = vor.u32 %v7809_v6, %v6167_v7  ;;  %456 = vst.msk [vmem:[#allocation3] ss:$8 sm:$0x3] %vm454_vm5, %v8108_v9 }
 0x158   : > { %1497 = vmatpush.bf16.msrb.mxu2 %v5983_v20  ;;  %1469 = vmatpush.bf16.msrb.mxu3 %v5979_v21  ;;  %v6198_v18 = vor.u32 %v7818_v16, %v6197_v14  ;;  %v6157_v20 = vld [vmem:[%s11005_s7 + $0x210] sm:$0xf]  ;;  %v6069_v16 = vld [vmem:[%s11005_s7 + $0x160] sm:$0xf] }
 0x159   : > { %v6158_v25 = vor.u32 %v7808_v24, %v6157_v20  ;;  %v6125_v20 = vld [vmem:[%s11005_s7 + $0x1d0] sm:$0xf]  ;;  %459 = vst.msk [vmem:[#allocation3 + $0x17] ss:$8 sm:$0x3] %vm454_vm5, %v8108_v9 }
 0x15a   : > { %vm2652_vm5 = vsmask.f32 7424 }
 0x15b   : > { %1452 = vmatpush.bf16.msra.mxu1 %v5919_v26  ;;  %1480 = vmatpush.bf16.msra.mxu0 %v5923_v27  ;;  %v6093_v26 = vld [vmem:[%s11005_s7 + $0x190] sm:$0xf]  ;;  %v7792_v27 = vld [vmem:[%s11005_s7 + $0x194] sm:$0xf0] }
 0x15c   : > { %1498 = vmatpush.bf16.msrb.mxu2 %v5971_v32  ;;  %1470 = vmatpush.bf16.msrb.mxu3 %v5967_v33  ;;  %v6094_v29 = vor.u32 %v7792_v27, %v6093_v26  ;;  %v6095_v32 = vld [vmem:[%s11005_s7 + $0x198] sm:$0xf0]  ;;  %v6190_v33 = vor.u32 %v7816_v30, %v6189_v28  ;;  %v7807_v26 = vld [vmem:[%s11005_s7 + $0x214] sm:$0xf] }
 0x15d   : > { %1206 = vmatmul.bf16.vlgmr.msra.gmra.mxu3 %v8711_v52  ;;  %1429 = vmatmul.bf16.vlgmr.msra.gmra.mxu2 %v8679_v36  ;;  %v5874_v52 = vld [vmem:[%s11003_s5 + $0x8] sm:$0xf]  ;;  %v6159_v27 = vld [vmem:[%s11005_s7 + $0x218] sm:$0xf0] }
 0x15e   : > { %5863 = vmatmul.msk.bf16.vlgmr.msrb.gmra.mxu1 %vm1138_vm8, %v8713_v53  ;;  %6008 = vmatmul.msk.bf16.vlgmr.msrb.gmra.mxu0 %vm1138_vm8, %v8681_v37  ;;  %v7671_v53 = vld [vmem:[%s11003_s5 + $0x10] sm:$0xf0] }
 0x15f   : > { %1453 = vmatpush.bf16.msra.mxu1 %v5907_v34  ;;  %1481 = vmatpush.bf16.msra.mxu0 %v5911_v35  ;;  %v5875_v55 = vor.u32 %v7671_v53, %v5874_v52  ;;  %v6098_v34 = vor.u32 %v7791_v31, %v6095_v32  ;;  %v6149_v35 = vld [vmem:[%s11005_s7 + $0x200] sm:$0xf]  ;;  %v7804_v52 = vld [vmem:[%s11005_s7 + $0x1f4] sm:$0xf0]  ;;  %v6162_v32 = vor.u32 %v7807_v26, %v6159_v27 }
 0x160   : > { %1929 = vmatpush.bf16.msra.mxu2 %v6206_v3  ;;  %v6150_v39 = vor.u32 %v7806_v38, %v6149_v35  ;;  %v6142_v56 = vor.u32 %v7804_v52, %v6141_v51  ;;  %v7802_v3 = vld [vmem:[%s11005_s7 + $0x1e4] sm:$0xf0]  ;;  %v7783_v35 = vld [vmem:[%s11005_s7 + $0x154] sm:$0xf] }
 0x161   : > { %v6134_v5 = vor.u32 %v7802_v3, %v6133_v2  ;;  %v6143_v2 = vld [vmem:[%s11005_s7 + $0x1f8] sm:$0xf0]  ;;  %v7819_v3 = vld [vmem:[%s11005_s7 + $0x274] sm:$0xf] }
 0x163   : > { %1454 = vmatpush.bf16.msra.mxu1 %v5895_v42  ;;  %1482 = vmatpush.bf16.msra.mxu0 %v5899_v43  ;;  %v6085_v42 = vld [vmem:[%s11005_s7 + $0x180] sm:$0xf]  ;;  %v7790_v43 = vld [vmem:[%s11005_s7 + $0x184] sm:$0xf0] }
 0x164   : > { %1930 = vmatpush.bf16.msra.mxu2 %v6198_v18  ;;  %v6086_v45 = vor.u32 %v7790_v43, %v6085_v42  ;;  %v7785_v18 = vld [vmem:[%s11005_s7 + $0x164] sm:$0xf]  ;;  %v6063_v42 = vld [vmem:[%s11005_s7 + $0x158] sm:$0xf0]  ;;  %v6117_v43 = vld [vmem:[%s11005_s7 + $0x1c0] sm:$0xf] }
 0x165   : > { %v6074_v24 = vor.u32 %v7785_v18, %v6071_v19  ;;  %v6263_v19 = vld [vmem:[%s11005_s7 + $0x60] sm:$0xf] }
 0x167   : > { %1455 = vmatpush.bf16.msra.mxu1 %v5883_v48  ;;  %1483 = vmatpush.bf16.msra.mxu0 %v5887_v49  ;;  %v6087_v48 = vld [vmem:[%s11005_s7 + $0x188] sm:$0xf0]  ;;  %v6182_v49 = vor.u32 %v7814_v46, %v6181_v44  ;;  %v7798_v44 = vld [vmem:[%s11005_s7 + $0x1c4] sm:$0xf0] }
 0x168   : > { %1931 = vmatpush.bf16.msra.mxu2 %v6190_v33  ;;  %v6090_v50 = vor.u32 %v7789_v47, %v6087_v48  ;;  %v6061_v33 = vld [vmem:[%s11005_s7 + $0x150] sm:$0xf]  ;;  %v6118_v46 = vor.u32 %v7798_v44, %v6117_v43  ;;  %v7805_v47 = vld [vmem:[%s11005_s7 + $0x204] sm:$0xf]  ;;  %v6151_v48 = vld [vmem:[%s11005_s7 + $0x208] sm:$0xf0] }
 0x169   : > { %v6154_v52 = vor.u32 %v7805_v47, %v6151_v48  ;;  %v7799_v43 = vld [vmem:[%s11005_s7 + $0x1d4] sm:$0xf]  ;;  %v6127_v44 = vld [vmem:[%s11005_s7 + $0x1d8] sm:$0xf0] }
 0x16a   : > { %v7815_v47 = vld [vmem:[%s11005_s7 + $0x254] sm:$0xf]  ;;  %v6191_v48 = vld [vmem:[%s11005_s7 + $0x258] sm:$0xf0] }
 0x16b   : > { %1456 = vmatpush.bf16.msra.mxu1 %v5871_v54  ;;  %1484 = vmatpush.bf16.msra.mxu0 %v5875_v55  ;;  %v8987_v55 = vld [vmem:[%s11004_s6] sm:$0x7] }
 0x16c   : > { %1932 = vmatpush.bf16.msra.mxu2 %v6182_v49  ;;  %v1507_v12 = vperm.slane %v8987_v55, 0  ;;  %v1508_v31 = vperm.slane %v8987_v55, 1  ;;  %v6271_v49 = vld [vmem:[%s11005_s7 + $0x70] sm:$0xf] }
 0x16d   : > { %6009 = vmatmul.msk.bf16.vlgmr.msrb.gmra.mxu3 %vm1138_vm8, %v8681_v37  ;;  %6010 = vmatmul.msk.bf16.vlgmr.msrb.gmra.mxu2 %vm1138_vm8, %v8681_v37  ;;  %v6109_v37 = vld [vmem:[%s11005_s7 + $0x1b0] sm:$0xf] }
 0x16e   : > { %1457 = vmatmul.bf16.vlgmr.msra.gmra.mxu1 %v8679_v36  ;;  %1485 = vmatmul.bf16.vlgmr.msra.gmra.mxu0 %v8679_v36  ;;  %v7796_v36 = vld [vmem:[%s11005_s7 + $0x1b4] sm:$0xf0] }
 0x16f   : > { %1911 = vmatpush.bf16.msrb.mxu1 %v6174_v58  ;;  %v6110_v63 = vor.u32 %v7796_v36, %v6109_v37  ;;  %1939 = vmatpush.bf16.msrb.mxu0 %v6114_v4  ;;  %v6175_v58 = vld [vmem:[%s11005_s7 + $0x238] sm:$0xf0]  ;;  %v6077_v36 = vld [vmem:[%s11005_s7 + $0x170] sm:$0xf] }
 0x170   : > { %v6178_v37 = vor.u32 %v7811_v57, %v6175_v58  ;;  %v6078_v0 = vor.u32 %v7788_v62, %v6077_v36  ;;  %v6055_v36 = vld [vmem:[%s11005_s7 + $0x148] sm:$0xf0] }
 0x171   : > { %1897 = vmatpush.bf16.msra.mxu3 %v6110_v63  ;;  %v7787_v63 = vld [vmem:[%s11005_s7 + $0x174] sm:$0xf] }
 0x172   : > { %1953 = vmatpush.bf16.msrb.mxu2 %v6178_v37  ;;  %v6082_v4 = vor.u32 %v7787_v63, %v6079_v1  ;;  %v7803_v1 = vld [vmem:[%s11005_s7 + $0x1f4] sm:$0xf] }
 0x173   : > { %1912 = vmatpush.bf16.msrb.mxu1 %v6166_v8  ;;  %1940 = vmatpush.bf16.msrb.mxu0 %v6106_v23  ;;  %v7800_v23 = vld [vmem:[%s11005_s7 + $0x1d4] sm:$0xf0]  ;;  %v6146_v7 = vor.u32 %v7803_v1, %v6143_v2 }
 0x175   : > { %1898 = vmatpush.bf16.msra.mxu3 %v6102_v15 }
 0x176   : > { %1954 = vmatpush.bf16.msrb.mxu2 %v6170_v13  ;;  %v6367_v13 = vld [vmem:[%s11005_s7 + $0x130] sm:$0xf] }
 0x177   : > { %1913 = vmatpush.bf16.msrb.mxu1 %v6158_v25  ;;  %1941 = vmatpush.bf16.msrb.mxu0 %v6098_v34  ;;  %v6126_v25 = vor.u32 %v7800_v23, %v6125_v20  ;;  %v7784_v34 = vld [vmem:[%s11005_s7 + $0x154] sm:$0xf0]  ;;  %v7754_v20 = vld [vmem:[%s11005_s7 + $0x64] sm:$0xf0] }
 0x178   : > { %v6264_v23 = vor.u32 %v7754_v20, %v6263_v19 }
 0x179   : > { %1899 = vmatpush.bf16.msra.mxu3 %v6094_v29 }
 0x17a   : > { %1955 = vmatpush.bf16.msrb.mxu2 %v6162_v32 }
 0x17b   : > { %1914 = vmatpush.bf16.msrb.mxu1 %v6150_v39  ;;  %1942 = vmatpush.bf16.msrb.mxu0 %v6090_v50  ;;  %v6062_v39 = vor.u32 %v7784_v34, %v6061_v33  ;;  %v7778_v33 = vld [vmem:[%s11005_s7 + $0x124] sm:$0xf0]  ;;  %v6255_v34 = vld [vmem:[%s11005_s7 + $0x50] sm:$0xf] }
 0x17d   : > { %1900 = vmatpush.bf16.msra.mxu3 %v6086_v45  ;;  %v6066_v45 = vor.u32 %v7783_v35, %v6063_v42  ;;  %v7752_v35 = vld [vmem:[%s11005_s7 + $0x54] sm:$0xf0] }
 0x17e   : > { %1956 = vmatpush.bf16.msrb.mxu2 %v6154_v52  ;;  %v6256_v42 = vor.u32 %v7752_v35, %v6255_v34 }
 0x17f   : > { %1915 = vmatpush.bf16.msrb.mxu1 %v6142_v56  ;;  %1943 = vmatpush.bf16.msrb.mxu0 %v6082_v4  ;;  %v6053_v56 = vld [vmem:[%s11005_s7 + $0x140] sm:$0xf] }
 0x181   : > { %1901 = vmatpush.bf16.msra.mxu3 %v6078_v0 }
 0x182   : > { %1957 = vmatpush.bf16.msrb.mxu2 %v6146_v7 }
 0x183   : > { %1916 = vmatpush.bf16.msrb.mxu1 %v6134_v5  ;;  %1944 = vmatpush.bf16.msrb.mxu0 %v6074_v24  ;;  %v1509_v5 = vperm.slane %v8987_v55, 2  ;;  %v7801_v24 = vld [vmem:[%s11005_s7 + $0x1e4] sm:$0xf]  ;;  %v6223_v55 = vld [vmem:[%s11005_s7 + $0x10] sm:$0xf] }
 0x187   : > { %1917 = vmatpush.bf16.msrb.mxu1 %v6126_v25  ;;  %1945 = vmatpush.bf16.msrb.mxu0 %v6066_v45  ;;  %v6135_v25 = vld [vmem:[%s11005_s7 + $0x1e8] sm:$0xf0] }
 0x188   : > { %v6138_v32 = vor.u32 %v7801_v24, %v6135_v25  ;;  %v6239_v25 = vld [vmem:[%s11005_s7 + $0x30] sm:$0xf] }
 0x18a   : > { %1958 = vmatpush.bf16.msrb.mxu2 %v6138_v32  ;;  %v6231_v32 = vld [vmem:[%s11005_s7 + $0x20] sm:$0xf] }
 0x18b   : > { %1918 = vmatpush.bf16.msrb.mxu1 %v6118_v46 }
 0x1cb   : > { %v8859_v60 = vpop.f32.mrf.mxu0  ;;  %v8861_v61 = vpop.f32.mrf.mxu1 }
 0x1d0   : > { %v8895_v10 = vpop.f32.mrf.mxu2  ;;  %v8897_v11 = vpop.f32.mrf.mxu3 }
 0x1d1   : > { %v1166_v8 = vadd.f32 %v8897_v11, %v8895_v10  ;;  %v6070_v11 = vor.u32 %v7786_v17, %v6069_v16 }
 0x1d3   : > { %v8920_v21 = vpop.f32.mrf.mxu0  ;;  %v8922_v22 = vpop.f32.mrf.mxu1  ;;  %1902 = vmatpush.bf16.msra.mxu3 %v6070_v11  ;;  %v7780_v11 = vld [vmem:[%s11005_s7 + $0x134] sm:$0xf0] }
 0x1d7   : > { %1903 = vmatpush.bf16.msra.mxu3 %v6062_v39 }
 0x1d8   : > { %v8954_v40 = vpop.f32.mrf.mxu2  ;;  %v8956_v41 = vpop.f32.mrf.mxu3 }
 0x1d9   : > { %v1168_v50 = vadd.f32 %v8956_v41, %v8954_v40  ;;  %v7782_v40 = vld [vmem:[%s11005_s7 + $0x144] sm:$0xf0]  ;;  %v7781_v41 = vld [vmem:[%s11005_s7 + $0x144] sm:$0xf] }
 0x1da   : > { %v6054_v0 = vor.u32 %v7782_v40, %v6053_v56  ;;  %v6058_v6 = vor.u32 %v7781_v41, %v6055_v36  ;;  %v7776_v56 = vld [vmem:[%s11005_s7 + $0x114] sm:$0xf0]  ;;  %v6130_v41 = vor.u32 %v7799_v43, %v6127_v44 }
 0x1db   : > { %v8982_v53 = vpop.f32.mrf.mxu1  ;;  %v1444_v54 = vpop.f32.mrf.mxu0 }
 0x1dc   : > { %1904 = vmatpush.bf16.msra.mxu3 %v6054_v0  ;;  %1946 = vmatpush.bf16.msrb.mxu0 %v6058_v6 }
 0x1dd   : > { %1959 = vmatpush.bf16.msrb.mxu2 %v6130_v41 }
 0x1e0   : > { %v9022_v14 = vpop.f32.mrf.mxu3  ;;  %v1430_v15 = vpop.f32.mrf.mxu2 }
 0x1e1   : > { %v1431_v10 = vadd.f32 %v1430_v15, %v1166_v8  ;;  %v6207_v8 = vld [vmem:[%s11005_s7 + $0x278] sm:$0xf0]  ;;  %v1194_v15 = vadd.f32 %v8861_v61, %v8859_v60  ;;  %v1222_v60 = vadd.f32 %v8982_v53, %v9022_v14  ;;  %v6368_v61 = vor.u32 %v7780_v11, %v6367_v13  ;;  %v7817_v53 = vld [vmem:[%s11005_s7 + $0x264] sm:$0xf]  ;;  %v6199_v14 = vld [vmem:[%s11005_s7 + $0x268] sm:$0xf0] }
 0x1e2   : > { %v7774_v11 = vld [vmem:[%s11005_s7 + $0x104] sm:$0xf0] }
 0x1e3   : > { %v1445_v28 = vadd.f32 %v1444_v54, %v1431_v10  ;;  %v9048_v29 = vpop.f32.mrf.mxu1  ;;  %v1446_v30 = vpop.f32.mrf.mxu0  ;;  %v7756_v54 = vld [vmem:[%s11005_s7 + $0x74] sm:$0xf0]  ;;  %v6210_v10 = vor.u32 %v7819_v3, %v6207_v8  ;;  %2217 = vmatpush.bf16.msra.mxu0 %v6368_v61  ;;  %v1196_v3 = vadd.f32 %v8922_v22, %v8920_v21  ;;  %v7797_v21 = vld [vmem:[%s11005_s7 + $0x1c4] sm:$0xf]  ;;  %v6119_v22 = vld [vmem:[%s11005_s7 + $0x1c8] sm:$0xf0] }
 0x1e4   : > { %v6272_v37 = vor.u32 %v7756_v54, %v6271_v49  ;;  %v6351_v49 = vld [vmem:[%s11005_s7 + $0x110] sm:$0xf]  ;;  %v6194_v54 = vor.u32 %v7815_v47, %v6191_v48  ;;  %v7742_v47 = vld [vmem:[%s11005_s7 + $0x4] sm:$0xf0] }
 0x1e5   : > { %v1513_v38 = vadd.f32 %v1507_v12, %v1445_v28  ;;  %1971 = vmatpush.bf16.msrb.mxu3 %v6210_v10  ;;  %v6359_v28 = vld [vmem:[%s11005_s7 + $0x120] sm:$0xf]  ;;  %v6352_v36 = vor.u32 %v7776_v56, %v6351_v49 }
 0x1e6   : > { %2185 = vmatpush.bf16.msra.mxu1 %v6272_v37  ;;  %v6360_v39 = vor.u32 %v7778_v33, %v6359_v28  ;;  %v7750_v37 = vld [vmem:[%s11005_s7 + $0x44] sm:$0xf0]  ;;  %v6343_v10 = vld [vmem:[%s11005_s7 + $0x100] sm:$0xf] }
 0x1e7   : > { %vm1519_vm10 = vcmp.gt.f32.partialorder %v1513_v38, 0.0  ;;  %v1525_v51 = vmul.f32 0.5, %v1513_v38  ;;  %v6344_v24 = vor.u32 %v7774_v11, %v6343_v10 }
 0x1e8   : > { %v9088_v57 = vpop.f32.mrf.mxu3  ;;  %v1432_v58 = vpop.f32.mrf.mxu2  ;;  %2218 = vmatpush.bf16.msra.mxu0 %v6360_v39 }
 0x1e9   : > { %v9099_v62 = vsel %vm1519_vm10, %v1513_v38, %v1525_v51  ;;  %v1433_v63 = vadd.f32 %v1432_v58, %v1168_v50  ;;  %v6247_v58 = vld [vmem:[%s11005_s7 + $0x40] sm:$0xf]  ;;  %v1224_v6 = vadd.f32 %v9048_v29, %v9088_v57  ;;  %v7813_v29 = vld [vmem:[%s11005_s7 + $0x244] sm:$0xf] }
 0x1ea   : > { %v1544_v4 = vrot.slane %v9099_v62, 7  ;;  %2186 = vmatpush.bf16.msra.mxu1 %v6264_v23  ;;  %v6248_v2 = vor.u32 %v7750_v37, %v6247_v58 }
 0x1eb   : > { %v1447_v16 = vadd.f32 %v1446_v30, %v1433_v63  ;;  %v1458_v17 = vpop.f32.mrf.mxu1  ;;  %v1486_v18 = vpop.f32.mrf.mxu0 }
 0x1ec   : > { %1559 = vst [vmem:[#allocation2] sm:$0xfe] %v1544_v4  ;;  %v1459_v27 = vadd.f32 %v1458_v17, %v1194_v15  ;;  %v1487_v30 = vadd.f32 %v1486_v18, %v1222_v60  ;;  %2219 = vmatpush.bf16.msra.mxu0 %v6352_v36  ;;  %v6122_v17 = vor.u32 %v7797_v21, %v6119_v22  ;;  %v6183_v18 = vld [vmem:[%s11005_s7 + $0x248] sm:$0xf0] }
 0x1ed   : > { %v1516_v26 = vadd.f32 %v1507_v12, %v1447_v16  ;;  %v6202_v12 = vor.u32 %v7817_v53, %v6199_v14  ;;  %v6186_v23 = vor.u32 %v7813_v29, %v6183_v18  ;;  %v6273_v29 = vld [vmem:[%s11005_s7 + $0x78] sm:$0xf0] }
 0x1ee   : > { %2187 = vmatpush.bf16.msra.mxu1 %v6256_v42  ;;  %1960 = vmatpush.bf16.msrb.mxu2 %v6122_v17  ;;  %v7779_v17 = vld [vmem:[%s11005_s7 + $0x134] sm:$0xf] }
 0x1ef   : > { %vm1522_vm12 = vcmp.gt.f32.partialorder %v1516_v26, 0.0  ;;  %v1528_v38 = vmul.f32 0.5, %v1516_v26  ;;  %1972 = vmatpush.bf16.msrb.mxu3 %v6202_v12  ;;  %v7746_v12 = vld [vmem:[%s11005_s7 + $0x24] sm:$0xf0] }
 0x1f0   : > { %v1472_v45 = vpop.f32.mrf.mxu3  ;;  %v1500_v46 = vpop.f32.mrf.mxu2  ;;  %2220 = vmatpush.bf16.msra.mxu0 %v6344_v24  ;;  %v6232_v35 = vor.u32 %v7746_v12, %v6231_v32  ;;  %v6265_v32 = vld [vmem:[%s11005_s7 + $0x68] sm:$0xf0]  ;;  %v7769_v12 = vld [vmem:[%s11005_s7 + $0xe4] sm:$0xf] }
 0x1f1   : > { %v1534_v50 = vsel %vm1522_vm12, %v1516_v26, %v1528_v38  ;;  %v1473_v51 = vadd.f32 %v1472_v45, %v1459_v27  ;;  %v1501_v52 = vadd.f32 %v1500_v46, %v1487_v30  ;;  %v7748_v26 = vld [vmem:[%s11005_s7 + $0x34] sm:$0xf0]  ;;  %v6215_v46 = vld [vmem:[%s11005_s7] sm:$0xf]  ;;  %vm2308_vm12 = vcmask 522240  }
 0x1f2   : > { %v1547_v40 = vrot.slane %v1534_v50, 7  ;;  %2188 = vmatpush.bf16.msra.mxu1 %v6248_v2  ;;  %v6240_v14 = vor.u32 %v7748_v26, %v6239_v25  ;;  %v6216_v48 = vor.u32 %v7742_v47, %v6215_v46  ;;  %v6321_v47 = vld [vmem:[%s11005_s7 + $0xd8] sm:$0xf0] }
 0x1f3   : > { %v1514_v63 = vadd.f32 %v1508_v31, %v1473_v51  ;;  %v1515_v0 = vadd.f32 %v1509_v5, %v1501_v52  ;;  %v1460_v1 = vpop.f32.mrf.mxu1  ;;  %v1488_v8 = vpop.f32.mrf.mxu0  ;;  %1973 = vmatpush.bf16.msrb.mxu3 %v6194_v54  ;;  %v1567_v51 = vld [vmem:[#allocation2] sm:$0xff] }
 0x1f4   : > { %v1548_v7 = vsel %vm1543_vm11, %v1544_v4, %v1547_v40  ;;  %v1461_v16 = vadd.f32 %v1460_v1, %v1196_v3  ;;  %v1489_v4 = vadd.f32 %v1488_v8, %v1224_v6 }
 0x1f5   : > { %1563 = vst [vmem:[#allocation2 + $0x18] sm:$0x3f] %v1548_v7  ;;  %vm1520_vm14 = vcmp.gt.f32.partialorder %v1514_v63, 0.0  ;;  %v1526_v13 = vmul.f32 0.5, %v1514_v63  ;;  %vm1521_vm15 = vcmp.gt.f32.partialorder %v1515_v0, 0.0  ;;  %v1527_v15 = vmul.f32 0.5, %v1515_v0 }
 0x1f6   : > { %2189 = vmatpush.bf16.msra.mxu1 %v6240_v14 }
 0x1f7   : > { %v1532_v57 = vsel %vm1520_vm14, %v1514_v63, %v1526_v13  ;;  %v1533_v62 = vsel %vm1521_vm15, %v1515_v0, %v1527_v15  ;;  %1974 = vmatpush.bf16.msrb.mxu3 %v6186_v23  ;;  %v6335_v13 = vld [vmem:[%s11005_s7 + $0xf0] sm:$0xf]  ;;  %v7772_v15 = vld [vmem:[%s11005_s7 + $0xf4] sm:$0xf0]  ;;  %vm461_vm14 = vcmask 909312  }
 0x1f8   : > { %v1545_v19 = vrot.slane %v1532_v57, 7  ;;  %v1546_v20 = vrot.slane %v1533_v62, 7  ;;  %v1474_v60 = vpop.f32.mrf.mxu3  ;;  %v1502_v61 = vpop.f32.mrf.mxu2  ;;  %v7771_v57 = vld [vmem:[%s11005_s7 + $0xf4] sm:$0xf]  ;;  %v6336_v25 = vor.u32 %v7772_v15, %v6335_v13  ;;  %v7764_v15 = vld [vmem:[%s11005_s7 + $0xb4] sm:$0xf0] }
 0x1f9   : > { %v1475_v27 = vadd.f32 %v1474_v60, %v1461_v16  ;;  %v1503_v53 = vadd.f32 %v1502_v61, %v1489_v4  ;;  %v7755_v16 = vld [vmem:[%s11005_s7 + $0x74] sm:$0xf]  ;;  %v6337_v4 = vld [vmem:[%s11005_s7 + $0xf8] sm:$0xf0]  ;;  %462 = vst.msk [vmem:[#allocation4] sm:$0x1] %vm461_vm14, %v8108_v9 }
 0x1fa   : > { %1560 = vst [vmem:[#allocation2 + $0x8] sm:$0xfe] %v1545_v19  ;;  %2190 = vmatpush.bf16.msra.mxu1 %v6232_v35  ;;  %v6276_v26 = vor.u32 %v7755_v16, %v6273_v29  ;;  %v7777_v35 = vld [vmem:[%s11005_s7 + $0x124] sm:$0xf]  ;;  %v7747_v16 = vld [vmem:[%s11005_s7 + $0x34] sm:$0xf] }
 0x1fb   : > { %1562 = vst.msk [vmem:[#allocation2 + $0x10] sm:$0xfe] %vm1561_vm13, %v1546_v20  ;;  %v1517_v28 = vadd.f32 %v1508_v31, %v1475_v27  ;;  %v1518_v30 = vadd.f32 %v1509_v5, %v1503_v53  ;;  %v7744_v5 = vld [vmem:[%s11005_s7 + $0x14] sm:$0xf0]  ;;  %v6327_v27 = vld [vmem:[%s11005_s7 + $0xe0] sm:$0xf] }
 0x1fc   : > { %v6224_v43 = vor.u32 %v7744_v5, %v6223_v55  ;;  %v1570_v54 = vld [vmem:[#allocation2 + $0x18] sm:$0x7f]  ;;  %v7770_v53 = vld [vmem:[%s11005_s7 + $0xe4] sm:$0xf0]  ;;  %v6319_v5 = vld [vmem:[%s11005_s7 + $0xd0] sm:$0xf] }
 0x1fd   : > { %vm1523_vm1 = vcmp.gt.f32.partialorder %v1517_v28, 0.0  ;;  %v1529_v33 = vmul.f32 0.5, %v1517_v28  ;;  %vm1524_vm2 = vcmp.gt.f32.partialorder %v1518_v30, 0.0  ;;  %v1530_v34 = vmul.f32 0.5, %v1518_v30  ;;  %v7763_v29 = vld [vmem:[%s11005_s7 + $0xb4] sm:$0xf] }
 0x1fe   : > { %2191 = vmatpush.bf16.msra.mxu1 %v6224_v43  ;;  %v7751_v43 = vld [vmem:[%s11005_s7 + $0x54] sm:$0xf]  ;;  %463 = vst.msk [vmem:[#allocation4 + $0x10] sm:$0x1] %vm461_vm14, %v8108_v9 }
 0x1ff   : > { %v1535_v38 = vsel %vm1523_vm1, %v1517_v28, %v1529_v33  ;;  %v1536_v31 = vsel %vm1524_vm2, %v1518_v30, %v1530_v34  ;;  %v6340_v28 = vor.u32 %v7771_v57, %v6337_v4  ;;  %v7753_v30 = vld [vmem:[%s11005_s7 + $0x64] sm:$0xf]  ;;  %v6329_v34 = vld [vmem:[%s11005_s7 + $0xe8] sm:$0xf0]  ;;  %v6305_v57 = vld [vmem:[%s11005_s7 + $0xb8] sm:$0xf0] }
 0x200   : > { %v1549_v39 = vrot.slane %v1535_v38, 7  ;;  %v1551_v42 = vrot.slane %v1536_v31, 7  ;;  %v6361_v38 = vld [vmem:[%s11005_s7 + $0x128] sm:$0xf0]  ;;  %v6328_v31 = vor.u32 %v7770_v53, %v6327_v27  ;;  %v6268_v55 = vor.u32 %v7753_v30, %v6265_v32  ;;  %v7760_v27 = vld [vmem:[%s11005_s7 + $0x94] sm:$0xf0] }
 0x201   : > { %v1568_v49 = vld [vmem:[#allocation2 + $0x8] sm:$0xff]  ;;  %v6364_v46 = vor.u32 %v7777_v35, %v6361_v38  ;;  %v6225_v53 = vld [vmem:[%s11005_s7 + $0x18] sm:$0xf0]  ;;  %v7741_v35 = vld [vmem:[%s11005_s7 + $0x4] sm:$0xf]  ;;  %vm2607_vm2 = vcmask 915456  }
 0x202   : > { %v1550_v44 = vsel %vm1543_vm11, %v1545_v19, %v1549_v39  ;;  %v1552_v45 = vsel %vm1543_vm11, %v1546_v20, %v1551_v42  ;;  %v1569_v50 = vld [vmem:[#allocation2 + $0x10] sm:$0xff]  ;;  %2192 = vmatpush.bf16.msra.mxu1 %v6216_v48  ;;  %v1573_v52 = vpack.c.bf16 %v1568_v49, %v1567_v51  ;;  %v6369_v20 = vld [vmem:[%s11005_s7 + $0x138] sm:$0xf0]  ;;  %v7768_v39 = vld [vmem:[%s11005_s7 + $0xd4] sm:$0xf0]  ;;  %v6332_v42 = vor.u32 %v7769_v12, %v6329_v34 }
 0x203   : > { %1564 = vst [vmem:[#allocation2 + $0x20] sm:$0x3f] %v1550_v44  ;;  %v1574_v58 = vpack.c.bf16 %v1569_v50, %v1569_v50  ;;  %v6372_v33 = vor.u32 %v7779_v17, %v6369_v20  ;;  %v6257_v44 = vld [vmem:[%s11005_s7 + $0x58] sm:$0xf0]  ;;  %v7775_v48 = vld [vmem:[%s11005_s7 + $0x114] sm:$0xf]  ;;  %v6320_v50 = vor.u32 %v7768_v39, %v6319_v5 }
 0x204   : > { %1566 = vst.msk [vmem:[#allocation2 + $0x28] sm:$0x3f] %vm1565_vm4, %v1552_v45  ;;  %v1662_v36 = vunpack.c.l.b16 %v1573_v52  ;;  %v1663_v0 = vunpack.c.h.b16 %v1573_v52  ;;  %v7767_v45 = vld [vmem:[%s11005_s7 + $0xd4] sm:$0xf]  ;;  %v6353_v49 = vld [vmem:[%s11005_s7 + $0x118] sm:$0xf0]  ;;  %v6260_v51 = vor.u32 %v7751_v43, %v6257_v44 }
 0x205   : > { %v1664_v2 = vunpack.c.l.b16 %v1574_v58  ;;  %v6311_v52 = vld [vmem:[%s11005_s7 + $0xc0] sm:$0xf]  ;;  %v7749_v58 = vld [vmem:[%s11005_s7 + $0x44] sm:$0xf]  ;;  %v7758_v34 = vld [vmem:[%s11005_s7 + $0x84] sm:$0xf0] }
 0x206   : > { %v6295_v17 = vld [vmem:[%s11005_s7 + $0xa0] sm:$0xf]  ;;  %v7761_v20 = vld [vmem:[%s11005_s7 + $0xa4] sm:$0xf]  ;;  %v6217_v38 = vld [vmem:[%s11005_s7 + $0x8] sm:$0xf0] }
 0x207   : > { %v6279_v12 = vld [vmem:[%s11005_s7 + $0x80] sm:$0xf]  ;;  %v6220_v39 = vor.u32 %v7741_v35, %v6217_v38  ;;  %v7847_v9 = vld [vmem:[%s11009_s11 + $0x10] sm:$0xff] }
 0x208   : > { %v6280_v5 = vor.u32 %v7758_v34, %v6279_v12 }
 0x20a   : > { %v1571_v56 = vld [vmem:[#allocation2 + $0x20] sm:$0x7f] }
 0x20b   : > { %v1575_v37 = vpack.c.bf16 %v1571_v56, %v1570_v54  ;;  %v1572_v40 = vld [vmem:[#allocation2 + $0x28] sm:$0x7f]  ;;  %v6324_v56 = vor.u32 %v7767_v45, %v6321_v47 }
 0x20c   : > { %v1576_v41 = vpack.c.bf16 %v1572_v40, %v1572_v40  ;;  %v7766_v54 = vld [vmem:[%s11005_s7 + $0xc4] sm:$0xf0]  ;;  %v7765_v40 = vld [vmem:[%s11005_s7 + $0xc4] sm:$0xf] }
 0x20d   : > { %v1665_v63 = vunpack.c.l.b16 %v1575_v37  ;;  %v1666_v1 = vunpack.c.h.b16 %v1575_v37  ;;  %v6249_v37 = vld [vmem:[%s11005_s7 + $0x48] sm:$0xf0] }
 0x20e   : > { %v1667_v3 = vunpack.c.l.b16 %v1576_v41  ;;  %v6356_v41 = vor.u32 %v7775_v48, %v6353_v49  ;;  %v7828_v49 = vld [vmem:[%s11007_s9 + $0x38] sm:$0xff] }
 0x20f   : > { %v9244_v6 = vpack.c.b16 %v1665_v63, %v1662_v36  ;;  %v9246_v7 = vpack.c.b16 %v1666_v1, %v1663_v0  ;;  %v6313_v36 = vld [vmem:[%s11005_s7 + $0xc8] sm:$0xf0]  ;;  %v7773_v63 = vld [vmem:[%s11005_s7 + $0x104] sm:$0xf]  ;;  %v6312_v1 = vor.u32 %v7766_v54, %v6311_v52 }
 0x210   : > { %v9248_v8 = vpack.c.b16 %v1667_v3, %v1664_v2  ;;  %v6345_v0 = vld [vmem:[%s11005_s7 + $0x108] sm:$0xf0]  ;;  %v6252_v2 = vor.u32 %v7749_v58, %v6249_v37  ;;  %v6303_v3 = vld [vmem:[%s11005_s7 + $0xb0] sm:$0xf]  ;;  %v6316_v13 = vor.u32 %v7765_v40, %v6313_v36  ;;  %v7832_v36 = vld [vmem:[%s11007_s9 + $0x58] sm:$0xff] }
 0x211   : > { %v1674_v21 = vshll.u32 %v9244_v6, 16  ;;  %v1681_v22 = vshll.u32 %v9246_v7, 16  ;;  %v1672_v18 = vshrl.u32 %v9244_v6, 16  ;;  %v1679_v11 = vshrl.u32 %v9246_v7, 16  ;;  %v7826_v52 = vld [vmem:[%s11007_s9 + $0x28] sm:$0xff]  ;;  %v7839_v58 = vld [vmem:[%s11007_s9 + $0x90] sm:$0xff] }
 0x212   : > { %v1688_v62 = vshll.u32 %v9248_v8, 16  ;;  %v1686_v60 = vshrl.u32 %v9248_v8, 16  ;;  %v7838_v40 = vld [vmem:[%s11007_s9 + $0x88] sm:$0xff] }
 0x213   : > { %v1676_v10 = vrot.slane %v1674_v21, 1  ;;  %v1683_v19 = vrot.slane %v1681_v22, 1  ;;  %v6241_v21 = vld [vmem:[%s11005_s7 + $0x38] sm:$0xf0]  ;;  %v6348_v22 = vor.u32 %v7773_v63, %v6345_v0 }
 0x214   : > { %v1690_v61 = vrot.slane %v1688_v62, 1  ;;  %v6304_v62 = vor.u32 %v7764_v15, %v6303_v3  ;;  %v6244_v4 = vor.u32 %v7747_v16, %v6241_v21  ;;  %v7823_v3 = vld [vmem:[%s11007_s9 + $0x10] sm:$0xff]  ;;  %v7836_v21 = vld [vmem:[%s11007_s9 + $0x78] sm:$0xff] }
 0x215   : > { %v1677_v23 = vor.u32 %v1676_v10, %v1672_v18  ;;  %v9280_v24 = vor.u32 %v1683_v19, %v1679_v11  ;;  %v6308_v18 = vor.u32 %v7763_v29, %v6305_v57  ;;  %v7762_v10 = vld [vmem:[%s11005_s7 + $0xa4] sm:$0xf0]  ;;  %v7745_v11 = vld [vmem:[%s11005_s7 + $0x24] sm:$0xf]  ;;  %v6233_v19 = vld [vmem:[%s11005_s7 + $0x28] sm:$0xf0] }
 0x216   : > { %v9288_v14 = vor.u32 %v1690_v61, %v1686_v60  ;;  %v6297_v60 = vld [vmem:[%s11005_s7 + $0xa8] sm:$0xf0]  ;;  %v6296_v61 = vor.u32 %v7762_v10, %v6295_v17  ;;  %v2269_v10 = vld [vmem:[%s11006_s8] sm:$0x3] }
 0x217   : > { %1905 = vmatmul.bf16.vlgmr.msra.gmra.mxu3 %v1677_v23  ;;  %1919 = vmatmul.bf16.vlgmr.msrb.gmra.mxu1 %v9280_v24  ;;  %v7822_v57 = vld [vmem:[%s11007_s9 + $0x8] sm:$0xff] }
 0x218   : > { %6211 = vmatmul.msk.bf16.vlgmr.msra.gmra.mxu2 %vm1138_vm8, %v9288_v14  ;;  %1947 = vmatmul.bf16.vlgmr.msrb.gmra.mxu0 %v1677_v23  ;;  %v6236_v23 = vor.u32 %v7745_v11, %v6233_v19 }
 0x219   : > { %2199 = vmatpush.bf16.msra.mxu3 %v6336_v25  ;;  %2227 = vmatpush.bf16.msra.mxu2 %v6276_v26  ;;  %v6287_v25 = vld [vmem:[%s11005_s7 + $0x90] sm:$0xf]  ;;  %v6300_v26 = vor.u32 %v7761_v20, %v6297_v60  ;;  %v7821_v20 = vld [vmem:[%s11007_s9] sm:$0xff] }
 0x21a   : > { %2241 = vmatpush.bf16.msrb.mxu0 %v6340_v28  ;;  %2259 = vmatpush.bf16.msrb.mxu1 %v6372_v33  ;;  %v6289_v28 = vld [vmem:[%s11005_s7 + $0x98] sm:$0xf0]  ;;  %v6288_v30 = vor.u32 %v7760_v27, %v6287_v25  ;;  %v7829_v60 = vld [vmem:[%s11007_s9 + $0x40] sm:$0xff]  ;;  %v7842_v25 = vld [vmem:[%s11007_s9 + $0xa8] sm:$0xff] }
 0x21d   : > { %2200 = vmatpush.bf16.msra.mxu3 %v6328_v31  ;;  %2228 = vmatpush.bf16.msra.mxu2 %v6268_v55  ;;  %v7757_v31 = vld [vmem:[%s11005_s7 + $0x84] sm:$0xf]  ;;  %v6281_v55 = vld [vmem:[%s11005_s7 + $0x88] sm:$0xf0] }
 0x21e   : > { %2242 = vmatpush.bf16.msrb.mxu0 %v6332_v42  ;;  %2260 = vmatpush.bf16.msrb.mxu1 %v6364_v46  ;;  %v6284_v42 = vor.u32 %v7757_v31, %v6281_v55  ;;  %v7833_v55 = vld [vmem:[%s11007_s9 + $0x60] sm:$0xff] }
 0x221   : > { %2201 = vmatpush.bf16.msra.mxu3 %v6320_v50  ;;  %2229 = vmatpush.bf16.msra.mxu2 %v6260_v51 }
 0x222   : > { %2243 = vmatpush.bf16.msrb.mxu0 %v6324_v56  ;;  %2261 = vmatpush.bf16.msrb.mxu1 %v6356_v41  ;;  %v7824_v41 = vld [vmem:[%s11007_s9 + $0x18] sm:$0xff] }
 0x225   : > { %2202 = vmatpush.bf16.msra.mxu3 %v6312_v1  ;;  %2230 = vmatpush.bf16.msra.mxu2 %v6252_v2  ;;  %v7837_v1 = vld [vmem:[%s11007_s9 + $0x80] sm:$0xff] }
 0x226   : > { %2244 = vmatpush.bf16.msrb.mxu0 %v6316_v13  ;;  %2262 = vmatpush.bf16.msrb.mxu1 %v6348_v22  ;;  %v7831_v13 = vld [vmem:[%s11007_s9 + $0x50] sm:$0xff]  ;;  %v7844_v22 = vld [vmem:[%s11007_s9 + $0xb8] sm:$0xff] }
 0x227   : > { %6212 = vmatmul.msk.bf16.vlgmr.msrb.gmra.mxu3 %vm1138_vm8, %v9288_v14  ;;  %2193 = vmatmul.bf16.vlgmr.msra.gmra.mxu1 %v9244_v6  ;;  %v7759_v14 = vld [vmem:[%s11005_s7 + $0x94] sm:$0xf] }
 0x228   : > { %1961 = vmatmul.bf16.vlgmr.msrb.gmra.mxu2 %v9280_v24  ;;  %6373 = vmatmul.msk.bf16.vlgmr.msra.gmra.mxu0 %vm1138_vm8, %v9248_v8  ;;  %v7743_v24 = vld [vmem:[%s11005_s7 + $0x14] sm:$0xf]  ;;  %v6292_v33 = vor.u32 %v7759_v14, %v6289_v28  ;;  %v7834_v28 = vld [vmem:[%s11007_s9 + $0x68] sm:$0xff] }
 0x229   : > { %2203 = vmatpush.bf16.msra.mxu3 %v6304_v62  ;;  %2231 = vmatpush.bf16.msra.mxu2 %v6244_v4  ;;  %v6228_v32 = vor.u32 %v7743_v24, %v6225_v53  ;;  %v7830_v62 = vld [vmem:[%s11007_s9 + $0x48] sm:$0xff]  ;;  %v7843_v4 = vld [vmem:[%s11007_s9 + $0xb0] sm:$0xff]  ;;  %v2271_v53 = vperm.slane %v2269_v10, 0 }
 0x22a   : > { %2245 = vmatpush.bf16.msrb.mxu0 %v6308_v18  ;;  %2481 = vmatpush.bf16.msra.mxu1 %v7844_v22  ;;  %v7835_v18 = vld [vmem:[%s11007_s9 + $0x70] sm:$0xff] }
 0x22d   : > { %2204 = vmatpush.bf16.msra.mxu3 %v6296_v61  ;;  %2232 = vmatpush.bf16.msra.mxu2 %v6236_v23 }
 0x22e   : > { %2246 = vmatpush.bf16.msrb.mxu0 %v6300_v26  ;;  %2482 = vmatpush.bf16.msra.mxu1 %v7843_v4 }
 0x231   : > { %2205 = vmatpush.bf16.msra.mxu3 %v6288_v30  ;;  %2233 = vmatpush.bf16.msra.mxu2 %v6228_v32 }
 0x232   : > { %2247 = vmatpush.bf16.msrb.mxu0 %v6292_v33  ;;  %v2272_v33 = vperm.slane %v2269_v10, 1  ;;  %2483 = vmatpush.bf16.msra.mxu1 %v7842_v25 }
 0x235   : > { %2206 = vmatpush.bf16.msra.mxu3 %v6280_v5  ;;  %2234 = vmatpush.bf16.msra.mxu2 %v6220_v39  ;;  %v7841_v5 = vld [vmem:[%s11007_s9 + $0xa0] sm:$0xff] }
 0x236   : > { %2248 = vmatpush.bf16.msrb.mxu0 %v6284_v42  ;;  %2484 = vmatpush.bf16.msra.mxu1 %v7841_v5 }
 0x237   : > { %6374 = vmatmul.msk.bf16.vlgmr.msrb.gmra.mxu1 %vm1138_vm8, %v9248_v8 }
 0x238   : > { %2207 = vmatmul.bf16.vlgmr.msra.gmra.mxu3 %v9246_v7  ;;  %2235 = vmatmul.bf16.vlgmr.msra.gmra.mxu2 %v9244_v6  ;;  %v7827_v6 = vld [vmem:[%s11007_s9 + $0x30] sm:$0xff] }
 0x239   : > { %2249 = vmatmul.bf16.vlgmr.msrb.gmra.mxu0 %v9246_v7  ;;  %2566 = vmatpush.bf16.msrb.mxu2 %v7828_v49  ;;  %v7840_v7 = vld [vmem:[%s11007_s9 + $0x98] sm:$0xff] }
 0x23a   : > { %2463 = vmatpush.bf16.msrb.mxu3 %v7840_v7  ;;  %2584 = vmatpush.bf16.msra.mxu0 %v7832_v36 }
 0x23d   : > { %2567 = vmatpush.bf16.msrb.mxu2 %v7827_v6 }
 0x23e   : > { %2464 = vmatpush.bf16.msrb.mxu3 %v7839_v58  ;;  %2585 = vmatpush.bf16.msra.mxu0 %v7831_v13 }
 0x241   : > { %2568 = vmatpush.bf16.msrb.mxu2 %v7826_v52 }
 0x242   : > { %2465 = vmatpush.bf16.msrb.mxu3 %v7838_v40  ;;  %2586 = vmatpush.bf16.msra.mxu0 %v7830_v62 }
 0x245   : > { %2569 = vmatpush.bf16.msrb.mxu2 %v7825_v59 }
 0x246   : > { %2466 = vmatpush.bf16.msrb.mxu3 %v7837_v1  ;;  %2587 = vmatpush.bf16.msra.mxu0 %v7829_v60 }
 0x249   : > { %2570 = vmatpush.bf16.msrb.mxu2 %v7824_v41 }
 0x24a   : > { %2467 = vmatpush.bf16.msrb.mxu3 %v7836_v21 }
 0x24d   : > { %2571 = vmatpush.bf16.msrb.mxu2 %v7823_v3 }
 0x24e   : > { %2468 = vmatpush.bf16.msrb.mxu3 %v7835_v18 }
 0x251   : > { %2572 = vmatpush.bf16.msrb.mxu2 %v7822_v57 }
 0x252   : > { %2469 = vmatpush.bf16.msrb.mxu3 %v7834_v28  ;;  %v7857_v28 = vld [vmem:[%s11009_s11 + $0x60] sm:$0xff] }
 0x255   : > { %2573 = vmatpush.bf16.msrb.mxu2 %v7821_v20 }
 0x256   : > { %2470 = vmatpush.bf16.msrb.mxu3 %v7833_v55 }
 0x294   : > { %v1920_v44 = vpop.f32.mrf.mxu1 }
 0x295   : > { %v1948_v43 = vpop.f32.mrf.mxu0 }
 0x29a   : > { %v1906_v45 = vpop.f32.mrf.mxu3 }
 0x29b   : > { %v1934_v46 = vpop.f32.mrf.mxu2  ;;  %v1921_v15 = vadd.f32 %v1920_v44, %v1906_v45 }
 0x29c   : > { %v1922_v48 = vpop.f32.mrf.mxu1 }
 0x29d   : > { %v9442_v47 = vpop.f32.mrf.mxu0  ;;  %v1935_v17 = vadd.f32 %v1934_v46, %v1921_v15 }
 0x2a2   : > { %v1908_v50 = vpop.f32.mrf.mxu3 }
 0x2a3   : > { %v9447_v8 = vpop.f32.mrf.mxu2  ;;  %v1923_v26 = vadd.f32 %v1922_v48, %v1908_v50 }
 0x2a4   : > { %v2194_v54 = vpop.f32.mrf.mxu1 }
 0x2a5   : > { %v2222_v51 = vpop.f32.mrf.mxu0  ;;  %v2195_v11 = vadd.f32 %v2194_v54, %v1935_v17  ;;  %v1937_v35 = vadd.f32 %v9447_v8, %v1923_v26 }
 0x2aa   : > { %v1976_v56 = vpop.f32.mrf.mxu3 }
 0x2ab   : > { %v1962_v37 = vpop.f32.mrf.mxu2 }
 0x2ac   : > { %v2196_v16 = vpop.f32.mrf.mxu1  ;;  %v1963_v29 = vadd.f32 %v1962_v37, %v1948_v43 }
 0x2ad   : > { %v9476_v63 = vpop.f32.mrf.mxu0  ;;  %v2197_v39 = vadd.f32 %v2196_v16, %v1937_v35  ;;  %v7845_v35 = vld [vmem:[%s11009_s11] sm:$0xff] }
 0x2ae   : > { %v1977_v19 = vadd.f32 %v1976_v56, %v1963_v29 }
 0x2b2   : > { %v1978_v0 = vpop.f32.mrf.mxu3 }
 0x2b3   : > { %v1964_v2 = vpop.f32.mrf.mxu2 }
 0x2b4   : > { %v2264_v30 = vpop.f32.mrf.mxu1  ;;  %v1965_v34 = vadd.f32 %v1964_v2, %v9442_v47 }
 0x2b6   : > { %v2250_v27 = vpop.f32.mrf.mxu0  ;;  %v1979_v44 = vadd.f32 %v1978_v0, %v1965_v34  ;;  %v7854_v34 = vld [vmem:[%s11009_s11 + $0x48] sm:$0xff] }
 0x2bb   : > { %v2208_v61 = vpop.f32.mrf.mxu3  ;;  %v2236_v23 = vpop.f32.mrf.mxu2 }
 0x2bc   : > { %v2209_v24 = vadd.f32 %v2208_v61, %v2195_v11  ;;  %v2237_v14 = vadd.f32 %v2236_v23, %v1977_v19  ;;  %v2266_v56 = vpop.f32.mrf.mxu1 }
 0x2be   : > { %v2223_v32 = vadd.f32 %v2222_v51, %v2209_v24  ;;  %v2251_v12 = vadd.f32 %v2250_v27, %v2237_v14  ;;  %v2252_v7 = vpop.f32.mrf.mxu0  ;;  %v7851_v27 = vld [vmem:[%s11009_s11 + $0x30] sm:$0xff]  ;;  %v7850_v24 = vld [vmem:[%s11009_s11 + $0x28] sm:$0xff]  ;;  %v7849_v14 = vld [vmem:[%s11009_s11 + $0x20] sm:$0xff] }
 0x2bf   : > { %2769 = vmatpush.bf16.msra.mxu3 %v7851_v27  ;;  %v7862_v27 = vld [vmem:[%s10999_s1 + $0x10] sm:$0xff] }
 0x2c0   : > { %v2275_v38 = vadd.f32 %v2271_v53, %v2223_v32  ;;  %v2265_v31 = vadd.f32 %v2264_v30, %v2251_v12  ;;  %v7848_v30 = vld [vmem:[%s11009_s11 + $0x18] sm:$0xff]  ;;  %v7855_v12 = vld [vmem:[%s11009_s11 + $0x50] sm:$0xff] }
 0x2c1   : > { %v7856_v32 = vld [vmem:[%s11009_s11 + $0x58] sm:$0xff] }
 0x2c2   : > { %vm2279_vm6 = vcmp.gt.f32.partialorder %v2275_v38, 0.0  ;;  %v2283_v42 = vmul.f32 0.5, %v2275_v38  ;;  %v2276_v43 = vadd.f32 %v2272_v33, %v2265_v31  ;;  %v7853_v31 = vld [vmem:[%s11009_s11 + $0x40] sm:$0xff] }
 0x2c3   : > { %v2210_v45 = vpop.f32.mrf.mxu3  ;;  %v2238_v46 = vpop.f32.mrf.mxu2  ;;  %2770 = vmatpush.bf16.msra.mxu3 %v7850_v24 }
 0x2c4   : > { %v2287_v47 = vsel %vm2279_vm6, %v2275_v38, %v2283_v42  ;;  %vm2280_vm7 = vcmp.gt.f32.partialorder %v2276_v43, 0.0  ;;  %v2284_v48 = vmul.f32 0.5, %v2276_v43  ;;  %v2211_v49 = vadd.f32 %v2210_v45, %v2197_v39  ;;  %v8095_v45 = vld [vmem:[%s11008_s10] ss:$0 sm:$0xff] }
 0x2c5   : > { %v2295_v50 = vrot.slane %v2287_v47, 7  ;;  %v2239_v8 = vadd.f32 %v2238_v46, %v1979_v44  ;;  %vm2820_vm6 = vcmask 130048  }
 0x2c6   : > { %v2288_v6 = vsel %vm2280_vm7, %v2276_v43, %v2284_v48  ;;  %v2225_v51 = vadd.f32 %v9476_v63, %v2211_v49  ;;  %v7852_v43 = vld [vmem:[%s11009_s11 + $0x38] sm:$0xff]  ;;  %vm2876_vm7 = vcmask 64512  }
 0x2c7   : > { %2305 = vst [vmem:[#allocation3] sm:$0xfe] %v2295_v50  ;;  %v2296_v52 = vrot.slane %v2288_v6, 7  ;;  %v2253_v54 = vadd.f32 %v2252_v7, %v2239_v8  ;;  %2771 = vmatpush.bf16.msra.mxu3 %v7849_v14 }
 0x2c8   : > { %v2277_v58 = vadd.f32 %v2271_v53, %v2225_v51  ;;  %v7858_v53 = vld [vmem:[%s11009_s11 + $0x68] sm:$0xff] }
 0x2c9   : > { %2306 = vst.msk [vmem:[#allocation3 + $0x8] sm:$0xfe] %vm1561_vm13, %v2296_v52  ;;  %v2267_v37 = vadd.f32 %v2266_v56, %v2253_v54  ;;  %2711 = vmatpush.bf16.msrb.mxu1 %v7858_v53 }
 0x2ca   : > { %vm2281_vm9 = vcmp.gt.f32.partialorder %v2277_v58, 0.0  ;;  %v2285_v59 = vmul.f32 0.5, %v2277_v58 }
 0x2cb   : > { %v2278_v40 = vadd.f32 %v2272_v33, %v2267_v37  ;;  %2772 = vmatpush.bf16.msra.mxu3 %v7848_v30  ;;  %v7846_v33 = vld [vmem:[%s11009_s11 + $0x8] sm:$0xff]  ;;  %v2611_v37 = vld [vmem:[#allocation4 + $0x10] sm:$0x1] }
 0x2cc   : > { %v2289_v41 = vsel %vm2281_vm9, %v2277_v58, %v2285_v59  ;;  %v7861_v30 = vld [vmem:[%s10999_s1 + $0x8] sm:$0xff] }
 0x2cd   : > { %v2297_v36 = vrot.slane %v2289_v41, 7  ;;  %vm2282_vm10 = vcmp.gt.f32.partialorder %v2278_v40, 0.0  ;;  %v2286_v0 = vmul.f32 0.5, %v2278_v40  ;;  %2712 = vmatpush.bf16.msrb.mxu1 %v7857_v28 }
 0x2ce   : > { %v2310_v15 = vld [vmem:[#allocation3] sm:$0xff] }
 0x2cf   : > { %v2298_v1 = vsel %vm1543_vm11, %v2295_v50, %v2297_v36  ;;  %v2290_v2 = vsel %vm2282_vm10, %v2278_v40, %v2286_v0  ;;  %2773 = vmatpush.bf16.msra.mxu3 %v7847_v9  ;;  %v2614_v40 = vpack.c.bf16 %v2611_v37, %v2611_v37  ;;  %v6656_v37 = vld [vmem:[%s11001_s3 + $0xc0] sm:$0xf] }
 0x2d0   : > { %2307 = vst [vmem:[#allocation3 + $0x10] sm:$0x7f] %v2298_v1  ;;  %v2299_v63 = vrot.slane %v2290_v2, 7  ;;  %v2311_v13 = vld [vmem:[#allocation3 + $0x8] sm:$0xff] }
 0x2d1   : > { %v2314_v16 = vpack.c.bf16 %v2311_v13, %v2310_v15  ;;  %2713 = vmatpush.bf16.msrb.mxu1 %v7856_v32  ;;  %v2649_v36 = vunpack.c.l.b16 %v2614_v40  ;;  %v7888_v40 = vld [vmem:[%s11001_s3 + $0xc4] sm:$0xf] }
 0x2d2   : > { %v2300_v3 = vsel %vm1543_vm11, %v2296_v52, %v2299_v63 }
 0x2d3   : > { %2309 = vst.msk [vmem:[#allocation3 + $0x18] sm:$0x7f] %vm2308_vm12, %v2300_v3  ;;  %v2367_v57 = vunpack.c.l.b16 %v2314_v16  ;;  %v2368_v62 = vunpack.c.h.b16 %v2314_v16  ;;  %2774 = vmatpush.bf16.msra.mxu3 %v7846_v33  ;;  %v2651_v63 = vpack.c.b16 %v2649_v36, %v2649_v36  ;;  %v6658_v36 = vld [vmem:[%s11001_s3 + $0xc8] sm:$0xf0] }
 0x2d5   : > { %2714 = vmatpush.bf16.msrb.mxu1 %v7855_v12  ;;  %v2661_v16 = vshll.u32 %v2651_v63, 16  ;;  %v7860_v12 = vld [vmem:[%s10999_s1] sm:$0xff]  ;;  %v7870_v63 = vld [vmem:[%s11001_s3 + $0x34] sm:$0xf] }
 0x2d7   : > { %v2312_v21 = vld [vmem:[#allocation3 + $0x10] sm:$0xff]  ;;  %2775 = vmatpush.bf16.msra.mxu3 %v7845_v35  ;;  %v7877_v35 = vld [vmem:[%s11001_s3 + $0x64] sm:$0xf0] }
 0x2d9   : > { %2715 = vmatpush.bf16.msrb.mxu1 %v7854_v34  ;;  %v6722_v34 = vld [vmem:[%s11001_s3 + $0x60] sm:$0xf] }
 0x2da   : > { %v2313_v22 = vld [vmem:[#allocation3 + $0x18] sm:$0xff] }
 0x2db   : > { %v2315_v29 = vpack.c.bf16 %v2313_v22, %v2312_v21 }
 0x2dd   : > { %v2369_v4 = vunpack.c.l.b16 %v2315_v29  ;;  %v2370_v17 = vunpack.c.h.b16 %v2315_v29  ;;  %2716 = vmatpush.bf16.msrb.mxu1 %v7853_v31  ;;  %v6723_v31 = vor.u32 %v7877_v35, %v6722_v34  ;;  %v6634_v35 = vld [vmem:[%s11001_s3 + $0x98] sm:$0xf0] }
 0x2df   : > { %v2371_v18 = vpack.c.b16 %v2369_v4, %v2367_v57  ;;  %v2372_v10 = vpack.c.b16 %v2370_v17, %v2368_v62  ;;  %v2663_v57 = vrot.slane %v2661_v16, 1  ;;  %v6648_v16 = vld [vmem:[%s11001_s3 + $0xb0] sm:$0xf] }
 0x2e1   : > { %2574 = vmatmul.bf16.vlgmr.msrb.gmra.mxu2 %v2371_v18  ;;  %6496 = vmatmul.msk.bf16.vlgmr.msra.gmra.mxu0 %vm1138_vm8, %v2372_v10  ;;  %v2376_v11 = vshll.u32 %v2371_v18, 16  ;;  %v2383_v19 = vshll.u32 %v2372_v10, 16  ;;  %v2374_v20 = vshrl.u32 %v2371_v18, 16  ;;  %v2381_v61 = vshrl.u32 %v2372_v10, 16  ;;  %v8096_v18 = vld [vmem:[%s11010_s12] ss:$0 sm:$0xff] }
 0x2e2   : > { %2717 = vmatpush.bf16.msrb.mxu1 %v7852_v43  ;;  %v7874_v43 = vld [vmem:[%s11001_s3 + $0x54] sm:$0xf] }
 0x2e3   : > { %v2378_v60 = vrot.slane %v2376_v11, 1  ;;  %v2385_v23 = vrot.slane %v2383_v19, 1 }
 0x2e5   : > { %v2379_v25 = vor.u32 %v2378_v60, %v2374_v20  ;;  %v2386_v26 = vor.u32 %v2385_v23, %v2381_v61 }
 0x2e7   : > { %2471 = vmatmul.bf16.vlgmr.msrb.gmra.mxu3 %v2379_v25  ;;  %6447 = vmatmul.msk.bf16.vlgmr.msra.gmra.mxu1 %vm1138_vm8, %v2386_v26  ;;  %v7859_v25 = vld [vmem:[%s8208_s22 + $0x8] sm:$0xff]  ;;  %v7863_v26 = vld [vmem:[%s10999_s1 + $0x18] sm:$0xff] }
 0x2e8   : > { %3007 = vmatpush.bf16.msra.mxu1 %v7863_v26  ;;  %v2982_v24 = vshll.u32 %v7859_v25, 16  ;;  %v2980_v53 = vshrl.u32 %v7859_v25, 16 }
 0x2ea   : > { %v2984_v14 = vrot.slane %v2982_v24, 1  ;;  %v7867_v24 = vld [vmem:[%s11001_s3 + $0x14] sm:$0xf0] }
 0x2ec   : > { %3008 = vmatpush.bf16.msra.mxu1 %v7862_v27  ;;  %v2985_v28 = vor.u32 %v2984_v14, %v2980_v53  ;;  %v6682_v27 = vld [vmem:[%s11001_s3 + $0x10] sm:$0xf]  ;;  %v7866_v53 = vld [vmem:[%s11001_s3 + $0x14] sm:$0xf] }
 0x2ed   : > { %v6683_v14 = vor.u32 %v7867_v24, %v6682_v27  ;;  %v6854_v27 = vld [vmem:[%s11003_s5 + $0x1bc] sm:$0xf0]  ;;  %v6840_v24 = vld [vmem:[%s11003_s5 + $0x198] sm:$0xf] }
 0x35e   : > { %v2589_v42 = vpop.f32.mrf.mxu0 }
 0x364   : > { %v2486_v38 = vpop.f32.mrf.mxu1  ;;  %v2575_v55 = vpop.f32.mrf.mxu2 }
 0x366   : > { %v2591_v52 = vpop.f32.mrf.mxu0 }
 0x36a   : > { %v2472_v5 = vpop.f32.mrf.mxu3 }
 0x36b   : > { %v2487_v39 = vadd.f32 %v2486_v38, %v2472_v5  ;;  %v7876_v38 = vld [vmem:[%s11001_s3 + $0x64] sm:$0xf] }
 0x36c   : > { %v2488_v48 = vpop.f32.mrf.mxu1  ;;  %v2577_v6 = vpop.f32.mrf.mxu2 }
 0x36d   : > { %v2576_v44 = vadd.f32 %v2575_v55, %v2487_v39  ;;  %v6724_v55 = vld [vmem:[%s11001_s3 + $0x68] sm:$0xf0]  ;;  %v6714_v39 = vld [vmem:[%s11001_s3 + $0x50] sm:$0xf] }
 0x36e   : > { %v6727_v5 = vor.u32 %v7876_v38, %v6724_v55  ;;  %v7865_v55 = vld [vmem:[%s11001_s3 + $0x4] sm:$0xf0] }
 0x36f   : > { %v2590_v46 = vadd.f32 %v2589_v42, %v2576_v44  ;;  %v7875_v42 = vld [vmem:[%s11001_s3 + $0x54] sm:$0xf0] }
 0x370   : > { %v6715_v44 = vor.u32 %v7875_v42, %v6714_v39  ;;  %v7864_v39 = vld [vmem:[%s11001_s3 + $0x4] sm:$0xf]  ;;  %v6676_v42 = vld [vmem:[%s11001_s3 + $0x8] sm:$0xf0] }
 0x371   : > { %v2598_v47 = vadd.f32 %v8095_v45, %v2590_v46 }
 0x372   : > { %v2474_v49 = vpop.f32.mrf.mxu3 }
 0x373   : > { %vm2600_vm15 = vcmp.gt.f32.partialorder %v2598_v47, 0.0  ;;  %v2602_v50 = vmul.f32 0.5, %v2598_v47  ;;  %v2489_v8 = vadd.f32 %v2488_v48, %v2474_v49  ;;  %v7891_v48 = vld [vmem:[%s11001_s3 + $0xd4] sm:$0xf0]  ;;  %v7890_v49 = vld [vmem:[%s11001_s3 + $0xd4] sm:$0xf] }
 0x375   : > { %v2604_v7 = vsel %vm2600_vm15, %v2598_v47, %v2602_v50  ;;  %v2578_v51 = vadd.f32 %v2577_v6, %v2489_v8  ;;  %v6664_v47 = vld [vmem:[%s11001_s3 + $0xd0] sm:$0xf]  ;;  %v6666_v8 = vld [vmem:[%s11001_s3 + $0xd8] sm:$0xf0] }
 0x376   : > { %2606 = vst.msk [vmem:[#allocation4 + $0x1] sm:$0xff] %vm670_vm3, %v2604_v7  ;;  %v6665_v50 = vor.u32 %v7891_v48, %v6664_v47  ;;  %v6669_v6 = vor.u32 %v7890_v49, %v6666_v8  ;;  %v6706_v7 = vld [vmem:[%s11001_s3 + $0x40] sm:$0xf]  ;;  %v6626_v48 = vld [vmem:[%s11001_s3 + $0x88] sm:$0xf0] }
 0x377   : > { %v2592_v54 = vadd.f32 %v2591_v52, %v2578_v51  ;;  %v7873_v51 = vld [vmem:[%s11001_s3 + $0x44] sm:$0xf0]  ;;  %v7879_v8 = vld [vmem:[%s11001_s3 + $0x74] sm:$0xf0] }
 0x378   : > { %3171 = vmatpush.bf16.msrb.mxu3 %v6665_v50  ;;  %v6707_v52 = vor.u32 %v7873_v51, %v6706_v7  ;;  %v6616_v50 = vld [vmem:[%s11001_s3 + $0x70] sm:$0xf]  ;;  %v6618_v51 = vld [vmem:[%s11001_s3 + $0x78] sm:$0xf0] }
 0x379   : > { %v2599_v56 = vadd.f32 %v8095_v45, %v2592_v54  ;;  %v6716_v45 = vld [vmem:[%s11001_s3 + $0x58] sm:$0xf0]  ;;  %v7872_v54 = vld [vmem:[%s11001_s3 + $0x44] sm:$0xf]  ;;  %v6617_v7 = vor.u32 %v7879_v8, %v6616_v50  ;;  %v6804_v8 = vld [vmem:[%s11003_s5 + $0x150] sm:$0xf] }
 0x37a   : > { %v6719_v46 = vor.u32 %v7874_v43, %v6716_v45  ;;  %v6679_v43 = vor.u32 %v7864_v39, %v6676_v42  ;;  %v7881_v45 = vld [vmem:[%s11001_s3 + $0x84] sm:$0xf0] }
 0x37b   : > { %vm2601_vm1 = vcmp.gt.f32.partialorder %v2599_v56, 0.0  ;;  %v2603_v58 = vmul.f32 0.5, %v2599_v56  ;;  %v6912_v39 = vld [vmem:[%s11003_s5 + $0x228] sm:$0xf] }
 0x37d   : > { %v2605_v59 = vsel %vm2601_vm1, %v2599_v56, %v2603_v58  ;;  %v2609_v41 = vld [vmem:[#allocation4] sm:$0xff]  ;;  %v6708_v56 = vld [vmem:[%s11001_s3 + $0x48] sm:$0xf0] }
 0x37e   : > { %2608 = vst.msk [vmem:[#allocation4 + $0x9] sm:$0x7f] %vm2607_vm2, %v2605_v59  ;;  %v2612_v0 = vpack.c.bf16 %v2609_v41, %v2609_v41  ;;  %v6711_v58 = vor.u32 %v7872_v54, %v6708_v56  ;;  %v7889_v59 = vld [vmem:[%s11001_s3 + $0xc4] sm:$0xf0] }
 0x37f   : > { %v6657_v41 = vor.u32 %v7889_v59, %v6656_v37  ;;  %v6864_v56 = vld [vmem:[%s11003_s5 + $0x1c8] sm:$0xf]  ;;  %v7949_v37 = vld [vmem:[%s11003_s5 + $0x1cc] sm:$0xf] }
 0x380   : > { %v2647_v3 = vunpack.c.l.b16 %v2612_v0  ;;  %v6661_v0 = vor.u32 %v7888_v40, %v6658_v36  ;;  %v6866_v40 = vld [vmem:[%s11003_s5 + $0x1d4] sm:$0xf0] }
 0x381   : > { %3172 = vmatpush.bf16.msrb.mxu3 %v6657_v41  ;;  %v6869_v36 = vor.u32 %v7949_v37, %v6866_v40  ;;  %v6806_v37 = vld [vmem:[%s11003_s5 + $0x15c] sm:$0xf0] }
 0x385   : > { %v2610_v1 = vld [vmem:[#allocation4 + $0x8] sm:$0xff] }
 0x386   : > { %v2613_v2 = vpack.c.bf16 %v2610_v1, %v2610_v1  ;;  %v6698_v1 = vld [vmem:[%s11001_s3 + $0x30] sm:$0xf] }
 0x388   : > { %v2648_v13 = vunpack.c.l.b16 %v2613_v2  ;;  %v7871_v2 = vld [vmem:[%s11001_s3 + $0x34] sm:$0xf0] }
 0x38a   : > { %v2650_v15 = vpack.c.b16 %v2648_v13, %v2647_v3  ;;  %v6699_v3 = vor.u32 %v7871_v2, %v6698_v1  ;;  %v6700_v13 = vld [vmem:[%s11001_s3 + $0x38] sm:$0xf0] }
 0x38c   : > { %6568 = vmatmul.msk.bf16.vlgmr.msra.gmra.mxu3 %vm670_vm3, %v2650_v15  ;;  %v2656_v21 = vshll.u32 %v2650_v15, 16  ;;  %v2654_v22 = vshrl.u32 %v2650_v15, 16  ;;  %v6703_v15 = vor.u32 %v7870_v63, %v6700_v13 }
 0x38e   : > { %v2658_v29 = vrot.slane %v2656_v21, 1  ;;  %v7887_v21 = vld [vmem:[%s11001_s3 + $0xb4] sm:$0xf0] }
 0x390   : > { %v2659_v62 = vor.u32 %v2658_v29, %v2654_v22  ;;  %v7886_v22 = vld [vmem:[%s11001_s3 + $0xb4] sm:$0xf]  ;;  %v6649_v29 = vor.u32 %v7887_v21, %v6648_v16 }
 0x392   : > { %v2664_v4 = vsel %vm2652_vm5, %v2659_v62, %v2663_v57  ;;  %v6650_v57 = vld [vmem:[%s11001_s3 + $0xb8] sm:$0xf0]  ;;  %3173 = vmatpush.bf16.msrb.mxu3 %v6649_v29 }
 0x393   : > { %6539 = vmatmul.msk.bf16.vlgmr.msrb.gmra.mxu1 %vm670_vm3, %v2664_v4  ;;  %v6653_v62 = vor.u32 %v7886_v22, %v6650_v57  ;;  %v6690_v4 = vld [vmem:[%s11001_s3 + $0x20] sm:$0xf] }
 0x394   : > { %3271 = vmatpush.bf16.msrb.mxu1 %v6723_v31  ;;  %v6674_v31 = vld [vmem:[%s11001_s3] sm:$0xf] }
 0x398   : > { %3272 = vmatpush.bf16.msrb.mxu1 %v6715_v44  ;;  %v6624_v44 = vld [vmem:[%s11001_s3 + $0x80] sm:$0xf] }
 0x399   : > { %v6625_v47 = vor.u32 %v7881_v45, %v6624_v44  ;;  %v7937_v45 = vld [vmem:[%s11003_s5 + $0x16c] sm:$0xf] }
 0x39c   : > { %3273 = vmatpush.bf16.msrb.mxu1 %v6707_v52 }
 0x3a0   : > { %3274 = vmatpush.bf16.msrb.mxu1 %v6699_v3 }
 0x3a3   : > { %6590 = vmatmul.msk.bf16.vlgmr.msra.gmra.mxu1 %vm499_vm0, %v2985_v28  ;;  %v6684_v28 = vld [vmem:[%s11001_s3 + $0x18] sm:$0xf0] }
 0x40f   : > { %v2777_v17 = vpop.f32.mrf.mxu3 }
 0x410   : > { %v2719_v10 = vpop.f32.mrf.mxu1 }
 0x411   : > { %v2778_v11 = vadd.f32 %v2777_v17, %v2719_v10  ;;  %v7869_v17 = vld [vmem:[%s11001_s3 + $0x24] sm:$0xf0] }
 0x412   : > { %v6691_v10 = vor.u32 %v7869_v17, %v6690_v4 }
 0x413   : > { %v2786_v19 = vadd.f32 %v8096_v18, %v2778_v11  ;;  %v6692_v11 = vld [vmem:[%s11001_s3 + $0x28] sm:$0xf0] }
 0x414   : > { %3275 = vmatpush.bf16.msrb.mxu1 %v6691_v10 }
 0x415   : > { %2844 = vxpose.xlu1.b32.start.end [1/1] (short) (narrow) %v2786_v19, 8  ;;  %2788 = vxpose.xlu0.b32.start [1/2] (short) (narrow) %v2786_v19, 8 }
 0x416   : > { %2950 = vmatpush.msra.mxu2 %v2786_v19 }
 0x417   : > { %v2779_v20 = vpop.f32.mrf.mxu3 }
 0x418   : > { %v2721_v60 = vpop.f32.mrf.mxu1  ;;  %3185 = vmatpush.bf16.msrb.mxu2 %v6669_v6  ;;  %3276 = vmatpush.bf16.msrb.mxu1 %v6683_v14  ;;  %v7878_v6 = vld [vmem:[%s11001_s3 + $0x74] sm:$0xf]  ;;  %v7944_v14 = vld [vmem:[%s11003_s5 + $0x1a0] sm:$0xf0] }
 0x419   : > { %v2780_v61 = vadd.f32 %v2779_v20, %v2721_v60  ;;  %v6640_v20 = vld [vmem:[%s11001_s3 + $0xa0] sm:$0xf]  ;;  %v7885_v60 = vld [vmem:[%s11001_s3 + $0xa4] sm:$0xf0]  ;;  %v6621_v54 = vor.u32 %v7878_v6, %v6618_v51  ;;  %v7935_v6 = vld [vmem:[%s11003_s5 + $0x158] sm:$0xf0] }
 0x41a   : > { %v6805_v51 = vor.u32 %v7935_v6, %v6804_v8  ;;  %v6987_v8 = vld [vmem:[%s11003_s5 + $0x78] sm:$0xf]  ;;  %v7908_v6 = vld [vmem:[%s11003_s5 + $0x80] sm:$0xf0] }
 0x41b   : > { %v2787_v23 = vadd.f32 %v8096_v18, %v2780_v61  ;;  %v7868_v18 = vld [vmem:[%s11001_s3 + $0x24] sm:$0xf] }
 0x41c   : > { %3186 = vmatpush.bf16.msrb.mxu2 %v6661_v0  ;;  %v7884_v61 = vld [vmem:[%s11001_s3 + $0xa4] sm:$0xf]  ;;  %v8097_v0 = vld [vmem:[%s11000_s2] ss:$0 sm:$0xff] }
 0x41d   : > { %2900 = vxpose.xlu1.b32.start.end [1/1] (short) (narrow) %v2787_v23, 8  ;;  %2789 = vxpose.xlu0.b32.end [2/2] (short) (narrow) %v2787_v23, 8 }
 0x41e   : > { %2838 = vmatpush.msrb.mxu0 %v2787_v23 }
 0x420   : > { %2839 = vmatpush.msrb.mxu0 %v2786_v19  ;;  %3187 = vmatpush.bf16.msrb.mxu2 %v6653_v62  ;;  %v6695_v19 = vor.u32 %v7868_v18, %v6692_v11  ;;  %v3010_v41 = vpop.f32.mrf.mxu1 }
 0x422   : > { %2895 = vmatpush.msra.mxu0 %v2787_v23  ;;  %v6641_v23 = vor.u32 %v7885_v60, %v6640_v20 }
 0x424   : > { %3174 = vmatpush.bf16.msrb.mxu3 %v6641_v23  ;;  %v7947_v23 = vld [vmem:[%s11003_s5 + $0x1b8] sm:$0xf0] }
 0x428   : > { %v3012_v13 = vpop.f32.mrf.mxu1 }
 0x4b9   : > { %v2860_v32 = vpop.trf.xlu1  ;;  %v2804_v9 = vpop.trf.xlu0 }
 0x4ba   : > { %6569 = vmatmul.msk.f32.vlgmr.msrb.gmra.mxu0 %vm2820_vm6, %v2804_v9  ;;  %v7883_v9 = vld [vmem:[%s11001_s3 + $0x94] sm:$0xf0] }
 0x4bb   : > { %3035 = vmatpush.bf16.msrb.mxu0 %v7861_v30  ;;  %v6687_v30 = vor.u32 %v7866_v53, %v6684_v28  ;;  %v7943_v28 = vld [vmem:[%s11003_s5 + $0x19c] sm:$0xf] }
 0x4bf   : > { %3036 = vmatpush.bf16.msrb.mxu0 %v7860_v12  ;;  %v7882_v12 = vld [vmem:[%s11001_s3 + $0x94] sm:$0xf] }
 0x4c0   : > { %v6637_v38 = vor.u32 %v7882_v12, %v6634_v35  ;;  %v6828_v12 = vld [vmem:[%s11003_s5 + $0x180] sm:$0xf]  ;;  %v7940_v35 = vld [vmem:[%s11003_s5 + $0x184] sm:$0xf] }
 0x4c1   : > { %v2916_v33 = vpop.trf.xlu1 }
 0x4c2   : > { %6570 = vmatmul.msk.f32.vlgmr.msra.gmra.mxu0 %vm2876_vm7, %v2860_v32  ;;  %6571 = vmatmul.msk.f32.vlgmr.msra.gmra.mxu2 %vm2876_vm7, %v2916_v33  ;;  %v6632_v32 = vld [vmem:[%s11001_s3 + $0x90] sm:$0xf] }
 0x4c3   : > { %3285 = vmatpush.bf16.msra.mxu0 %v6727_v5  ;;  %v6633_v34 = vor.u32 %v7883_v9, %v6632_v32  ;;  %v6675_v5 = vor.u32 %v7865_v55, %v6674_v31  ;;  %v6841_v32 = vor.u32 %v7944_v14, %v6840_v24  ;;  %v6816_v55 = vld [vmem:[%s11003_s5 + $0x168] sm:$0xf]  ;;  %v7952_v24 = vld [vmem:[%s11003_s5 + $0x1e4] sm:$0xf]  ;;  %v6878_v14 = vld [vmem:[%s11003_s5 + $0x1ec] sm:$0xf0] }
 0x4c5   : > { %3175 = vmatpush.bf16.msrb.mxu3 %v6633_v34  ;;  %3277 = vmatpush.bf16.msrb.mxu1 %v6675_v5  ;;  %v7938_v5 = vld [vmem:[%s11003_s5 + $0x170] sm:$0xf0] }
 0x4c6   : > { %v6817_v42 = vor.u32 %v7938_v5, %v6816_v55  ;;  %v7911_v55 = vld [vmem:[%s11003_s5 + $0x98] sm:$0xf0] }
 0x4c7   : > { %3286 = vmatpush.bf16.msra.mxu0 %v6719_v46  ;;  %v7880_v46 = vld [vmem:[%s11001_s3 + $0x84] sm:$0xf] }
 0x4c8   : > { %v6629_v49 = vor.u32 %v7880_v46, %v6626_v48  ;;  %v6818_v46 = vld [vmem:[%s11003_s5 + $0x174] sm:$0xf0]  ;;  %v7961_v48 = vld [vmem:[%s11003_s5 + $0x22c] sm:$0xf] }
 0x4c9   : > { %3176 = vmatpush.bf16.msrb.mxu3 %v6625_v47  ;;  %3664 = vmatpush.bf16.msra.mxu1 %v6869_v36  ;;  %v6821_v47 = vor.u32 %v7937_v45, %v6818_v46  ;;  %v6792_v36 = vld [vmem:[%s11003_s5 + $0x138] sm:$0xf]  ;;  %v7923_v46 = vld [vmem:[%s11003_s5 + $0xf8] sm:$0xf0] }
 0x4ca   : > { %6599 = vmatmul.msk.bf16.vlgmr.msrb.gmra.mxu0 %vm499_vm0, %v7859_v25  ;;  %v6642_v25 = vld [vmem:[%s11001_s3 + $0xa8] sm:$0xf0] }
 0x4cb   : > { %3287 = vmatpush.bf16.msra.mxu0 %v6711_v58  ;;  %v6645_v26 = vor.u32 %v7884_v61, %v6642_v25  ;;  %v7950_v58 = vld [vmem:[%s11003_s5 + $0x1d0] sm:$0xf0]  ;;  %v6852_v61 = vld [vmem:[%s11003_s5 + $0x1b0] sm:$0xf] }
 0x4cc   : > { %v6865_v59 = vor.u32 %v7950_v58, %v6864_v56  ;;  %v6853_v25 = vor.u32 %v7947_v23, %v6852_v61  ;;  %v7934_v58 = vld [vmem:[%s11003_s5 + $0x154] sm:$0xf] }
 0x4cd   : > { %3188 = vmatpush.bf16.msrb.mxu2 %v6645_v26  ;;  %3177 = vmatpush.bf16.msrb.mxu3 %v6617_v7  ;;  %v7946_v26 = vld [vmem:[%s11003_s5 + $0x1b4] sm:$0xf]  ;;  %v6900_v7 = vld [vmem:[%s11003_s5 + $0x210] sm:$0xf]  ;;  %v6809_v40 = vor.u32 %v7934_v58, %v6806_v37  ;;  %v7920_v58 = vld [vmem:[%s11003_s5 + $0xe0] sm:$0xf0] }
 0x4ce   : > { %v6857_v53 = vor.u32 %v7946_v26, %v6854_v27  ;;  %v7914_v61 = vld [vmem:[%s11003_s5 + $0xb0] sm:$0xf0]  ;;  %v7928_v26 = vld [vmem:[%s11003_s5 + $0x124] sm:$0xf]  ;;  %v6782_v27 = vld [vmem:[%s11003_s5 + $0x12c] sm:$0xf0] }
 0x4cf   : > { %3288 = vmatpush.bf16.msra.mxu0 %v6703_v15 }
 0x4d0   : > { %3665 = vmatpush.bf16.msra.mxu1 %v6857_v53  ;;  %v6785_v53 = vor.u32 %v7928_v26, %v6782_v27  ;;  %v7899_v26 = vld [vmem:[%s11003_s5 + $0x38] sm:$0xf0] }
 0x4d1   : > { %3189 = vmatpush.bf16.msrb.mxu2 %v6637_v38  ;;  %3636 = vmatpush.bf16.msra.mxu3 %v6865_v59  ;;  %v6830_v38 = vld [vmem:[%s11003_s5 + $0x18c] sm:$0xf0]  ;;  %v7958_v59 = vld [vmem:[%s11003_s5 + $0x214] sm:$0xf] }
 0x4d2   : > { %v6833_v31 = vor.u32 %v7940_v35, %v6830_v38  ;;  %v7948_v38 = vld [vmem:[%s11003_s5 + $0x1c0] sm:$0xf0] }
 0x4d3   : > { %3289 = vmatpush.bf16.msra.mxu0 %v6695_v19 }
 0x4d5   : > { %3190 = vmatpush.bf16.msrb.mxu2 %v6629_v49  ;;  %3637 = vmatpush.bf16.msra.mxu3 %v6853_v25  ;;  %v6914_v49 = vld [vmem:[%s11003_s5 + $0x234] sm:$0xf0] }
 0x4d6   : > { %v6917_v50 = vor.u32 %v7961_v48, %v6914_v49  ;;  %v7945_v48 = vld [vmem:[%s11003_s5 + $0x1a8] sm:$0xf0] }
 0x4d7   : > { %3290 = vmatpush.bf16.msra.mxu0 %v6687_v30  ;;  %v6842_v30 = vld [vmem:[%s11003_s5 + $0x1a4] sm:$0xf0] }
 0x4d8   : > { %v6845_v9 = vor.u32 %v7943_v28, %v6842_v30  ;;  %v6920_v28 = vld [vmem:[%s11003_s5 + $0x230] sm:$0xf]  ;;  %v7963_v30 = vld [vmem:[%s11003_s5 + $0x238] sm:$0xf0] }
 0x4d9   : > { %3191 = vmatpush.bf16.msrb.mxu2 %v6621_v54  ;;  %3638 = vmatpush.bf16.msra.mxu3 %v6841_v32  ;;  %v7959_v54 = vld [vmem:[%s11003_s5 + $0x218] sm:$0xf0]  ;;  %v6881_v32 = vor.u32 %v7952_v24, %v6878_v14 }
 0x4da   : > { %3666 = vmatpush.bf16.msra.mxu1 %v6845_v9  ;;  %v6901_v56 = vor.u32 %v7959_v54, %v6900_v7  ;;  %v6921_v9 = vor.u32 %v7963_v30, %v6920_v28  ;;  %v6896_v7 = vld [vmem:[%s11003_s5 + $0x200] sm:$0xf]  ;;  %v7957_v54 = vld [vmem:[%s11003_s5 + $0x208] sm:$0xf0] }
 0x4db   : > { %3291 = vmatpush.bf16.msra.mxu0 %v6679_v43  ;;  %v7962_v43 = vld [vmem:[%s11003_s5 + $0x230] sm:$0xf0]  ;;  %v6897_v37 = vor.u32 %v7957_v54, %v6896_v7 }
 0x4dc   : > { %v6913_v44 = vor.u32 %v7962_v43, %v6912_v39  ;;  %v7960_v43 = vld [vmem:[%s11003_s5 + $0x220] sm:$0xf0] }
 0x4de   : > { %3667 = vmatpush.bf16.msra.mxu1 %v6833_v31  ;;  %3654 = vmatpush.bf16.msra.mxu2 %v6913_v44  ;;  %v6999_v31 = vld [vmem:[%s11003_s5 + $0x90] sm:$0xf] }
 0x4df   : > { %3682 = vmatpush.bf16.msrb.mxu0 %v6917_v50  ;;  %v7000_v39 = vor.u32 %v7911_v55, %v6999_v31  ;;  %v7047_v44 = vld [vmem:[%s11003_s5 + $0xf0] sm:$0xf]  ;;  %v6788_v55 = vld [vmem:[%s11003_s5 + $0x128] sm:$0xf] }
 0x4e0   : > { %v7048_v49 = vor.u32 %v7923_v46, %v7047_v44  ;;  %v7893_v46 = vld [vmem:[%s11003_s5 + $0x8] sm:$0xf0] }
 0x4e2   : > { %3668 = vmatpush.bf16.msra.mxu1 %v6821_v47  ;;  %3655 = vmatpush.bf16.msra.mxu2 %v6901_v56  ;;  %v6848_v47 = vld [vmem:[%s11003_s5 + $0x1a0] sm:$0xf]  ;;  %v7035_v56 = vld [vmem:[%s11003_s5 + $0xd8] sm:$0xf] }
 0x4e3   : > { %v6849_v50 = vor.u32 %v7945_v48, %v6848_v47 }
 0x4e6   : > { %3669 = vmatpush.bf16.msra.mxu1 %v6809_v40  ;;  %v6836_v40 = vld [vmem:[%s11003_s5 + $0x188] sm:$0xf] }
 0x537   : > { %v2841_v33 = vpop.f32.mrf.mxu0 }
 0x538   : > { %2956 = vst.msk [vmem:[%s9735_s17] sm:$0xff] %vm2876_vm7, %v2841_v33  ;;  %v7941_v33 = vld [vmem:[%s11003_s5 + $0x188] sm:$0xf0] }
 0x539   : > { %v6829_v34 = vor.u32 %v7941_v33, %v6828_v12  ;;  %v7059_v12 = vld [vmem:[%s11003_s5 + $0x108] sm:$0xf]  ;;  %v7926_v33 = vld [vmem:[%s11003_s5 + $0x110] sm:$0xf0] }
 0x53a   : > { %v7060_v35 = vor.u32 %v7926_v33, %v7059_v12  ;;  %v6939_v12 = vld [vmem:[%s11003_s5 + $0x18] sm:$0xf] }
 0x53b   : > { %3639 = vmatpush.bf16.msra.mxu3 %v6829_v34  ;;  %v6860_v34 = vld [vmem:[%s11003_s5 + $0x1b8] sm:$0xf] }
 0x53c   : > { %v6861_v5 = vor.u32 %v7948_v38, %v6860_v34 }
 0x53f   : > { %v9790_v52 = vpop.f32.mrf.mxu0  ;;  %3640 = vmatpush.bf16.msra.mxu3 %v6817_v42  ;;  %v6908_v42 = vld [vmem:[%s11003_s5 + $0x218] sm:$0xf] }
 0x540   : > { %v6909_v45 = vor.u32 %v7960_v43, %v6908_v42 }
 0x543   : > { %3641 = vmatpush.bf16.msra.mxu3 %v6805_v51  ;;  %v6988_v51 = vor.u32 %v7908_v6, %v6987_v8 }
 0x547   : > { %v3038_v1 = vpop.f32.mrf.mxu0 }
 0x548   : > { %v3039_v2 = vadd.f32 %v3038_v1, %v3010_v41  ;;  %v6902_v41 = vld [vmem:[%s11003_s5 + $0x21c] sm:$0xf0] }
 0x549   : > { %v6905_v1 = vor.u32 %v7958_v59, %v6902_v41  ;;  %v7036_v59 = vor.u32 %v7920_v58, %v7035_v56  ;;  %v7942_v41 = vld [vmem:[%s11003_s5 + $0x190] sm:$0xf0] }
 0x54a   : > { %v3047_v63 = vadd.f32 %v8097_v0, %v3039_v2 }
 0x54b   : > { %3683 = vmatpush.bf16.msrb.mxu0 %v6905_v1  ;;  %v10027_v1 = vpop.f32.mrf.mxu2 }
 0x54c   : > { %v3051_v3 = vmul.f32 0.5, %v3047_v63  ;;  %vm3049_vm0 = vcmp.gt.f32.partialorder %v3047_v63, 0.0 }
 0x54e   : > { %v3053_v21 = vsel %vm3049_vm0, %v3047_v63, %v3051_v3  ;;  %v6888_v63 = vld [vmem:[%s11003_s5 + $0x1f8] sm:$0xf]  ;;  %v7956_v3 = vld [vmem:[%s11003_s5 + $0x200] sm:$0xf0] }
 0x54f   : > { %v3040_v15 = vpop.f32.mrf.mxu0  ;;  %v3055_v57 = vpack.c.bf16 %v3053_v21, %v3053_v21  ;;  %v7955_v21 = vld [vmem:[%s11003_s5 + $0x1fc] sm:$0xf] }
 0x550   : > { %v3041_v16 = vadd.f32 %v3040_v15, %v3012_v13  ;;  %v6889_v13 = vor.u32 %v7956_v3, %v6888_v63  ;;  %v7931_v15 = vld [vmem:[%s11003_s5 + $0x13c] sm:$0xf]  ;;  %v6884_v3 = vld [vmem:[%s11003_s5 + $0x1e8] sm:$0xf] }
 0x551   : > { %v3087_v17 = vunpack.c.l.b16 %v3055_v57  ;;  %v6780_v57 = vld [vmem:[%s11003_s5 + $0x120] sm:$0xf] }
 0x552   : > { %v3048_v22 = vadd.f32 %v8097_v0, %v3041_v16  ;;  %v7932_v0 = vld [vmem:[%s11003_s5 + $0x140] sm:$0xf0]  ;;  %v6794_v16 = vld [vmem:[%s11003_s5 + $0x144] sm:$0xf0]  ;;  %3656 = vmatpush.bf16.msra.mxu2 %v6889_v13  ;;  %v7954_v13 = vld [vmem:[%s11003_s5 + $0x1f0] sm:$0xf0] }
 0x553   : > { %v6793_v2 = vor.u32 %v7932_v0, %v6792_v36  ;;  %v6975_v36 = vld [vmem:[%s11003_s5 + $0x60] sm:$0xf]  ;;  %v7905_v0 = vld [vmem:[%s11003_s5 + $0x68] sm:$0xf0] }
 0x554   : > { %vm3050_vm9 = vcmp.gt.f32.partialorder %v3048_v22, 0.0  ;;  %v3052_v29 = vmul.f32 0.5, %v3048_v22  ;;  %v6976_v63 = vor.u32 %v7905_v0, %v6975_v36 }
 0x555   : > { %3642 = vmatpush.bf16.msra.mxu3 %v6793_v2  ;;  %v6837_v2 = vor.u32 %v7942_v41, %v6836_v40 }
 0x556   : > { %v3054_v62 = vsel %vm3050_vm9, %v3048_v22, %v3052_v29  ;;  %v6797_v22 = vor.u32 %v7931_v15, %v6794_v16  ;;  %v6890_v29 = vld [vmem:[%s11003_s5 + $0x204] sm:$0xf0]  ;;  %v7023_v15 = vld [vmem:[%s11003_s5 + $0xc0] sm:$0xf]  ;;  %v6885_v16 = vor.u32 %v7954_v13, %v6884_v3 }
 0x557   : > { %v3056_v4 = vpack.c.bf16 %v3054_v62, %v3054_v62  ;;  %v7929_v62 = vld [vmem:[%s11003_s5 + $0x128] sm:$0xf0] }
 0x558   : > { %3670 = vmatpush.bf16.msra.mxu1 %v6797_v22  ;;  %v6824_v22 = vld [vmem:[%s11003_s5 + $0x170] sm:$0xf] }
 0x559   : > { %v3088_v18 = vunpack.c.l.b16 %v3056_v4  ;;  %v6893_v4 = vor.u32 %v7955_v21, %v6890_v29  ;;  %v7917_v21 = vld [vmem:[%s11003_s5 + $0xc8] sm:$0xf0]  ;;  %v7939_v29 = vld [vmem:[%s11003_s5 + $0x178] sm:$0xf0] }
 0x55b   : > { %v3089_v10 = vpack.c.b16 %v3088_v18, %v3087_v17  ;;  %v6781_v17 = vor.u32 %v7929_v62, %v6780_v57  ;;  %v6876_v18 = vld [vmem:[%s11003_s5 + $0x1e0] sm:$0xf]  ;;  %3684 = vmatpush.bf16.msrb.mxu0 %v6893_v4  ;;  %v7024_v62 = vor.u32 %v7917_v21, %v7023_v15  ;;  %v6825_v4 = vor.u32 %v7939_v29, %v6824_v22  ;;  %v7013_v21 = vld [vmem:[%s11003_s5 + $0xb4] sm:$0xf0] }
 0x55c   : > { %3671 = vmatpush.bf16.msra.mxu1 %v6785_v53  ;;  %v3298_v57 = vld [vmem:[%s11002_s4] sm:$0x3] }
 0x55d   : > { %6728 = vmatmul.msk.bf16.vlgmr.msrb.gmra.mxu1 %vm670_vm3, %v3089_v10  ;;  %6729 = vmatmul.msk.bf16.vlgmr.msra.gmra.mxu0 %vm670_vm3, %v3089_v10  ;;  %v3093_v11 = vshll.u32 %v3089_v10, 16  ;;  %v3091_v19 = vshrl.u32 %v3089_v10, 16  ;;  %v7953_v10 = vld [vmem:[%s11003_s5 + $0x1e8] sm:$0xf0] }
 0x55e   : > { %3643 = vmatpush.bf16.msra.mxu3 %v6781_v17  ;;  %v6963_v17 = vld [vmem:[%s11003_s5 + $0x48] sm:$0xf] }
 0x55f   : > { %v3095_v20 = vrot.slane %v3093_v11, 1  ;;  %v6872_v11 = vld [vmem:[%s11003_s5 + $0x1d0] sm:$0xf]  ;;  %3685 = vmatpush.bf16.msrb.mxu0 %v6881_v32  ;;  %v6800_v32 = vld [vmem:[%s11003_s5 + $0x140] sm:$0xf] }
 0x560   : > { %3933 = vmatpush.bf16.msrb.mxu1 %v7060_v35  ;;  %v7896_v35 = vld [vmem:[%s11003_s5 + $0x20] sm:$0xf0] }
 0x561   : > { %v3096_v60 = vor.u32 %v3095_v20, %v3091_v19  ;;  %v6877_v19 = vor.u32 %v7953_v10, %v6876_v18  ;;  %v7951_v20 = vld [vmem:[%s11003_s5 + $0x1d8] sm:$0xf0]  ;;  %v7902_v18 = vld [vmem:[%s11003_s5 + $0x50] sm:$0xf0]  ;;  %v6940_v31 = vor.u32 %v7896_v35, %v6939_v12 }
 0x562   : > { %v6873_v23 = vor.u32 %v7951_v20, %v6872_v11  ;;  %v6812_v20 = vld [vmem:[%s11003_s5 + $0x158] sm:$0xf]  ;;  %v7922_v12 = vld [vmem:[%s11003_s5 + $0xf4] sm:$0xf] }
 0x563   : > { %6670 = vmatmul.msk.bf16.vlgmr.msrb.gmra.mxu3 %vm670_vm3, %v3096_v60  ;;  %6671 = vmatmul.msk.bf16.vlgmr.msrb.gmra.mxu2 %vm670_vm3, %v3096_v60  ;;  %v7011_v60 = vld [vmem:[%s11003_s5 + $0xa8] sm:$0xf] }
 0x564   : > { %v7012_v25 = vor.u32 %v7914_v61, %v7011_v60  ;;  %3657 = vmatpush.bf16.msra.mxu2 %v6877_v19  ;;  %3710 = vmatpush.bf16.msra.mxu0 %v6921_v9  ;;  %v6964_v19 = vor.u32 %v7902_v18, %v6963_v17  ;;  %v7936_v60 = vld [vmem:[%s11003_s5 + $0x160] sm:$0xf0]  ;;  %v6951_v61 = vld [vmem:[%s11003_s5 + $0x30] sm:$0xf]  ;;  %v7933_v9 = vld [vmem:[%s11003_s5 + $0x148] sm:$0xf0] }
 0x565   : > { %3934 = vmatpush.bf16.msrb.mxu1 %v7048_v49  ;;  %v6813_v53 = vor.u32 %v7936_v60, %v6812_v20  ;;  %v6952_v14 = vor.u32 %v7899_v26, %v6951_v61  ;;  %v6801_v38 = vor.u32 %v7933_v9, %v6800_v32  ;;  %v7927_v17 = vld [vmem:[%s11003_s5 + $0x118] sm:$0xf0]  ;;  %v7925_v18 = vld [vmem:[%s11003_s5 + $0x10c] sm:$0xf]  ;;  %v7061_v60 = vld [vmem:[%s11003_s5 + $0x114] sm:$0xf0] }
 0x566   : > { %3915 = vmatpush.bf16.msrb.mxu3 %v7012_v25  ;;  %v3301_v25 = vperm.slane %v3298_v57, 1  ;;  %v7055_v32 = vld [vmem:[%s11003_s5 + $0xf8] sm:$0xf]  ;;  %v7924_v9 = vld [vmem:[%s11003_s5 + $0x100] sm:$0xf0] }
 0x568   : > { %3692 = vmatpush.bf16.msrb.mxu2 %v6873_v23  ;;  %3711 = vmatpush.bf16.msra.mxu0 %v6909_v45  ;;  %v3300_v23 = vperm.slane %v3298_v57, 0  ;;  %v7019_v57 = vld [vmem:[%s11003_s5 + $0xb0] sm:$0xf] }
 0x569   : > { %3935 = vmatpush.bf16.msrb.mxu1 %v7036_v59 }
 0x56a   : > { %3916 = vmatpush.bf16.msrb.mxu3 %v7000_v39  ;;  %v6927_v39 = vld [vmem:[%s11003_s5] sm:$0xf] }
 0x56c   : > { %3693 = vmatpush.bf16.msrb.mxu2 %v6861_v5  ;;  %3712 = vmatpush.bf16.msra.mxu0 %v6897_v37  ;;  %v7930_v5 = vld [vmem:[%s11003_s5 + $0x130] sm:$0xf0] }
 0x56d   : > { %3936 = vmatpush.bf16.msrb.mxu1 %v7024_v62  ;;  %v6789_v49 = vor.u32 %v7930_v5, %v6788_v55  ;;  %v7915_v62 = vld [vmem:[%s11003_s5 + $0xb8] sm:$0xf0]  ;;  %v6995_v55 = vld [vmem:[%s11003_s5 + $0x80] sm:$0xf]  ;;  %v7909_v5 = vld [vmem:[%s11003_s5 + $0x88] sm:$0xf0] }
 0x56e   : > { %3917 = vmatpush.bf16.msrb.mxu3 %v6988_v51  ;;  %v7020_v26 = vor.u32 %v7915_v62, %v7019_v57  ;;  %v6959_v57 = vld [vmem:[%s11003_s5 + $0x38] sm:$0xf]  ;;  %v7900_v62 = vld [vmem:[%s11003_s5 + $0x40] sm:$0xf0] }
 0x570   : > { %3694 = vmatpush.bf16.msrb.mxu2 %v6849_v50  ;;  %3713 = vmatpush.bf16.msra.mxu0 %v6885_v16  ;;  %v6928_v50 = vor.u32 %v7893_v46, %v6927_v39  ;;  %v7913_v16 = vld [vmem:[%s11003_s5 + $0xac] sm:$0xf]  ;;  %v7056_v39 = vor.u32 %v7924_v9, %v7055_v32  ;;  %v7037_v46 = vld [vmem:[%s11003_s5 + $0xe4] sm:$0xf0]  ;;  %v7266_v9 = vld [vmem:[%s11005_s7 + $0x270] sm:$0xf] }
 0x572   : > { %3918 = vmatpush.bf16.msrb.mxu3 %v6976_v63 }
 0x574   : > { %3695 = vmatpush.bf16.msrb.mxu2 %v6837_v2 }
 0x576   : > { %3919 = vmatpush.bf16.msrb.mxu3 %v6964_v19 }
 0x578   : > { %3696 = vmatpush.bf16.msrb.mxu2 %v6825_v4  ;;  %v7067_v4 = vld [vmem:[%s11003_s5 + $0x110] sm:$0xf] }
 0x57a   : > { %3920 = vmatpush.bf16.msrb.mxu3 %v6952_v14  ;;  %v7912_v14 = vld [vmem:[%s11003_s5 + $0xa0] sm:$0xf0] }
 0x57c   : > { %3697 = vmatpush.bf16.msrb.mxu2 %v6813_v53  ;;  %v7007_v53 = vld [vmem:[%s11003_s5 + $0x98] sm:$0xf] }
 0x57d   : > { %v7008_v35 = vor.u32 %v7912_v14, %v7007_v53  ;;  %v7234_v53 = vld [vmem:[%s11005_s7 + $0x230] sm:$0xf]  ;;  %v8035_v14 = vld [vmem:[%s11005_s7 + $0x234] sm:$0xf0] }
 0x57e   : > { %3921 = vmatpush.bf16.msrb.mxu3 %v6940_v31  ;;  %v6989_v31 = vld [vmem:[%s11003_s5 + $0x84] sm:$0xf0] }
 0x580   : > { %3698 = vmatpush.bf16.msrb.mxu2 %v6801_v38  ;;  %v7907_v38 = vld [vmem:[%s11003_s5 + $0x7c] sm:$0xf] }
 0x582   : > { %3922 = vmatpush.bf16.msrb.mxu3 %v6928_v50  ;;  %v6977_v50 = vld [vmem:[%s11003_s5 + $0x6c] sm:$0xf0] }
 0x584   : > { %3699 = vmatpush.bf16.msrb.mxu2 %v6789_v49  ;;  %v7904_v49 = vld [vmem:[%s11003_s5 + $0x64] sm:$0xf] }
 0x5da   : > { %v3279_v10 = vpop.f32.mrf.mxu1  ;;  %v3293_v11 = vpop.f32.mrf.mxu0 }
 0x5e2   : > { %v3281_v42 = vpop.f32.mrf.mxu1  ;;  %v3295_v43 = vpop.f32.mrf.mxu0 }
 0x5e6   : > { %v3179_v27 = vpop.f32.mrf.mxu3  ;;  %v3193_v24 = vpop.f32.mrf.mxu2 }
 0x5e7   : > { %v3280_v28 = vadd.f32 %v3279_v10, %v3179_v27  ;;  %v3294_v30 = vadd.f32 %v3293_v11, %v3193_v24  ;;  %v7910_v27 = vld [vmem:[%s11003_s5 + $0x94] sm:$0xf]  ;;  %v7001_v24 = vld [vmem:[%s11003_s5 + $0x9c] sm:$0xf0] }
 0x5e9   : > { %v3304_v33 = vadd.f32 %v3300_v23, %v3280_v28  ;;  %v3305_v34 = vadd.f32 %v3301_v25, %v3294_v30  ;;  %v7068_v28 = vor.u32 %v7927_v17, %v7067_v4  ;;  %v7064_v30 = vor.u32 %v7925_v18, %v7061_v60  ;;  %v7895_v18 = vld [vmem:[%s11003_s5 + $0x1c] sm:$0xf] }
 0x5ea   : > { %v6960_v17 = vor.u32 %v7900_v62, %v6959_v57  ;;  %v7146_v62 = vld [vmem:[%s11005_s7 + $0x180] sm:$0xf] }
 0x5eb   : > { %v3312_v44 = vmul.f32 0.5, %v3304_v33  ;;  %v3313_v45 = vmul.f32 0.5, %v3305_v34  ;;  %vm3308_vm10 = vcmp.gt.f32.partialorder %v3304_v33, 0.0  ;;  %vm3309_vm14 = vcmp.gt.f32.partialorder %v3305_v34, 0.0 }
 0x5ed   : > { %v3316_v7 = vsel %vm3308_vm10, %v3304_v33, %v3312_v44  ;;  %v3317_v51 = vsel %vm3309_vm14, %v3305_v34, %v3313_v45  ;;  %v7049_v33 = vld [vmem:[%s11003_s5 + $0xfc] sm:$0xf0]  ;;  %v7004_v34 = vor.u32 %v7910_v27, %v7001_v24  ;;  %v7921_v44 = vld [vmem:[%s11003_s5 + $0xe8] sm:$0xf0]  ;;  %v7919_v45 = vld [vmem:[%s11003_s5 + $0xdc] sm:$0xf] }
 0x5ee   : > { %v3181_v47 = vpop.f32.mrf.mxu3  ;;  %v3195_v48 = vpop.f32.mrf.mxu2  ;;  %v3320_v59 = vpack.c.bf16 %v3317_v51, %v3316_v7  ;;  %v7040_v51 = vor.u32 %v7919_v45, %v7037_v46  ;;  %v8017_v45 = vld [vmem:[%s11005_s7 + $0x1a4] sm:$0xf0]  ;;  %v7258_v46 = vld [vmem:[%s11005_s7 + $0x260] sm:$0xf] }
 0x5ef   : > { %v3282_v8 = vadd.f32 %v3281_v42, %v3181_v47  ;;  %v3296_v6 = vadd.f32 %v3295_v43, %v3195_v48  ;;  %v7052_v42 = vor.u32 %v7922_v12, %v7049_v33  ;;  %v7043_v43 = vld [vmem:[%s11003_s5 + $0xe0] sm:$0xf]  ;;  %v6992_v47 = vor.u32 %v7907_v38, %v6989_v31  ;;  %v8043_v33 = vld [vmem:[%s11005_s7 + $0x274] sm:$0xf0] }
 0x5f0   : > { %v3420_v0 = vunpack.c.l.b16 %v3320_v59  ;;  %v3421_v2 = vunpack.c.h.b16 %v3320_v59  ;;  %v6996_v48 = vor.u32 %v7909_v5, %v6995_v55  ;;  %v7044_v7 = vor.u32 %v7921_v44, %v7043_v43  ;;  %v7226_v55 = vld [vmem:[%s11005_s7 + $0x220] sm:$0xf]  ;;  %v8033_v5 = vld [vmem:[%s11005_s7 + $0x224] sm:$0xf0] }
 0x5f1   : > { %v3306_v54 = vadd.f32 %v3300_v23, %v3282_v8  ;;  %v3307_v56 = vadd.f32 %v3301_v25, %v3296_v6  ;;  %v7016_v25 = vor.u32 %v7913_v16, %v7013_v21  ;;  %v6983_v8 = vld [vmem:[%s11003_s5 + $0x68] sm:$0xf]  ;;  %v7906_v6 = vld [vmem:[%s11003_s5 + $0x70] sm:$0xf0]  ;;  %v6980_v59 = vor.u32 %v7904_v49, %v6977_v50  ;;  %v7162_v44 = vld [vmem:[%s11005_s7 + $0x1a0] sm:$0xf] }
 0x5f2   : > { %v7267_v38 = vor.u32 %v8043_v33, %v7266_v9  ;;  %v8016_v49 = vld [vmem:[%s11005_s7 + $0x1a4] sm:$0xf]  ;;  %v7164_v50 = vld [vmem:[%s11005_s7 + $0x1a8] sm:$0xf0]  ;;  %v8010_v9 = vld [vmem:[%s11005_s7 + $0x174] sm:$0xf] }
 0x5f3   : > { %vm3310_vm15 = vcmp.gt.f32.partialorder %v3306_v54, 0.0  ;;  %v3314_v58 = vmul.f32 0.5, %v3306_v54  ;;  %vm3311_vm1 = vcmp.gt.f32.partialorder %v3307_v56, 0.0  ;;  %v3315_v37 = vmul.f32 0.5, %v3307_v56  ;;  %v7140_v33 = vld [vmem:[%s11005_s7 + $0x178] sm:$0xf0] }
 0x5f5   : > { %v3318_v40 = vsel %vm3310_vm15, %v3306_v54, %v3314_v58  ;;  %v3319_v41 = vsel %vm3311_vm1, %v3307_v56, %v3315_v37  ;;  %v7031_v54 = vld [vmem:[%s11003_s5 + $0xc8] sm:$0xf]  ;;  %v7918_v56 = vld [vmem:[%s11003_s5 + $0xd0] sm:$0xf0]  ;;  %v7916_v58 = vld [vmem:[%s11003_s5 + $0xc4] sm:$0xf] }
 0x5f6   : > { %v3321_v36 = vpack.c.bf16 %v3319_v41, %v3318_v40  ;;  %v7025_v37 = vld [vmem:[%s11003_s5 + $0xcc] sm:$0xf0]  ;;  %v6984_v40 = vor.u32 %v7906_v6, %v6983_v8  ;;  %v7901_v41 = vld [vmem:[%s11003_s5 + $0x4c] sm:$0xf]  ;;  %v7167_v6 = vor.u32 %v8016_v49, %v7164_v50  ;;  %v8009_v49 = vld [vmem:[%s11005_s7 + $0x164] sm:$0xf0] }
 0x5f8   : > { %v3422_v63 = vunpack.c.l.b16 %v3321_v36  ;;  %v3423_v3 = vunpack.c.h.b16 %v3321_v36  ;;  %v6965_v36 = vld [vmem:[%s11003_s5 + $0x54] sm:$0xf0] }
 0x5f9   : > { %v6968_v16 = vor.u32 %v7901_v41, %v6965_v36  ;;  %v8039_v36 = vld [vmem:[%s11005_s7 + $0x254] sm:$0xf0] }
 0x5fa   : > { %v10092_v13 = vpack.c.b16 %v3422_v63, %v3420_v0  ;;  %v10094_v15 = vpack.c.b16 %v3423_v3, %v3421_v2  ;;  %v6971_v0 = vld [vmem:[%s11003_s5 + $0x50] sm:$0xf]  ;;  %v7903_v2 = vld [vmem:[%s11003_s5 + $0x58] sm:$0xf0]  ;;  %v7032_v63 = vor.u32 %v7918_v56, %v7031_v54  ;;  %v7028_v3 = vor.u32 %v7916_v58, %v7025_v37 }
 0x5fb   : > { %v6972_v21 = vor.u32 %v7903_v2, %v6971_v0  ;;  %v7154_v37 = vld [vmem:[%s11005_s7 + $0x190] sm:$0xf]  ;;  %v8014_v0 = vld [vmem:[%s11005_s7 + $0x194] sm:$0xf]  ;;  %v7156_v2 = vld [vmem:[%s11005_s7 + $0x198] sm:$0xf0] }
 0x5fc   : > { %v3429_v22 = vshll.u32 %v10092_v13, 16  ;;  %v3436_v29 = vshll.u32 %v10094_v15, 16  ;;  %v3427_v10 = vshrl.u32 %v10092_v13, 16  ;;  %v3434_v19 = vshrl.u32 %v10094_v15, 16 }
 0x5fe   : > { %v3431_v11 = vrot.slane %v3429_v22, 1  ;;  %v3438_v20 = vrot.slane %v3436_v29, 1  ;;  %v7898_v22 = vld [vmem:[%s11003_s5 + $0x34] sm:$0xf]  ;;  %v6953_v29 = vld [vmem:[%s11003_s5 + $0x3c] sm:$0xf0] }
 0x5ff   : > { %v6956_v4 = vor.u32 %v7898_v22, %v6953_v29 }
 0x600   : > { %v10124_v61 = vor.u32 %v3431_v11, %v3427_v10  ;;  %v10126_v23 = vor.u32 %v3438_v20, %v3434_v19  ;;  %v6941_v10 = vld [vmem:[%s11003_s5 + $0x24] sm:$0xf0]  ;;  %v6947_v11 = vld [vmem:[%s11003_s5 + $0x20] sm:$0xf]  ;;  %v7897_v19 = vld [vmem:[%s11003_s5 + $0x28] sm:$0xf0] }
 0x601   : > { %v6944_v20 = vor.u32 %v7895_v18, %v6941_v10  ;;  %v6948_v60 = vor.u32 %v7897_v19, %v6947_v11  ;;  %v8037_v10 = vld [vmem:[%s11005_s7 + $0x244] sm:$0xf0]  ;;  %v8012_v11 = vld [vmem:[%s11005_s7 + $0x184] sm:$0xf]  ;;  %v7148_v19 = vld [vmem:[%s11005_s7 + $0x188] sm:$0xf0] }
 0x602   : > { %3644 = vmatmul.bf16.vlgmr.msra.gmra.mxu3 %v10124_v61  ;;  %6922 = vmatmul.msk.bf16.vlgmr.msra.gmra.mxu2 %vm1138_vm8, %v10126_v23 }
 0x603   : > { %3672 = vmatmul.bf16.vlgmr.msra.gmra.mxu1 %v10124_v61  ;;  %6923 = vmatmul.msk.bf16.vlgmr.msrb.gmra.mxu0 %vm1138_vm8, %v10126_v23 }
 0x604   : > { %3943 = vmatpush.bf16.msrb.mxu0 %v7016_v25  ;;  %3971 = vmatpush.bf16.msra.mxu1 %v7020_v26  ;;  %v6935_v25 = vld [vmem:[%s11003_s5 + $0x8] sm:$0xf]  ;;  %v7894_v26 = vld [vmem:[%s11003_s5 + $0x10] sm:$0xf0] }
 0x605   : > { %3989 = vmatpush.bf16.msra.mxu3 %v7068_v28  ;;  %3961 = vmatpush.bf16.msra.mxu2 %v7064_v30  ;;  %v6936_v24 = vor.u32 %v7894_v26, %v6935_v25  ;;  %v7235_v28 = vor.u32 %v8035_v14, %v7234_v53  ;;  %v8034_v25 = vld [vmem:[%s11005_s7 + $0x234] sm:$0xf]  ;;  %v7236_v14 = vld [vmem:[%s11005_s7 + $0x238] sm:$0xf0] }
 0x608   : > { %3944 = vmatpush.bf16.msrb.mxu0 %v7004_v34  ;;  %3972 = vmatpush.bf16.msra.mxu1 %v7008_v35  ;;  %v8018_v34 = vld [vmem:[%s11005_s7 + $0x1b4] sm:$0xf]  ;;  %v7172_v35 = vld [vmem:[%s11005_s7 + $0x1b8] sm:$0xf0] }
 0x609   : > { %3990 = vmatpush.bf16.msra.mxu3 %v7056_v39  ;;  %3962 = vmatpush.bf16.msra.mxu2 %v7052_v42  ;;  %v7175_v31 = vor.u32 %v8018_v34, %v7172_v35  ;;  %v7227_v39 = vor.u32 %v8033_v5, %v7226_v55  ;;  %v7194_v34 = vld [vmem:[%s11005_s7 + $0x1e0] sm:$0xf]  ;;  %v8025_v35 = vld [vmem:[%s11005_s7 + $0x1e4] sm:$0xf0]  ;;  %v8032_v55 = vld [vmem:[%s11005_s7 + $0x224] sm:$0xf] }
 0x60a   : > { %v7228_v5 = vld [vmem:[%s11005_s7 + $0x228] sm:$0xf0] }
 0x60c   : > { %3945 = vmatpush.bf16.msrb.mxu0 %v6992_v47  ;;  %3973 = vmatpush.bf16.msra.mxu1 %v6996_v48  ;;  %v7163_v47 = vor.u32 %v8017_v45, %v7162_v44  ;;  %v8041_v48 = vld [vmem:[%s11005_s7 + $0x264] sm:$0xf0]  ;;  %v7231_v45 = vor.u32 %v8032_v55, %v7228_v5 }
 0x60d   : > { %3991 = vmatpush.bf16.msra.mxu3 %v7044_v7  ;;  %3963 = vmatpush.bf16.msra.mxu2 %v7040_v51  ;;  %v7259_v8 = vor.u32 %v8041_v48, %v7258_v46  ;;  %v7218_v7 = vld [vmem:[%s11005_s7 + $0x210] sm:$0xf]  ;;  %v8031_v51 = vld [vmem:[%s11005_s7 + $0x214] sm:$0xf0]  ;;  %v7130_v48 = vld [vmem:[%s11005_s7 + $0x160] sm:$0xf] }
 0x60e   : > { %v7219_v58 = vor.u32 %v8031_v51, %v7218_v7  ;;  %v7131_v50 = vor.u32 %v8009_v49, %v7130_v48  ;;  %v8023_v7 = vld [vmem:[%s11005_s7 + $0x1d4] sm:$0xf0] }
 0x610   : > { %3946 = vmatpush.bf16.msrb.mxu0 %v6980_v59  ;;  %3974 = vmatpush.bf16.msra.mxu1 %v6984_v40  ;;  %v8015_v59 = vld [vmem:[%s11005_s7 + $0x194] sm:$0xf0]  ;;  %v7250_v40 = vld [vmem:[%s11005_s7 + $0x250] sm:$0xf] }
 0x611   : > { %3992 = vmatpush.bf16.msra.mxu3 %v7032_v63  ;;  %3964 = vmatpush.bf16.msra.mxu2 %v7028_v3  ;;  %v7155_v41 = vor.u32 %v8015_v59, %v7154_v37  ;;  %v7251_v63 = vor.u32 %v8039_v36, %v7250_v40  ;;  %v7159_v3 = vor.u32 %v8014_v0, %v7156_v2  ;;  %v8030_v37 = vld [vmem:[%s11005_s7 + $0x214] sm:$0xf]  ;;  %v7220_v59 = vld [vmem:[%s11005_s7 + $0x218] sm:$0xf0] }
 0x612   : > { %3700 = vmatmul.bf16.vlgmr.msrb.gmra.mxu2 %v10124_v61  ;;  %3923 = vmatmul.bf16.vlgmr.msrb.gmra.mxu3 %v10092_v13  ;;  %v7892_v61 = vld [vmem:[%s11003_s5 + $0x4] sm:$0xf]  ;;  %v7223_v2 = vor.u32 %v8030_v37, %v7220_v59 }
 0x613   : > { %6924 = vmatmul.msk.bf16.vlgmr.msra.gmra.mxu0 %vm1138_vm8, %v10126_v23  ;;  %7069 = vmatmul.msk.bf16.vlgmr.msrb.gmra.mxu1 %vm1138_vm8, %v10094_v15  ;;  %v6929_v23 = vld [vmem:[%s11003_s5 + $0xc] sm:$0xf0] }
 0x614   : > { %3947 = vmatpush.bf16.msrb.mxu0 %v6968_v16  ;;  %3975 = vmatpush.bf16.msra.mxu1 %v6972_v21  ;;  %v6932_v27 = vor.u32 %v7892_v61, %v6929_v23  ;;  %v7210_v16 = vld [vmem:[%s11005_s7 + $0x200] sm:$0xf]  ;;  %v8029_v21 = vld [vmem:[%s11005_s7 + $0x204] sm:$0xf0]  ;;  %v7202_v61 = vld [vmem:[%s11005_s7 + $0x1f0] sm:$0xf] }
 0x615   : > { %4419 = vmatpush.bf16.msrb.mxu3 %v7267_v38  ;;  %v7211_v22 = vor.u32 %v8029_v21, %v7210_v16  ;;  %v8027_v23 = vld [vmem:[%s11005_s7 + $0x1f4] sm:$0xf0]  ;;  %v7143_v38 = vor.u32 %v8010_v9, %v7140_v33  ;;  %v8006_v16 = vld [vmem:[%s11005_s7 + $0x154] sm:$0xf] }
 0x616   : > { %v7203_v53 = vor.u32 %v8027_v23, %v7202_v61  ;;  %v8026_v33 = vld [vmem:[%s11005_s7 + $0x1f4] sm:$0xf] }
 0x618   : > { %3948 = vmatpush.bf16.msrb.mxu0 %v6956_v4  ;;  %3976 = vmatpush.bf16.msra.mxu1 %v6960_v17  ;;  %v8013_v4 = vld [vmem:[%s11005_s7 + $0x184] sm:$0xf0]  ;;  %v7242_v17 = vld [vmem:[%s11005_s7 + $0x240] sm:$0xf] }
 0x619   : > { %4420 = vmatpush.bf16.msrb.mxu3 %v7259_v8  ;;  %v7147_v18 = vor.u32 %v8013_v4, %v7146_v62  ;;  %v7132_v8 = vld [vmem:[%s11005_s7 + $0x168] sm:$0xf0]  ;;  %v7124_v62 = vld [vmem:[%s11005_s7 + $0x158] sm:$0xf0]  ;;  %v7178_v4 = vld [vmem:[%s11005_s7 + $0x1c0] sm:$0xf] }
 0x61c   : > { %3949 = vmatpush.bf16.msrb.mxu0 %v6944_v20  ;;  %3977 = vmatpush.bf16.msra.mxu1 %v6948_v60  ;;  %v7243_v20 = vor.u32 %v8037_v10, %v7242_v17  ;;  %v7151_v60 = vor.u32 %v8012_v11, %v7148_v19  ;;  %v8021_v17 = vld [vmem:[%s11005_s7 + $0x1c4] sm:$0xf0]  ;;  %v8028_v11 = vld [vmem:[%s11005_s7 + $0x204] sm:$0xf]  ;;  %v7212_v19 = vld [vmem:[%s11005_s7 + $0x208] sm:$0xf0] }
 0x61d   : > { %4421 = vmatpush.bf16.msrb.mxu3 %v7251_v63  ;;  %v7122_v63 = vld [vmem:[%s11005_s7 + $0x150] sm:$0xf]  ;;  %v7179_v10 = vor.u32 %v8021_v17, %v7178_v4  ;;  %v7215_v23 = vor.u32 %v8028_v11, %v7212_v19  ;;  %v8022_v4 = vld [vmem:[%s11005_s7 + $0x1d4] sm:$0xf]  ;;  %v7188_v17 = vld [vmem:[%s11005_s7 + $0x1d8] sm:$0xf0] }
 0x61e   : > { %v8038_v11 = vld [vmem:[%s11005_s7 + $0x254] sm:$0xf]  ;;  %v7252_v19 = vld [vmem:[%s11005_s7 + $0x258] sm:$0xf0] }
 0x620   : > { %3950 = vmatpush.bf16.msrb.mxu0 %v6932_v27  ;;  %3978 = vmatpush.bf16.msra.mxu1 %v6936_v24  ;;  %v10392_v24 = vld [vmem:[%s11004_s6] sm:$0x7] }
 0x621   : > { %4422 = vmatpush.bf16.msrb.mxu3 %v7243_v20  ;;  %v4001_v44 = vperm.slane %v10392_v24, 0  ;;  %v4002_v0 = vperm.slane %v10392_v24, 1  ;;  %v7332_v20 = vld [vmem:[%s11005_s7 + $0x70] sm:$0xf] }
 0x622   : > { %7070 = vmatmul.msk.bf16.vlgmr.msra.gmra.mxu2 %vm1138_vm8, %v10094_v15  ;;  %7071 = vmatmul.msk.bf16.vlgmr.msra.gmra.mxu3 %vm1138_vm8, %v10094_v15  ;;  %v7170_v15 = vld [vmem:[%s11005_s7 + $0x1b0] sm:$0xf] }
 0x623   : > { %3951 = vmatmul.bf16.vlgmr.msrb.gmra.mxu0 %v10092_v13  ;;  %3979 = vmatmul.bf16.vlgmr.msra.gmra.mxu1 %v10092_v13  ;;  %v8019_v13 = vld [vmem:[%s11005_s7 + $0x1b4] sm:$0xf0] }
 0x624   : > { %4401 = vmatpush.bf16.msra.mxu0 %v7235_v28  ;;  %v7171_v12 = vor.u32 %v8019_v13, %v7170_v15  ;;  %4429 = vmatpush.bf16.msrb.mxu1 %v7175_v31  ;;  %v7239_v28 = vor.u32 %v8034_v25, %v7236_v14  ;;  %v7138_v15 = vld [vmem:[%s11005_s7 + $0x170] sm:$0xf]  ;;  %v8011_v13 = vld [vmem:[%s11005_s7 + $0x174] sm:$0xf0]  ;;  %v7195_v31 = vor.u32 %v8025_v35, %v7194_v34  ;;  %v7204_v34 = vld [vmem:[%s11005_s7 + $0x1f8] sm:$0xf0] }
 0x625   : > { %v7979_v25 = vld [vmem:[%s11005_s7 + $0x74] sm:$0xf0]  ;;  %v8042_v35 = vld [vmem:[%s11005_s7 + $0x274] sm:$0xf]  ;;  %v7207_v5 = vor.u32 %v8026_v33, %v7204_v34 }
 0x626   : > { %4387 = vmatpush.bf16.msrb.mxu2 %v7171_v12  ;;  %v7139_v12 = vor.u32 %v8011_v13, %v7138_v15  ;;  %4443 = vmatpush.bf16.msra.mxu3 %v7239_v28  ;;  %v7333_v28 = vor.u32 %v7979_v25, %v7332_v20  ;;  %v7116_v15 = vld [vmem:[%s11005_s7 + $0x148] sm:$0xf0]  ;;  %v7412_v20 = vld [vmem:[%s11005_s7 + $0x110] sm:$0xf]  ;;  %v7255_v25 = vor.u32 %v8038_v11, %v7252_v19  ;;  %v7965_v11 = vld [vmem:[%s11005_s7 + $0x4] sm:$0xf0] }
 0x628   : > { %4402 = vmatpush.bf16.msra.mxu0 %v7227_v39  ;;  %4430 = vmatpush.bf16.msrb.mxu1 %v7167_v6  ;;  %v7186_v6 = vld [vmem:[%s11005_s7 + $0x1d0] sm:$0xf] }
 0x62a   : > { %4388 = vmatpush.bf16.msrb.mxu2 %v7163_v47  ;;  %4444 = vmatpush.bf16.msra.mxu3 %v7231_v45  ;;  %v7428_v45 = vld [vmem:[%s11005_s7 + $0x130] sm:$0xf] }
 0x62c   : > { %4403 = vmatpush.bf16.msra.mxu0 %v7219_v58  ;;  %4431 = vmatpush.bf16.msrb.mxu1 %v7159_v3  ;;  %v7187_v58 = vor.u32 %v8023_v7, %v7186_v6  ;;  %v8007_v3 = vld [vmem:[%s11005_s7 + $0x154] sm:$0xf0]  ;;  %v7977_v6 = vld [vmem:[%s11005_s7 + $0x64] sm:$0xf0]  ;;  %v8024_v7 = vld [vmem:[%s11005_s7 + $0x1e4] sm:$0xf] }
 0x62e   : > { %4389 = vmatpush.bf16.msrb.mxu2 %v7155_v41  ;;  %4445 = vmatpush.bf16.msra.mxu3 %v7223_v2 }
 0x630   : > { %4404 = vmatpush.bf16.msra.mxu0 %v7211_v22  ;;  %4432 = vmatpush.bf16.msrb.mxu1 %v7151_v60  ;;  %v7123_v22 = vor.u32 %v8007_v3, %v7122_v63  ;;  %v8001_v63 = vld [vmem:[%s11005_s7 + $0x124] sm:$0xf0]  ;;  %v7316_v3 = vld [vmem:[%s11005_s7 + $0x50] sm:$0xf] }
 0x632   : > { %4390 = vmatpush.bf16.msrb.mxu2 %v7147_v18  ;;  %v7127_v18 = vor.u32 %v8006_v16, %v7124_v62  ;;  %4446 = vmatpush.bf16.msra.mxu3 %v7215_v23  ;;  %v7975_v16 = vld [vmem:[%s11005_s7 + $0x54] sm:$0xf0] }
 0x633   : > { %v7317_v62 = vor.u32 %v7975_v16, %v7316_v3 }
 0x634   : > { %4405 = vmatpush.bf16.msra.mxu0 %v7203_v53  ;;  %4433 = vmatpush.bf16.msrb.mxu1 %v7143_v38 }
 0x636   : > { %4391 = vmatpush.bf16.msrb.mxu2 %v7139_v12  ;;  %4447 = vmatpush.bf16.msra.mxu3 %v7207_v5 }
 0x638   : > { %4406 = vmatpush.bf16.msra.mxu0 %v7195_v31  ;;  %v4003_v31 = vperm.slane %v10392_v24, 2  ;;  %v7284_v24 = vld [vmem:[%s11005_s7 + $0x10] sm:$0xf] }
 0x63a   : > { %4392 = vmatpush.bf16.msrb.mxu2 %v7131_v50  ;;  %v8003_v50 = vld [vmem:[%s11005_s7 + $0x134] sm:$0xf0] }
 0x63c   : > { %4407 = vmatpush.bf16.msra.mxu0 %v7187_v58 }
 0x63e   : > { %4393 = vmatpush.bf16.msrb.mxu2 %v7123_v22 }
 0x640   : > { %4408 = vmatpush.bf16.msra.mxu0 %v7179_v10 }
 0x644   : > { %4675 = vmatpush.bf16.msrb.mxu0 %v7333_v28  ;;  %v7973_v28 = vld [vmem:[%s11005_s7 + $0x44] sm:$0xf0] }
 0x680   : > { %v10272_v30 = vpop.f32.mrf.mxu1  ;;  %v10274_v32 = vpop.f32.mrf.mxu0 }
 0x685   : > { %v10300_v42 = vpop.f32.mrf.mxu3  ;;  %v10302_v43 = vpop.f32.mrf.mxu2 }
 0x686   : > { %v3660_v39 = vadd.f32 %v10302_v43, %v10300_v42  ;;  %v8008_v42 = vld [vmem:[%s11005_s7 + $0x164] sm:$0xf] }
 0x687   : > { %v7135_v51 = vor.u32 %v8008_v42, %v7132_v8  ;;  %v7324_v8 = vld [vmem:[%s11005_s7 + $0x60] sm:$0xf] }
 0x688   : > { %v10328_v54 = vpop.f32.mrf.mxu1  ;;  %v10330_v56 = vpop.f32.mrf.mxu0  ;;  %v7325_v59 = vor.u32 %v7977_v6, %v7324_v8 }
 0x689   : > { %4434 = vmatpush.bf16.msrb.mxu1 %v7135_v51  ;;  %v7196_v51 = vld [vmem:[%s11005_s7 + $0x1e8] sm:$0xf0] }
 0x68a   : > { %v7199_v2 = vor.u32 %v8024_v7, %v7196_v51  ;;  %4676 = vmatpush.bf16.msrb.mxu0 %v7325_v59 }
 0x68c   : > { %4448 = vmatpush.bf16.msra.mxu3 %v7199_v2  ;;  %v7292_v2 = vld [vmem:[%s11005_s7 + $0x20] sm:$0xf] }
 0x68d   : > { %v10356_v29 = vpop.f32.mrf.mxu3  ;;  %v10358_v57 = vpop.f32.mrf.mxu2  ;;  %4435 = vmatpush.bf16.msrb.mxu1 %v7127_v18 }
 0x68e   : > { %v3662_v60 = vadd.f32 %v10358_v57, %v10356_v29  ;;  %v8005_v29 = vld [vmem:[%s11005_s7 + $0x144] sm:$0xf0]  ;;  %v8004_v57 = vld [vmem:[%s11005_s7 + $0x144] sm:$0xf]  ;;  %4677 = vmatpush.bf16.msrb.mxu0 %v7317_v62 }
 0x68f   : > { %v7119_v55 = vor.u32 %v8004_v57, %v7116_v15  ;;  %v7191_v57 = vor.u32 %v8022_v4, %v7188_v17 }
 0x690   : > { %v10387_v26 = vpop.f32.mrf.mxu0  ;;  %v3938_v27 = vpop.f32.mrf.mxu1 }
 0x691   : > { %4436 = vmatpush.bf16.msrb.mxu1 %v7119_v55  ;;  %4449 = vmatpush.bf16.msra.mxu3 %v7191_v57 }
 0x695   : > { %v10424_v46 = vpop.f32.mrf.mxu2  ;;  %v3924_v47 = vpop.f32.mrf.mxu3 }
 0x696   : > { %v3925_v43 = vadd.f32 %v3924_v47, %v3660_v39  ;;  %v7268_v39 = vld [vmem:[%s11005_s7 + $0x278] sm:$0xf0]  ;;  %v3688_v47 = vadd.f32 %v10274_v32, %v10272_v30  ;;  %v3716_v30 = vadd.f32 %v10387_v26, %v10424_v46  ;;  %v7429_v32 = vor.u32 %v8003_v50, %v7428_v45  ;;  %v8040_v26 = vld [vmem:[%s11005_s7 + $0x264] sm:$0xf]  ;;  %v7260_v46 = vld [vmem:[%s11005_s7 + $0x268] sm:$0xf0] }
 0x697   : > { %v7997_v50 = vld [vmem:[%s11005_s7 + $0x104] sm:$0xf0] }
 0x698   : > { %v3939_v40 = vadd.f32 %v3938_v27, %v3925_v43  ;;  %v10450_v41 = vpop.f32.mrf.mxu0  ;;  %v3940_v36 = vpop.f32.mrf.mxu1  ;;  %v7114_v27 = vld [vmem:[%s11005_s7 + $0x140] sm:$0xf]  ;;  %v7271_v43 = vor.u32 %v8042_v35, %v7268_v39  ;;  %4707 = vmatpush.bf16.msra.mxu1 %v7429_v32  ;;  %v3690_v35 = vadd.f32 %v10330_v56, %v10328_v54  ;;  %v8020_v54 = vld [vmem:[%s11005_s7 + $0x1c4] sm:$0xf]  ;;  %v7180_v56 = vld [vmem:[%s11005_s7 + $0x1c8] sm:$0xf0] }
 0x699   : > { %v7115_v12 = vor.u32 %v8005_v29, %v7114_v27  ;;  %v7999_v27 = vld [vmem:[%s11005_s7 + $0x114] sm:$0xf0] }
 0x69a   : > { %v4007_v21 = vadd.f32 %v4001_v44, %v3939_v40  ;;  %v7420_v40 = vld [vmem:[%s11005_s7 + $0x120] sm:$0xf]  ;;  %v7413_v15 = vor.u32 %v7999_v27, %v7412_v20 }
 0x69b   : > { %4394 = vmatpush.bf16.msrb.mxu2 %v7115_v12  ;;  %v7421_v22 = vor.u32 %v8001_v63, %v7420_v40 }
 0x69c   : > { %vm4013_vm0 = vcmp.gt.f32.partialorder %v4007_v21, 0.0  ;;  %v4019_v61 = vmul.f32 0.5, %v4007_v21 }
 0x69d   : > { %v10490_v53 = vpop.f32.mrf.mxu2  ;;  %v3926_v14 = vpop.f32.mrf.mxu3  ;;  %4708 = vmatpush.bf16.msra.mxu1 %v7421_v22 }
 0x69e   : > { %v10501_v13 = vsel %vm4013_vm0, %v4007_v21, %v4019_v61  ;;  %v3927_v9 = vadd.f32 %v3926_v14, %v3662_v60  ;;  %v7308_v14 = vld [vmem:[%s11005_s7 + $0x40] sm:$0xf]  ;;  %v3718_v55 = vadd.f32 %v10450_v41, %v10490_v53  ;;  %v8036_v41 = vld [vmem:[%s11005_s7 + $0x244] sm:$0xf] }
 0x69f   : > { %v4037_v38 = vrot.slane %v10501_v13, 7  ;;  %4461 = vmatpush.bf16.msra.mxu2 %v7271_v43  ;;  %v7309_v34 = vor.u32 %v7973_v28, %v7308_v14  ;;  %v7404_v43 = vld [vmem:[%s11005_s7 + $0x100] sm:$0xf] }
 0x6a0   : > { %v3941_v48 = vadd.f32 %v3940_v36, %v3927_v9  ;;  %v3952_v49 = vpop.f32.mrf.mxu0  ;;  %v3980_v42 = vpop.f32.mrf.mxu1  ;;  %v7405_v51 = vor.u32 %v7997_v50, %v7404_v43 }
 0x6a1   : > { %4052 = vst [vmem:[#allocation2] sm:$0xfe] %v4037_v38  ;;  %v3953_v37 = vadd.f32 %v3952_v49, %v3688_v47  ;;  %v3981_v36 = vadd.f32 %v3980_v42, %v3716_v30  ;;  %4709 = vmatpush.bf16.msra.mxu1 %v7413_v15  ;;  %4678 = vmatpush.bf16.msrb.mxu0 %v7309_v34  ;;  %v7244_v42 = vld [vmem:[%s11005_s7 + $0x248] sm:$0xf0] }
 0x6a2   : > { %v4010_v58 = vadd.f32 %v4001_v44, %v3941_v48  ;;  %v7263_v44 = vor.u32 %v8040_v26, %v7260_v46  ;;  %v7183_v49 = vor.u32 %v8020_v54, %v7180_v56  ;;  %v7247_v7 = vor.u32 %v8036_v41, %v7244_v42  ;;  %v7334_v41 = vld [vmem:[%s11005_s7 + $0x78] sm:$0xf0] }
 0x6a4   : > { %vm4016_vm9 = vcmp.gt.f32.partialorder %v4010_v58, 0.0  ;;  %v4022_v21 = vmul.f32 0.5, %v4010_v58  ;;  %4462 = vmatpush.bf16.msra.mxu2 %v7263_v44  ;;  %4450 = vmatpush.bf16.msra.mxu3 %v7183_v49  ;;  %v7969_v44 = vld [vmem:[%s11005_s7 + $0x24] sm:$0xf0]  ;;  %v8002_v49 = vld [vmem:[%s11005_s7 + $0x134] sm:$0xf] }
 0x6a5   : > { %v3966_v18 = vpop.f32.mrf.mxu2  ;;  %v3994_v10 = vpop.f32.mrf.mxu3  ;;  %4710 = vmatpush.bf16.msra.mxu1 %v7405_v51  ;;  %v7293_v16 = vor.u32 %v7969_v44, %v7292_v2  ;;  %v7326_v2 = vld [vmem:[%s11005_s7 + $0x68] sm:$0xf0]  ;;  %v7992_v44 = vld [vmem:[%s11005_s7 + $0xe4] sm:$0xf] }
 0x6a6   : > { %v4028_v60 = vsel %vm4016_vm9, %v4010_v58, %v4022_v21  ;;  %v3967_v61 = vadd.f32 %v3966_v18, %v3953_v37  ;;  %v3995_v23 = vadd.f32 %v3994_v10, %v3981_v36  ;;  %v7300_v58 = vld [vmem:[%s11005_s7 + $0x30] sm:$0xf]  ;;  %v7971_v37 = vld [vmem:[%s11005_s7 + $0x34] sm:$0xf0]  ;;  %v7276_v10 = vld [vmem:[%s11005_s7] sm:$0xf] }
 0x6a7   : > { %v4040_v29 = vrot.slane %v4028_v60, 7  ;;  %v7301_v46 = vor.u32 %v7971_v37, %v7300_v58  ;;  %v7277_v19 = vor.u32 %v7965_v11, %v7276_v10  ;;  %v7382_v11 = vld [vmem:[%s11005_s7 + $0xd8] sm:$0xf0] }
 0x6a8   : > { %v4008_v9 = vadd.f32 %v4002_v0, %v3967_v61  ;;  %v4009_v12 = vadd.f32 %v4003_v31, %v3995_v23  ;;  %v3954_v33 = vpop.f32.mrf.mxu0  ;;  %v3982_v39 = vpop.f32.mrf.mxu1  ;;  %4463 = vmatpush.bf16.msra.mxu2 %v7255_v25  ;;  %v4058_v61 = vld [vmem:[#allocation2] sm:$0xff] }
 0x6a9   : > { %v4041_v5 = vsel %vm1543_vm11, %v4037_v38, %v4040_v29  ;;  %v3955_v48 = vadd.f32 %v3954_v33, %v3690_v35  ;;  %v3983_v38 = vadd.f32 %v3982_v39, %v3718_v55  ;;  %4679 = vmatpush.bf16.msrb.mxu0 %v7301_v46 }
 0x6aa   : > { %4055 = vst [vmem:[#allocation2 + $0x18] sm:$0x3f] %v4041_v5  ;;  %vm4014_vm10 = vcmp.gt.f32.partialorder %v4008_v9, 0.0  ;;  %v4020_v45 = vmul.f32 0.5, %v4008_v9  ;;  %vm4015_vm14 = vcmp.gt.f32.partialorder %v4009_v12, 0.0  ;;  %v4021_v47 = vmul.f32 0.5, %v4009_v12 }
 0x6ac   : > { %v4026_v53 = vsel %vm4014_vm10, %v4008_v9, %v4020_v45  ;;  %v4027_v13 = vsel %vm4015_vm14, %v4009_v12, %v4021_v47  ;;  %4464 = vmatpush.bf16.msra.mxu2 %v7247_v7  ;;  %v7396_v45 = vld [vmem:[%s11005_s7 + $0xf0] sm:$0xf]  ;;  %v7995_v47 = vld [vmem:[%s11005_s7 + $0xf4] sm:$0xf0] }
 0x6ad   : > { %v4038_v8 = vrot.slane %v4026_v53, 7  ;;  %v4039_v6 = vrot.slane %v4027_v13, 7  ;;  %v3968_v30 = vpop.f32.mrf.mxu2  ;;  %v3996_v32 = vpop.f32.mrf.mxu3  ;;  %4680 = vmatpush.bf16.msrb.mxu0 %v7293_v16  ;;  %v7994_v53 = vld [vmem:[%s11005_s7 + $0xf4] sm:$0xf]  ;;  %v7397_v58 = vor.u32 %v7995_v47, %v7396_v45  ;;  %v8000_v16 = vld [vmem:[%s11005_s7 + $0x124] sm:$0xf] }
 0x6ae   : > { %v3969_v59 = vadd.f32 %v3968_v30, %v3955_v48  ;;  %v3997_v26 = vadd.f32 %v3996_v32, %v3983_v38  ;;  %v7978_v48 = vld [vmem:[%s11005_s7 + $0x74] sm:$0xf]  ;;  %v7398_v38 = vld [vmem:[%s11005_s7 + $0xf8] sm:$0xf0]  ;;  %v7987_v47 = vld [vmem:[%s11005_s7 + $0xb4] sm:$0xf0] }
 0x6af   : > { %4053 = vst [vmem:[#allocation2 + $0x8] sm:$0xfe] %v4038_v8  ;;  %v7337_v37 = vor.u32 %v7978_v48, %v7334_v41  ;;  %v7970_v48 = vld [vmem:[%s11005_s7 + $0x34] sm:$0xf] }
 0x6b0   : > { %4054 = vst.msk [vmem:[#allocation2 + $0x10] sm:$0xfe] %vm1561_vm13, %v4039_v6  ;;  %v4011_v40 = vadd.f32 %v4002_v0, %v3969_v59  ;;  %v4012_v36 = vadd.f32 %v4003_v31, %v3997_v26  ;;  %v7967_v31 = vld [vmem:[%s11005_s7 + $0x14] sm:$0xf0]  ;;  %v7388_v59 = vld [vmem:[%s11005_s7 + $0xe0] sm:$0xf] }
 0x6b1   : > { %v7285_v4 = vor.u32 %v7967_v31, %v7284_v24  ;;  %v4061_v25 = vld [vmem:[#allocation2 + $0x18] sm:$0x7f]  ;;  %v7993_v26 = vld [vmem:[%s11005_s7 + $0xe4] sm:$0xf0]  ;;  %v7380_v31 = vld [vmem:[%s11005_s7 + $0xd0] sm:$0xf] }
 0x6b2   : > { %vm4017_vm15 = vcmp.gt.f32.partialorder %v4011_v40, 0.0  ;;  %v4023_v63 = vmul.f32 0.5, %v4011_v40  ;;  %vm4018_vm1 = vcmp.gt.f32.partialorder %v4012_v36, 0.0  ;;  %v4024_v3 = vmul.f32 0.5, %v4012_v36  ;;  %v7986_v41 = vld [vmem:[%s11005_s7 + $0xb4] sm:$0xf] }
 0x6b3   : > { %4681 = vmatpush.bf16.msrb.mxu0 %v7285_v4  ;;  %v7974_v4 = vld [vmem:[%s11005_s7 + $0x54] sm:$0xf] }
 0x6b4   : > { %v4029_v21 = vsel %vm4017_vm15, %v4011_v40, %v4023_v63  ;;  %v4030_v0 = vsel %vm4018_vm1, %v4012_v36, %v4024_v3  ;;  %v7401_v40 = vor.u32 %v7994_v53, %v7398_v38  ;;  %v7976_v36 = vld [vmem:[%s11005_s7 + $0x64] sm:$0xf]  ;;  %v7390_v3 = vld [vmem:[%s11005_s7 + $0xe8] sm:$0xf0]  ;;  %v7366_v53 = vld [vmem:[%s11005_s7 + $0xb8] sm:$0xf0] }
 0x6b5   : > { %v4042_v22 = vrot.slane %v4029_v21, 7  ;;  %v4044_v62 = vrot.slane %v4030_v0, 7  ;;  %v7422_v21 = vld [vmem:[%s11005_s7 + $0x128] sm:$0xf0]  ;;  %v7389_v0 = vor.u32 %v7993_v26, %v7388_v59  ;;  %v7329_v24 = vor.u32 %v7976_v36, %v7326_v2  ;;  %v7983_v59 = vld [vmem:[%s11005_s7 + $0x94] sm:$0xf0] }
 0x6b6   : > { %v4059_v20 = vld [vmem:[#allocation2 + $0x8] sm:$0xff]  ;;  %v7425_v10 = vor.u32 %v8000_v16, %v7422_v21  ;;  %v7286_v26 = vld [vmem:[%s11005_s7 + $0x18] sm:$0xf0]  ;;  %v7964_v16 = vld [vmem:[%s11005_s7 + $0x4] sm:$0xf] }
 0x6b7   : > { %v4043_v17 = vsel %vm1543_vm11, %v4038_v8, %v4042_v22  ;;  %v4045_v18 = vsel %vm1543_vm11, %v4039_v6, %v4044_v62  ;;  %v4060_v60 = vld [vmem:[#allocation2 + $0x10] sm:$0xff]  ;;  %4682 = vmatpush.bf16.msrb.mxu0 %v7277_v19  ;;  %v4064_v23 = vpack.c.bf16 %v4059_v20, %v4058_v61  ;;  %v7430_v6 = vld [vmem:[%s11005_s7 + $0x138] sm:$0xf0]  ;;  %v7991_v22 = vld [vmem:[%s11005_s7 + $0xd4] sm:$0xf0]  ;;  %v7393_v62 = vor.u32 %v7992_v44, %v7390_v3 }
 0x6b8   : > { %4056 = vst [vmem:[#allocation2 + $0x20] sm:$0x3f] %v4043_v17  ;;  %v4065_v14 = vpack.c.bf16 %v4060_v60, %v4060_v60  ;;  %v7433_v63 = vor.u32 %v8002_v49, %v7430_v6  ;;  %v7318_v17 = vld [vmem:[%s11005_s7 + $0x58] sm:$0xf0]  ;;  %v7998_v19 = vld [vmem:[%s11005_s7 + $0x114] sm:$0xf]  ;;  %v7381_v60 = vor.u32 %v7991_v22, %v7380_v31 }
 0x6b9   : > { %4057 = vst.msk [vmem:[#allocation2 + $0x28] sm:$0x3f] %vm1565_vm4, %v4045_v18  ;;  %v4152_v15 = vunpack.c.l.b16 %v4064_v23  ;;  %v4153_v12 = vunpack.c.h.b16 %v4064_v23  ;;  %v7990_v18 = vld [vmem:[%s11005_s7 + $0xd4] sm:$0xf]  ;;  %v7414_v20 = vld [vmem:[%s11005_s7 + $0x118] sm:$0xf0]  ;;  %v7321_v61 = vor.u32 %v7974_v4, %v7318_v17 }
 0x6ba   : > { %v4154_v34 = vunpack.c.l.b16 %v4065_v14  ;;  %v7372_v23 = vld [vmem:[%s11005_s7 + $0xc0] sm:$0xf]  ;;  %v7972_v14 = vld [vmem:[%s11005_s7 + $0x44] sm:$0xf]  ;;  %v7981_v3 = vld [vmem:[%s11005_s7 + $0x84] sm:$0xf0] }
 0x6bb   : > { %v7356_v49 = vld [vmem:[%s11005_s7 + $0xa0] sm:$0xf]  ;;  %v7984_v6 = vld [vmem:[%s11005_s7 + $0xa4] sm:$0xf]  ;;  %v7278_v21 = vld [vmem:[%s11005_s7 + $0x8] sm:$0xf0] }
 0x6bc   : > { %v7340_v44 = vld [vmem:[%s11005_s7 + $0x80] sm:$0xf]  ;;  %v7281_v22 = vor.u32 %v7964_v16, %v7278_v21 }
 0x6bd   : > { %v7341_v31 = vor.u32 %v7981_v3, %v7340_v44 }
 0x6bf   : > { %v4062_v27 = vld [vmem:[#allocation2 + $0x20] sm:$0x7f] }
 0x6c0   : > { %v4066_v28 = vpack.c.bf16 %v4062_v27, %v4061_v25  ;;  %v4063_v29 = vld [vmem:[#allocation2 + $0x28] sm:$0x7f]  ;;  %v7385_v27 = vor.u32 %v7990_v18, %v7382_v11 }
 0x6c1   : > { %v4067_v57 = vpack.c.bf16 %v4063_v29, %v4063_v29  ;;  %v7989_v25 = vld [vmem:[%s11005_s7 + $0xc4] sm:$0xf0]  ;;  %v7988_v29 = vld [vmem:[%s11005_s7 + $0xc4] sm:$0xf] }
 0x6c2   : > { %v4155_v9 = vunpack.c.l.b16 %v4066_v28  ;;  %v4156_v33 = vunpack.c.h.b16 %v4066_v28  ;;  %v7310_v28 = vld [vmem:[%s11005_s7 + $0x48] sm:$0xf0] }
 0x6c3   : > { %v4157_v35 = vunpack.c.l.b16 %v4067_v57  ;;  %v7417_v57 = vor.u32 %v7998_v19, %v7414_v20  ;;  %v8051_v20 = vld [vmem:[%s11007_s9 + $0x38] sm:$0xff] }
 0x6c4   : > { %v10646_v55 = vpack.c.b16 %v4155_v9, %v4152_v15  ;;  %v10648_v5 = vpack.c.b16 %v4156_v33, %v4153_v12  ;;  %v7374_v15 = vld [vmem:[%s11005_s7 + $0xc8] sm:$0xf0]  ;;  %v7996_v9 = vld [vmem:[%s11005_s7 + $0x104] sm:$0xf]  ;;  %v7373_v33 = vor.u32 %v7989_v25, %v7372_v23 }
 0x6c5   : > { %v10650_v39 = vpack.c.b16 %v4157_v35, %v4154_v34  ;;  %v7406_v12 = vld [vmem:[%s11005_s7 + $0x108] sm:$0xf0]  ;;  %v7313_v34 = vor.u32 %v7972_v14, %v7310_v28  ;;  %v7364_v35 = vld [vmem:[%s11005_s7 + $0xb0] sm:$0xf]  ;;  %v7377_v45 = vor.u32 %v7988_v29, %v7374_v15  ;;  %v8048_v29 = vld [vmem:[%s11007_s9 + $0x20] sm:$0xff] }
 0x6c6   : > { %v4164_v54 = vshll.u32 %v10646_v55, 16  ;;  %v4171_v56 = vshll.u32 %v10648_v5, 16  ;;  %v4162_v42 = vshrl.u32 %v10646_v55, 16  ;;  %v4169_v50 = vshrl.u32 %v10648_v5, 16  ;;  %v8049_v23 = vld [vmem:[%s11007_s9 + $0x28] sm:$0xff]  ;;  %v8062_v14 = vld [vmem:[%s11007_s9 + $0x90] sm:$0xff] }
 0x6c7   : > { %v4178_v13 = vshll.u32 %v10650_v39, 16  ;;  %v4176_v30 = vshrl.u32 %v10650_v39, 16  ;;  %v8047_v15 = vld [vmem:[%s11007_s9 + $0x18] sm:$0xff] }
 0x6c8   : > { %v4166_v43 = vrot.slane %v4164_v54, 1  ;;  %v4173_v8 = vrot.slane %v4171_v56, 1  ;;  %v7302_v54 = vld [vmem:[%s11005_s7 + $0x38] sm:$0xf0]  ;;  %v7409_v56 = vor.u32 %v7996_v9, %v7406_v12 }
 0x6c9   : > { %v4180_v32 = vrot.slane %v4178_v13, 1  ;;  %v7365_v13 = vor.u32 %v7987_v47, %v7364_v35  ;;  %v7305_v38 = vor.u32 %v7970_v48, %v7302_v54  ;;  %v8055_v9 = vld [vmem:[%s11007_s9 + $0x58] sm:$0xff]  ;;  %v8054_v47 = vld [vmem:[%s11007_s9 + $0x50] sm:$0xff] }
 0x6ca   : > { %v4167_v7 = vor.u32 %v4166_v43, %v4162_v42  ;;  %v10682_v51 = vor.u32 %v4173_v8, %v4169_v50  ;;  %v7369_v42 = vor.u32 %v7986_v41, %v7366_v53  ;;  %v7985_v43 = vld [vmem:[%s11005_s7 + $0xa4] sm:$0xf0]  ;;  %v7968_v50 = vld [vmem:[%s11005_s7 + $0x24] sm:$0xf]  ;;  %v7294_v8 = vld [vmem:[%s11005_s7 + $0x28] sm:$0xf0] }
 0x6cb   : > { %v10690_v46 = vor.u32 %v4180_v32, %v4176_v30  ;;  %v7358_v30 = vld [vmem:[%s11005_s7 + $0xa8] sm:$0xf0]  ;;  %v7357_v32 = vor.u32 %v7985_v43, %v7356_v49  ;;  %v8067_v41 = vld [vmem:[%s11007_s9 + $0xb8] sm:$0xff]  ;;  %v8066_v49 = vld [vmem:[%s11007_s9 + $0xb0] sm:$0xff] }
 0x6cc   : > { %4395 = vmatmul.bf16.vlgmr.msrb.gmra.mxu2 %v4167_v7  ;;  %4409 = vmatmul.bf16.vlgmr.msra.gmra.mxu0 %v10682_v51  ;;  %v8058_v43 = vld [vmem:[%s11007_s9 + $0x70] sm:$0xff] }
 0x6cd   : > { %7272 = vmatmul.msk.bf16.vlgmr.msrb.gmra.mxu3 %vm1138_vm8, %v10690_v46  ;;  %4437 = vmatmul.bf16.vlgmr.msrb.gmra.mxu1 %v4167_v7  ;;  %v7297_v7 = vor.u32 %v7968_v50, %v7294_v8  ;;  %v4759_v50 = vld [vmem:[%s11006_s8] sm:$0x3] }
 0x6ce   : > { %4689 = vmatpush.bf16.msrb.mxu2 %v7397_v58  ;;  %4717 = vmatpush.bf16.msrb.mxu3 %v7337_v37  ;;  %v7348_v58 = vld [vmem:[%s11005_s7 + $0x90] sm:$0xf]  ;;  %v7361_v37 = vor.u32 %v7984_v6, %v7358_v30  ;;  %v8044_v30 = vld [vmem:[%s11007_s9] sm:$0xff]  ;;  %v4762_v3 = vperm.slane %v4759_v50, 1 }
 0x6cf   : > { %4731 = vmatpush.bf16.msrb.mxu1 %v7401_v40  ;;  %4749 = vmatpush.bf16.msra.mxu0 %v7433_v63  ;;  %v7350_v40 = vld [vmem:[%s11005_s7 + $0x98] sm:$0xf0]  ;;  %v7349_v36 = vor.u32 %v7983_v59, %v7348_v58 }
 0x6d2   : > { %4690 = vmatpush.bf16.msrb.mxu2 %v7389_v0  ;;  %4718 = vmatpush.bf16.msrb.mxu3 %v7329_v24  ;;  %v7980_v0 = vld [vmem:[%s11005_s7 + $0x84] sm:$0xf]  ;;  %v7342_v24 = vld [vmem:[%s11005_s7 + $0x88] sm:$0xf0] }
 0x6d3   : > { %4732 = vmatpush.bf16.msrb.mxu1 %v7393_v62  ;;  %4750 = vmatpush.bf16.msra.mxu0 %v7425_v10  ;;  %v7345_v62 = vor.u32 %v7980_v0, %v7342_v24 }
 0x6d6   : > { %4691 = vmatpush.bf16.msrb.mxu2 %v7381_v60  ;;  %4719 = vmatpush.bf16.msrb.mxu3 %v7321_v61 }
 0x6d7   : > { %4733 = vmatpush.bf16.msrb.mxu1 %v7385_v27  ;;  %4751 = vmatpush.bf16.msra.mxu0 %v7417_v57  ;;  %v8061_v57 = vld [vmem:[%s11007_s9 + $0x88] sm:$0xff] }
 0x6da   : > { %4692 = vmatpush.bf16.msrb.mxu2 %v7373_v33  ;;  %4720 = vmatpush.bf16.msrb.mxu3 %v7313_v34  ;;  %v8060_v34 = vld [vmem:[%s11007_s9 + $0x80] sm:$0xff] }
 0x6db   : > { %4734 = vmatpush.bf16.msrb.mxu1 %v7377_v45  ;;  %4752 = vmatpush.bf16.msra.mxu0 %v7409_v56  ;;  %v8046_v45 = vld [vmem:[%s11007_s9 + $0x10] sm:$0xff]  ;;  %v8059_v56 = vld [vmem:[%s11007_s9 + $0x78] sm:$0xff] }
 0x6dc   : > { %7273 = vmatmul.msk.bf16.vlgmr.msra.gmra.mxu2 %vm1138_vm8, %v10690_v46  ;;  %4683 = vmatmul.bf16.vlgmr.msrb.gmra.mxu0 %v10646_v55  ;;  %v7982_v46 = vld [vmem:[%s11005_s7 + $0x94] sm:$0xf] }
 0x6dd   : > { %4451 = vmatmul.bf16.vlgmr.msra.gmra.mxu3 %v10682_v51  ;;  %7434 = vmatmul.msk.bf16.vlgmr.msra.gmra.mxu1 %vm1138_vm8, %v10650_v39  ;;  %v7966_v51 = vld [vmem:[%s11005_s7 + $0x14] sm:$0xf]  ;;  %v7353_v63 = vor.u32 %v7982_v46, %v7350_v40  ;;  %v4761_v46 = vperm.slane %v4759_v50, 0 }
 0x6de   : > { %4693 = vmatpush.bf16.msrb.mxu2 %v7365_v13  ;;  %4721 = vmatpush.bf16.msrb.mxu3 %v7305_v38  ;;  %v7289_v2 = vor.u32 %v7966_v51, %v7286_v26  ;;  %v8045_v13 = vld [vmem:[%s11007_s9 + $0x8] sm:$0xff] }
 0x6df   : > { %4735 = vmatpush.bf16.msrb.mxu1 %v7369_v42  ;;  %v8053_v38 = vld [vmem:[%s11007_s9 + $0x48] sm:$0xff]  ;;  %4969 = vmatpush.bf16.msrb.mxu0 %v8067_v41 }
 0x6e2   : > { %4694 = vmatpush.bf16.msrb.mxu2 %v7357_v32  ;;  %4722 = vmatpush.bf16.msrb.mxu3 %v7297_v7  ;;  %v8052_v32 = vld [vmem:[%s11007_s9 + $0x40] sm:$0xff] }
 0x6e3   : > { %4736 = vmatpush.bf16.msrb.mxu1 %v7361_v37  ;;  %4970 = vmatpush.bf16.msrb.mxu0 %v8066_v49  ;;  %v8065_v37 = vld [vmem:[%s11007_s9 + $0xa8] sm:$0xff] }
 0x6e6   : > { %4695 = vmatpush.bf16.msrb.mxu2 %v7349_v36  ;;  %4723 = vmatpush.bf16.msrb.mxu3 %v7289_v2  ;;  %v8057_v36 = vld [vmem:[%s11007_s9 + $0x68] sm:$0xff] }
 0x6e7   : > { %4737 = vmatpush.bf16.msrb.mxu1 %v7353_v63  ;;  %4971 = vmatpush.bf16.msrb.mxu0 %v8065_v37 }
 0x6ea   : > { %4696 = vmatpush.bf16.msrb.mxu2 %v7341_v31  ;;  %4724 = vmatpush.bf16.msrb.mxu3 %v7281_v22  ;;  %v8056_v31 = vld [vmem:[%s11007_s9 + $0x60] sm:$0xff] }
 0x6eb   : > { %4738 = vmatpush.bf16.msrb.mxu1 %v7345_v62  ;;  %v8064_v22 = vld [vmem:[%s11007_s9 + $0xa0] sm:$0xff] }
 0x6ec   : > { %7435 = vmatmul.msk.bf16.vlgmr.msra.gmra.mxu0 %vm1138_vm8, %v10650_v39 }
 0x6ed   : > { %4697 = vmatmul.bf16.vlgmr.msrb.gmra.mxu2 %v10648_v5  ;;  %4725 = vmatmul.bf16.vlgmr.msrb.gmra.mxu3 %v10646_v55  ;;  %v8050_v55 = vld [vmem:[%s11007_s9 + $0x30] sm:$0xff] }
 0x6ee   : > { %4739 = vmatmul.bf16.vlgmr.msrb.gmra.mxu1 %v10648_v5  ;;  %5054 = vmatpush.bf16.msra.mxu3 %v8051_v20  ;;  %v8063_v5 = vld [vmem:[%s11007_s9 + $0x98] sm:$0xff] }
 0x6ef   : > { %4951 = vmatpush.bf16.msra.mxu2 %v8063_v5  ;;  %5072 = vmatpush.bf16.msra.mxu1 %v8055_v9 }
 0x6f0   : > { %4972 = vmatpush.bf16.msrb.mxu0 %v8064_v22  ;;  %v8076_v22 = vld [vmem:[%s11009_s11 + $0x40] sm:$0xff] }
 0x6f2   : > { %5055 = vmatpush.bf16.msra.mxu3 %v8050_v55 }
 0x6f3   : > { %4952 = vmatpush.bf16.msra.mxu2 %v8062_v14  ;;  %5073 = vmatpush.bf16.msra.mxu1 %v8054_v47 }
 0x6f6   : > { %5056 = vmatpush.bf16.msra.mxu3 %v8049_v23 }
 0x6f7   : > { %4953 = vmatpush.bf16.msra.mxu2 %v8061_v57  ;;  %5074 = vmatpush.bf16.msra.mxu1 %v8053_v38 }
 0x6fa   : > { %5057 = vmatpush.bf16.msra.mxu3 %v8048_v29 }
 0x6fb   : > { %4954 = vmatpush.bf16.msra.mxu2 %v8060_v34  ;;  %5075 = vmatpush.bf16.msra.mxu1 %v8052_v32 }
 0x6fe   : > { %5058 = vmatpush.bf16.msra.mxu3 %v8047_v15 }
 0x6ff   : > { %4955 = vmatpush.bf16.msra.mxu2 %v8059_v56 }
 0x702   : > { %5059 = vmatpush.bf16.msra.mxu3 %v8046_v45 }
 0x703   : > { %4956 = vmatpush.bf16.msra.mxu2 %v8058_v43 }
 0x706   : > { %5060 = vmatpush.bf16.msra.mxu3 %v8045_v13 }
 0x707   : > { %4957 = vmatpush.bf16.msra.mxu2 %v8057_v36  ;;  %v8072_v36 = vld [vmem:[%s11009_s11 + $0x20] sm:$0xff] }
 0x70a   : > { %5061 = vmatpush.bf16.msra.mxu3 %v8044_v30 }
 0x70b   : > { %4958 = vmatpush.bf16.msra.mxu2 %v8056_v31 }
 0x749   : > { %v4410_v17 = vpop.f32.mrf.mxu0 }
 0x74a   : > { %v4438_v4 = vpop.f32.mrf.mxu1 }
 0x74f   : > { %v4396_v18 = vpop.f32.mrf.mxu2 }
 0x750   : > { %v4424_v10 = vpop.f32.mrf.mxu3  ;;  %v4411_v48 = vadd.f32 %v4410_v17, %v4396_v18 }
 0x751   : > { %v4412_v19 = vpop.f32.mrf.mxu0 }
 0x752   : > { %v10844_v11 = vpop.f32.mrf.mxu1  ;;  %v4425_v42 = vadd.f32 %v4424_v10, %v4411_v48 }
 0x757   : > { %v4398_v60 = vpop.f32.mrf.mxu2 }
 0x758   : > { %v10849_v39 = vpop.f32.mrf.mxu3  ;;  %v4413_v59 = vadd.f32 %v4412_v19, %v4398_v60 }
 0x759   : > { %v4684_v25 = vpop.f32.mrf.mxu0 }
 0x75a   : > { %v4712_v61 = vpop.f32.mrf.mxu1  ;;  %v4685_v8 = vadd.f32 %v4684_v25, %v4425_v42  ;;  %v4427_v21 = vadd.f32 %v10849_v39, %v4413_v59 }
 0x75f   : > { %v4466_v27 = vpop.f32.mrf.mxu2 }
 0x760   : > { %v4452_v28 = vpop.f32.mrf.mxu3 }
 0x761   : > { %v4686_v54 = vpop.f32.mrf.mxu0  ;;  %v4453_v53 = vadd.f32 %v4452_v28, %v4438_v4 }
 0x762   : > { %v10875_v12 = vpop.f32.mrf.mxu1  ;;  %v4687_v62 = vadd.f32 %v4686_v54, %v4427_v21  ;;  %v8069_v21 = vld [vmem:[%s11009_s11 + $0x8] sm:$0xff] }
 0x763   : > { %v4467_v6 = vadd.f32 %v4466_v27, %v4453_v53 }
 0x767   : > { %v4468_v33 = vpop.f32.mrf.mxu2 }
 0x768   : > { %v4454_v35 = vpop.f32.mrf.mxu3 }
 0x769   : > { %v4754_v2 = vpop.f32.mrf.mxu0  ;;  %v4455_v16 = vadd.f32 %v4454_v35, %v10844_v11 }
 0x76b   : > { %v4740_v51 = vpop.f32.mrf.mxu1  ;;  %v4469_v18 = vadd.f32 %v4468_v33, %v4455_v16  ;;  %v8078_v16 = vld [vmem:[%s11009_s11 + $0x50] sm:$0xff] }
 0x770   : > { %v4698_v7 = vpop.f32.mrf.mxu2  ;;  %v4726_v58 = vpop.f32.mrf.mxu3 }
 0x771   : > { %v4699_v26 = vadd.f32 %v4698_v7, %v4685_v8  ;;  %v4727_v40 = vadd.f32 %v4726_v58, %v4467_v6  ;;  %v4756_v14 = vpop.f32.mrf.mxu0 }
 0x773   : > { %v4713_v44 = vadd.f32 %v4712_v61, %v4699_v26  ;;  %v4741_v63 = vadd.f32 %v4740_v51, %v4727_v40  ;;  %v4742_v61 = vpop.f32.mrf.mxu1  ;;  %v8074_v26 = vld [vmem:[%s11009_s11 + $0x30] sm:$0xff]  ;;  %v8081_v40 = vld [vmem:[%s11009_s11 + $0x68] sm:$0xff] }
 0x774   : > { %5254 = vmatpush.bf16.msrb.mxu2 %v8074_v26  ;;  %5196 = vmatpush.bf16.msra.mxu0 %v8081_v40  ;;  %v2955_v26 = vsub.f32 %v9790_v52, %v10027_v1 }
 0x775   : > { %v4765_v0 = vadd.f32 %v4761_v46, %v4713_v44  ;;  %v4755_v24 = vadd.f32 %v4754_v2, %v4741_v63  ;;  %v8080_v2 = vld [vmem:[%s11009_s11 + $0x60] sm:$0xff]  ;;  %v8071_v44 = vld [vmem:[%s11009_s11 + $0x18] sm:$0xff] }
 0x776   : > { %v8079_v63 = vld [vmem:[%s11009_s11 + $0x58] sm:$0xff] }
 0x777   : > { %vm4769_vm4 = vcmp.gt.f32.partialorder %v4765_v0, 0.0  ;;  %v4773_v4 = vmul.f32 0.5, %v4765_v0  ;;  %v4766_v17 = vadd.f32 %v4762_v3, %v4755_v24  ;;  %v8068_v24 = vld [vmem:[%s11009_s11] sm:$0xff] }
 0x778   : > { %v4700_v10 = vpop.f32.mrf.mxu2  ;;  %v4728_v11 = vpop.f32.mrf.mxu3  ;;  %5197 = vmatpush.bf16.msra.mxu0 %v8080_v2 }
 0x779   : > { %v4777_v19 = vsel %vm4769_vm4, %v4765_v0, %v4773_v4  ;;  %vm4770_vm0 = vcmp.gt.f32.partialorder %v4766_v17, 0.0  ;;  %v4774_v20 = vmul.f32 0.5, %v4766_v17  ;;  %v4701_v60 = vadd.f32 %v4700_v10, %v4687_v62  ;;  %v8077_v0 = vld [vmem:[%s11009_s11 + $0x48] sm:$0xff]  ;;  %v8075_v10 = vld [vmem:[%s11009_s11 + $0x38] sm:$0xff] }
 0x77a   : > { %v4785_v39 = vrot.slane %v4777_v19, 7  ;;  %v4729_v55 = vadd.f32 %v4728_v11, %v4469_v18  ;;  %v8098_v19 = vld [vmem:[%s11008_s10] ss:$0 sm:$0xff] }
 0x77b   : > { %v4778_v5 = vsel %vm4770_vm0, %v4766_v17, %v4774_v20  ;;  %v4715_v23 = vadd.f32 %v10875_v12, %v4701_v60 }
 0x77c   : > { %4795 = vst [vmem:[#allocation3] sm:$0xfe] %v4785_v39  ;;  %v4786_v25 = vrot.slane %v4778_v5, 7  ;;  %v4743_v27 = vadd.f32 %v4742_v61, %v4729_v55  ;;  %5198 = vmatpush.bf16.msra.mxu0 %v8079_v63 }
 0x77d   : > { %v4767_v28 = vadd.f32 %v4761_v46, %v4715_v23  ;;  %v8073_v46 = vld [vmem:[%s11009_s11 + $0x28] sm:$0xff] }
 0x77e   : > { %4796 = vst.msk [vmem:[#allocation3 + $0x8] sm:$0xfe] %vm1561_vm13, %v4786_v25  ;;  %v4757_v29 = vadd.f32 %v4756_v14, %v4743_v27  ;;  %5255 = vmatpush.bf16.msrb.mxu2 %v8073_v46  ;;  %vm5443_vm13 = vcmask 195712  }
 0x77f   : > { %vm4771_vm9 = vcmp.gt.f32.partialorder %v4767_v28, 0.0  ;;  %v4775_v57 = vmul.f32 0.5, %v4767_v28 }
 0x780   : > { %v4768_v15 = vadd.f32 %v4762_v3, %v4757_v29  ;;  %v8070_v3 = vld [vmem:[%s11009_s11 + $0x10] sm:$0xff]  ;;  %5199 = vmatpush.bf16.msra.mxu0 %v8078_v16 }
 0x781   : > { %v4779_v9 = vsel %vm4771_vm9, %v4767_v28, %v4775_v57 }
 0x782   : > { %v4787_v33 = vrot.slane %v4779_v9, 7  ;;  %vm4772_vm10 = vcmp.gt.f32.partialorder %v4768_v15, 0.0  ;;  %v4776_v34 = vmul.f32 0.5, %v4768_v15  ;;  %5256 = vmatpush.bf16.msrb.mxu2 %v8072_v36 }
 0x783   : > { %v4799_v54 = vld [vmem:[#allocation3] sm:$0xff] }
 0x784   : > { %v4788_v35 = vsel %vm1543_vm11, %v4785_v39, %v4787_v33  ;;  %v4780_v45 = vsel %vm4772_vm10, %v4768_v15, %v4776_v34  ;;  %5200 = vmatpush.bf16.msra.mxu0 %v8077_v0  ;;  %v5098_v15 = vld [vmem:[#allocation4 + $0x10] sm:$0x1] }
 0x785   : > { %4797 = vst [vmem:[#allocation3 + $0x10] sm:$0x7f] %v4788_v35  ;;  %v4789_v12 = vrot.slane %v4780_v45, 7  ;;  %v4800_v48 = vld [vmem:[#allocation3 + $0x8] sm:$0xff]  ;;  %v5101_v33 = vpack.c.bf16 %v5098_v15, %v5098_v15 }
 0x786   : > { %v4803_v56 = vpack.c.bf16 %v4800_v48, %v4799_v54  ;;  %5257 = vmatpush.bf16.msrb.mxu2 %v8071_v44 }
 0x787   : > { %v4790_v47 = vsel %vm1543_vm11, %v4786_v25, %v4789_v12  ;;  %v5135_v35 = vunpack.c.l.b16 %v5101_v33 }
 0x788   : > { %4798 = vst.msk [vmem:[#allocation3 + $0x18] sm:$0x7f] %vm2308_vm12, %v4790_v47  ;;  %v4855_v38 = vunpack.c.l.b16 %v4803_v56  ;;  %v4856_v49 = vunpack.c.h.b16 %v4803_v56  ;;  %5201 = vmatpush.bf16.msra.mxu0 %v8076_v22  ;;  %vm5449_vm12 = vcmask 261312  }
 0x789   : > { %v5137_v48 = vpack.c.b16 %v5135_v35, %v5135_v35 }
 0x78a   : > { %5258 = vmatpush.bf16.msrb.mxu2 %v8070_v3 }
 0x78c   : > { %v4801_v41 = vld [vmem:[#allocation3 + $0x10] sm:$0xff]  ;;  %5202 = vmatpush.bf16.msra.mxu0 %v8075_v10 }
 0x78e   : > { %5259 = vmatpush.bf16.msrb.mxu2 %v8069_v21 }
 0x78f   : > { %v4802_v53 = vld [vmem:[#allocation3 + $0x18] sm:$0xff] }
 0x790   : > { %v4804_v13 = vpack.c.bf16 %v4802_v53, %v4801_v41  ;;  %v5146_v53 = vshll.u32 %v5137_v48, 16 }
 0x792   : > { %v4857_v42 = vunpack.c.l.b16 %v4804_v13  ;;  %v4858_v43 = vunpack.c.h.b16 %v4804_v13  ;;  %5260 = vmatpush.bf16.msrb.mxu2 %v8068_v24 }
 0x794   : > { %v4859_v50 = vpack.c.b16 %v4857_v42, %v4855_v38  ;;  %v4860_v8 = vpack.c.b16 %v4858_v43, %v4856_v49  ;;  %v5148_v42 = vrot.slane %v5146_v53, 1 }
 0x796   : > { %5062 = vmatmul.bf16.vlgmr.msra.gmra.mxu3 %v4859_v50  ;;  %7557 = vmatmul.msk.bf16.vlgmr.msra.gmra.mxu1 %vm1138_vm8, %v4860_v8  ;;  %v4864_v6 = vshll.u32 %v4859_v50, 16  ;;  %v4871_v30 = vshll.u32 %v4860_v8, 16  ;;  %v4862_v32 = vshrl.u32 %v4859_v50, 16  ;;  %v4869_v58 = vshrl.u32 %v4860_v8, 16 }
 0x798   : > { %v4866_v7 = vrot.slane %v4864_v6, 1  ;;  %v4873_v37 = vrot.slane %v4871_v30, 1  ;;  %v8099_v6 = vld [vmem:[%s11010_s12] ss:$0 sm:$0xff] }
 0x79a   : > { %v4867_v59 = vor.u32 %v4866_v7, %v4862_v32  ;;  %v4874_v51 = vor.u32 %v4873_v37, %v4869_v58 }
 0x79c   : > { %4959 = vmatmul.bf16.vlgmr.msra.gmra.mxu2 %v4867_v59  ;;  %7508 = vmatmul.msk.bf16.vlgmr.msrb.gmra.mxu0 %vm1138_vm8, %v4874_v51 }
 0x813   : > { %v5077_v18 = vpop.f32.mrf.mxu1 }
 0x819   : > { %v4974_v31 = vpop.f32.mrf.mxu0  ;;  %v5063_v62 = vpop.f32.mrf.mxu3 }
 0x81b   : > { %v5079_v14 = vpop.f32.mrf.mxu1 }
 0x81f   : > { %v4960_v4 = vpop.f32.mrf.mxu2 }
 0x820   : > { %v4975_v17 = vadd.f32 %v4974_v31, %v4960_v4 }
 0x821   : > { %v4976_v39 = vpop.f32.mrf.mxu0  ;;  %v5065_v23 = vpop.f32.mrf.mxu3 }
 0x822   : > { %v5064_v11 = vadd.f32 %v5063_v62, %v4975_v17 }
 0x824   : > { %v5078_v20 = vadd.f32 %v5077_v18, %v5064_v11 }
 0x826   : > { %v5086_v60 = vadd.f32 %v8098_v19, %v5078_v20 }
 0x827   : > { %v4962_v55 = vpop.f32.mrf.mxu2 }
 0x828   : > { %vm5088_vm8 = vcmp.gt.f32.partialorder %v5086_v60, 0.0  ;;  %v5090_v5 = vmul.f32 0.5, %v5086_v60  ;;  %v4977_v61 = vadd.f32 %v4976_v39, %v4962_v55 }
 0x82a   : > { %v5092_v25 = vsel %vm5088_vm8, %v5086_v60, %v5090_v5  ;;  %v5066_v27 = vadd.f32 %v5065_v23, %v4977_v61 }
 0x82b   : > { %5094 = vst.msk [vmem:[#allocation4 + $0x1] sm:$0xff] %vm670_vm3, %v5092_v25 }
 0x82c   : > { %v5080_v28 = vadd.f32 %v5079_v14, %v5066_v27 }
 0x82e   : > { %v5087_v29 = vadd.f32 %v8098_v19, %v5080_v28 }
 0x830   : > { %vm5089_vm11 = vcmp.gt.f32.partialorder %v5087_v29, 0.0  ;;  %v5091_v57 = vmul.f32 0.5, %v5087_v29 }
 0x832   : > { %v5093_v9 = vsel %vm5089_vm11, %v5087_v29, %v5091_v57  ;;  %v5096_v34 = vld [vmem:[#allocation4] sm:$0xff] }
 0x833   : > { %5095 = vst.msk [vmem:[#allocation4 + $0x9] sm:$0x7f] %vm2607_vm2, %v5093_v9  ;;  %v5099_v45 = vpack.c.bf16 %v5096_v34, %v5096_v34 }
 0x835   : > { %v5133_v54 = vunpack.c.l.b16 %v5099_v45 }
 0x83a   : > { %v5097_v12 = vld [vmem:[#allocation4 + $0x8] sm:$0xff] }
 0x83b   : > { %v5100_v47 = vpack.c.bf16 %v5097_v12, %v5097_v12 }
 0x83d   : > { %v5134_v56 = vunpack.c.l.b16 %v5100_v47 }
 0x83f   : > { %v5136_v41 = vpack.c.b16 %v5134_v56, %v5133_v54 }
 0x841   : > { %7629 = vmatmul.msk.bf16.vlgmr.msrb.gmra.mxu2 %vm670_vm3, %v5136_v41  ;;  %v5141_v13 = vshll.u32 %v5136_v41, 16  ;;  %v5139_v38 = vshrl.u32 %v5136_v41, 16 }
 0x843   : > { %v5143_v49 = vrot.slane %v5141_v13, 1 }
 0x845   : > { %v5144_v43 = vor.u32 %v5143_v49, %v5139_v38 }
 0x847   : > { %v5149_v50 = vsel %vm2652_vm5, %v5144_v43, %v5148_v42 }
 0x848   : > { %7600 = vmatmul.msk.bf16.vlgmr.msra.gmra.mxu0 %vm670_vm3, %v5149_v50  ;;  %vm2961_vm3 = vcmask 130112  }
 0x8c4   : > { %v5262_v8 = vpop.f32.mrf.mxu2 }
 0x8c5   : > { %v5204_v30 = vpop.f32.mrf.mxu0 }
 0x8c6   : > { %v5263_v32 = vadd.f32 %v5262_v8, %v5204_v30 }
 0x8c8   : > { %v5271_v7 = vadd.f32 %v8099_v6, %v5263_v32 }
 0x8ca   : > { %5328 = vxpose.xlu1.b32.start.end [1/1] (short) (narrow) %v5271_v7, 8  ;;  %5273 = vxpose.xlu2.b32.start [1/2] (short) (narrow) %v5271_v7, 8 }
 0x8cb   : > { %5433 = vmatpush.msrb.mxu3 %v5271_v7 }
 0x8cc   : > { %v5264_v58 = vpop.f32.mrf.mxu2 }
 0x8cd   : > { %v5206_v37 = vpop.f32.mrf.mxu0 }
 0x8ce   : > { %v5265_v59 = vadd.f32 %v5264_v58, %v5206_v37 }
 0x8d0   : > { %v5272_v51 = vadd.f32 %v8099_v6, %v5265_v59 }
 0x8d2   : > { %5383 = vxpose.xlu0.b32.start.end [1/1] (short) (narrow) %v5272_v51, 8  ;;  %5274 = vxpose.xlu2.b32.end [2/2] (short) (narrow) %v5272_v51, 8 }
 0x8d3   : > { %5322 = vmatpush.msrb.mxu1 %v5272_v51 }
 0x8d5   : > { %5323 = vmatpush.msrb.mxu1 %v5271_v7 }
 0x8d7   : > { %5378 = vmatpush.msra.mxu1 %v5272_v51 }
 0x93b   : > { %2958 = vrot.lane.b32.xlu2 %v2955_v26, %s8109_s28 }
 0x963   : > { %v5289_v46 = vpop.trf.xlu2 }
 0x964   : > { %7630 = vmatmul.msk.f32.vlgmr.msrb.gmra.mxu1 %vm2820_vm6, %v5289_v46 }
 0x96e   : > { %v5344_v40 = vpop.trf.xlu1 }
 0x96f   : > { %7631 = vmatmul.msk.f32.vlgmr.msra.gmra.mxu1 %vm2876_vm7, %v5344_v40 }
 0x976   : > { %v5399_v36 = vpop.trf.xlu0 }
 0x977   : > { %7632 = vmatmul.msk.f32.vlgmr.msrb.gmra.mxu3 %vm2876_vm7, %v5399_v36 }
 0x995   : > { %v2959_v2 = vpop.permute.xlu2 %2958 }
 0x996   : > { %2962 = vst.msk [vmem:[%s9735_s17] sm:$0xff] %vm2961_vm3, %v2959_v2 }
 0x9e1   : > { %v5325_v44 = vpop.f32.mrf.mxu1 }
 0x9e2   : > { %5440 = vrot.lane.b32.xlu0 %v5325_v44, %s8110_s29 }
 0x9ec   : > { %v5380_v52 = vpop.f32.mrf.mxu1 }
 0x9fa   : > { %v5435_v1 = vpop.f32.mrf.mxu3 }
 0x9fb   : > { %v5438_v63 = vsub.f32 %v5380_v52, %v5435_v1 }
 0x9fd   : > { %5446 = vrot.lane.b32.xlu1 %v5438_v63, %s8111_s14 }
 0xa54   : > { %v5441_v3 = vpop.permute.xlu0 %5440 }
 0xa55   : > { %5444 = vst.msk [vmem:[%s9735_s17] sm:$0xff] %vm5443_vm13, %v5441_v3 }
 0xa6f   : > { %v5447_v16 = vpop.permute.xlu1 %5446 }
 0xa70   : > { %5450 = vst.msk [vmem:[%s9735_s17] sm:$0xff] %vm5449_vm12, %v5447_v16 }
 0xa71 PF: > { %s23_s25 = sadd.s32 1, %s8106_s25  }
 0xa72   : > { %p20_p5 = scmp.ge.s32.totalorder %s23_s25, 4  }
 0xa74   :  { %22 = sbr.rel (!%p20_p5) target bundleno = 1 (0x1), region = 111 }

</bundles_post_ra>
